<compile_context>
chip_gen: v7x
topology: tpu7x:2x2x1
jax: 0.10.0
libtpu: 0.0.40
codegen_flags: <defaults>
</compile_context>

<pallas_src>
import functools
import math

import jax
import jax.numpy as jnp
import numpy as np
from jax import lax
from jax.experimental import pallas as pl
from jax.experimental.pallas import tpu as pltpu


def _layer_norm(x, g, b, eps=1e-6):
    """LayerNorm over the last dim (biased variance, like torch.nn.LayerNorm)."""
    mu = jnp.mean(x, axis=-1, keepdims=True)
    xc = x - mu
    var = jnp.mean(xc * xc, axis=-1, keepdims=True)
    return xc * lax.rsqrt(var + eps) * g + b


def _transformer_encoder_kernel(num_heads,
                                x_ref, pe_ref, bias_ref,
                                ln1g_ref, ln1b_ref, wqkv_ref, bqkv_ref,
                                wo_ref, bo_ref,
                                ln2g_ref, ln2b_ref, wff1_ref, bff1_ref,
                                wff2_ref, bff2_ref,
                                lnfg_ref, lnfb_ref,
                                out_ref):
    """One grid step = one batch element; runs the full L-layer stack."""
    T, D = x_ref.shape[1], x_ref.shape[2]
    L = wqkv_ref.shape[0]
    hd = D // num_heads
    scale = 1.0 / math.sqrt(hd)

    x = x_ref[0] + pe_ref[...]            # (T, D)  positional-encoding add fused
    bias = bias_ref[0]                    # (1, T)  additive key-padding mask

    for l in range(L):                    # static unroll over layers
        # ---------------- self-attention block (pre-norm) ----------------
        y = _layer_norm(x, ln1g_ref[l], ln1b_ref[l])
        qkv = jnp.dot(y, wqkv_ref[l],
                      preferred_element_type=jnp.float32) + bqkv_ref[l]   # (T, 3D)
        q = qkv[:, 0:D] * scale
        k = qkv[:, D:2 * D]
        v = qkv[:, 2 * D:3 * D]
        wo = wo_ref[l]                                                    # (D, D)

        att = jnp.zeros((T, D), jnp.float32)
        for h in range(num_heads):        # static unroll over heads
            sl = slice(h * hd, (h + 1) * hd)
            # scores_h = q_h @ k_h^T   (contract on head dim, no explicit transpose)
            s = lax.dot_general(q[:, sl], k[:, sl], (((1,), (1,)), ((), ())),
                                preferred_element_type=jnp.float32)       # (T, T)
            s = s + bias                                                  # key mask
            m = jnp.max(s, axis=-1, keepdims=True)
            e = jnp.exp(s - m)
            a = e / jnp.sum(e, axis=-1, keepdims=True)
            ctx = jnp.dot(a, v[:, sl],
                          preferred_element_type=jnp.float32)             # (T, hd)
            # fold the output projection per head: concat(ctx_h) @ W_o
            #   == sum_h ctx_h @ W_o[h*hd:(h+1)*hd, :]
            att = att + jnp.dot(ctx, wo[sl, :],
                                preferred_element_type=jnp.float32)       # (T, D)
        x = x + att + bo_ref[l]           # residual (dropout == identity at eval)

        # ------------- position-wise feed-forward block (pre-norm) -------------
        y2 = _layer_norm(x, ln2g_ref[l], ln2b_ref[l])
        h1 = jnp.maximum(
            jnp.dot(y2, wff1_ref[l], preferred_element_type=jnp.float32)
            + bff1_ref[l], 0.0)                                           # (T, F)
        x = x + jnp.dot(h1, wff2_ref[l],
                        preferred_element_type=jnp.float32) + bff2_ref[l]

    out_ref[0] = _layer_norm(x, lnfg_ref[...], lnfb_ref[...])


def positional_encoding(length, size):
    """JoeyNMT PositionalEncoding table, shape (length, size)."""
    position = np.arange(length, dtype=np.float64)[:, None]
    div_term = np.exp(np.arange(0, size, 2, dtype=np.float64)
                      * -(math.log(10000.0) / size))
    pe = np.zeros((length, size), np.float32)
    pe[:, 0::2] = np.sin(position * div_term)
    pe[:, 1::2] = np.cos(position * div_term)
    return jnp.asarray(pe, jnp.float32)


def transformer_encoder_forward(embed_src, src_length, mask, params, num_heads=4):
    """embed_src: (B,T,D) f32, src_length: (B,) int32 (unused, parity with PyTorch),
    mask: (B,1,T) bool key-padding mask (True = valid token).

    Returns (x_norm (B,T,D), None) like TransformerEncoder.forward.
    """
    del src_length  # not used by the PyTorch forward either
    B, T, D = embed_src.shape
    L = params["w_qkv"].shape[0]
    F = params["w_ff1"].shape[-1]

    pe = positional_encoding(T, D)
    # key padding mask -> additive bias (0 where valid, -1e9 where padding)
    bias = jnp.where(mask, 0.0, -1e9).astype(jnp.float32)        # (B, 1, T)

    def full(shape):
        nd = len(shape)
        return pl.BlockSpec(shape, lambda b, _n=nd: (0,) * _n)   # resident weights

    in_specs = [
        pl.BlockSpec((1, T, D), lambda b: (b, 0, 0)),            # x (per-batch block)
        full((T, D)),                                            # positional encoding
        pl.BlockSpec((1, 1, T), lambda b: (b, 0, 0)),            # mask bias
        full((L, 1, D)), full((L, 1, D)),                        # LN1 gamma/beta
        full((L, D, 3 * D)), full((L, 1, 3 * D)),                # fused W_qkv, b_qkv
        full((L, D, D)), full((L, 1, D)),                        # W_o, b_o
        full((L, 1, D)), full((L, 1, D)),                        # LN2 gamma/beta
        full((L, D, F)), full((L, 1, F)),                        # W_ff1, b_ff1
        full((L, F, D)), full((L, 1, D)),                        # W_ff2, b_ff2
        full((1, D)), full((1, D)),                              # final LN gamma/beta
    ]

    out = pl.pallas_call(
        functools.partial(_transformer_encoder_kernel, num_heads),
        out_shape=jax.ShapeDtypeStruct((B, T, D), jnp.float32),
        grid=(B,),
        in_specs=in_specs,
        out_specs=pl.BlockSpec((1, T, D), lambda b: (b, 0, 0)),
        compiler_params=pltpu.CompilerParams(
            dimension_semantics=("parallel",),
            vmem_limit_bytes=64 * 1024 * 1024),
    )(embed_src.astype(jnp.float32), pe, bias,
      params["ln1_g"], params["ln1_b"], params["w_qkv"], params["b_qkv"],
      params["w_o"], params["b_o"],
      params["ln2_g"], params["ln2_b"], params["w_ff1"], params["b_ff1"],
      params["w_ff2"], params["b_ff2"],
      params["ln_f_g"], params["ln_f_b"])

    return out, None   # PyTorch forward returns (x_norm, None)


def init_params(key, hidden_size, ff_size, num_layers):
    """Per-layer weights stacked along a leading L axis (Linear weights transposed)."""
    D, F, L = hidden_size, ff_size, num_layers
    ks = jax.random.split(key, 8)

    def u(k, shape, fan_in):
        s = 1.0 / np.sqrt(fan_in)
        return jax.random.uniform(k, shape, jnp.float32, -s, s)

    return dict(
        ln1_g=jnp.ones((L, 1, D), jnp.float32), ln1_b=jnp.zeros((L, 1, D), jnp.float32),
        ln2_g=jnp.ones((L, 1, D), jnp.float32), ln2_b=jnp.zeros((L, 1, D), jnp.float32),
        ln_f_g=jnp.ones((1, D), jnp.float32),   ln_f_b=jnp.zeros((1, D), jnp.float32),
        w_qkv=u(ks[0], (L, D, 3 * D), D), b_qkv=u(ks[1], (L, 1, 3 * D), D),
        w_o=u(ks[2], (L, D, D), D),       b_o=u(ks[3], (L, 1, D), D),
        w_ff1=u(ks[4], (L, D, F), D),     b_ff1=u(ks[5], (L, 1, F), D),
        w_ff2=u(ks[6], (L, F, D), F),     b_ff2=u(ks[7], (L, 1, D), F),
    )


def reference_forward(embed_src, mask, params, num_heads):
    """Pure-JAX reference of the pre-norm Transformer encoder (correctness check)."""
    B, T, D = embed_src.shape
    L = params["w_qkv"].shape[0]
    hd = D // num_heads
    x = embed_src.astype(jnp.float32) + positional_encoding(T, D)[None]
    bias = jnp.where(mask, 0.0, -1e9).astype(jnp.float32)[:, None, :, :]  # (B,1,1,T)

    def ln(z, g, b):
        mu = z.mean(-1, keepdims=True)
        zc = z - mu
        var = (zc * zc).mean(-1, keepdims=True)
        return zc * lax.rsqrt(var + 1e-6) * g + b

    def split(z):
        return z.reshape(B, T, num_heads, hd).transpose(0, 2, 1, 3)

    for l in range(L):
        y = ln(x, params["ln1_g"][l], params["ln1_b"][l])
        qkv = y @ params["w_qkv"][l] + params["b_qkv"][l]
        q = split(qkv[..., :D]) / math.sqrt(hd)
        k = split(qkv[..., D:2 * D])
        v = split(qkv[..., 2 * D:])
        s = jnp.einsum("bhqd,bhkd->bhqk", q, k) + bias
        a = jax.nn.softmax(s, axis=-1)
        ctx = jnp.einsum("bhqk,bhkd->bhqd", a, v).transpose(0, 2, 1, 3).reshape(B, T, D)
        x = x + ctx @ params["w_o"][l] + params["b_o"][l]
        y2 = ln(x, params["ln2_g"][l], params["ln2_b"][l])
        h1 = jnp.maximum(y2 @ params["w_ff1"][l] + params["b_ff1"][l], 0.0)
        x = x + h1 @ params["w_ff2"][l] + params["b_ff2"][l]
    return ln(x, params["ln_f_g"], params["ln_f_b"])


if __name__ == "__main__":
    # small shapes consistent with the module (hidden must be lane-friendly)
    B, T, D, F, H, L = 2, 16, 128, 256, 4, 2

    key = jax.random.PRNGKey(0)
    k_x, k_p = jax.random.split(key)
    embed_src = jax.random.normal(k_x, (B, T, D), jnp.float32)
    src_length = jnp.array([16, 11], dtype=jnp.int32)                   # (B,)
    # key-padding mask (True where there is a real token), shape (B, 1, T)
    mask = jnp.arange(T)[None, None, :] < src_length[:, None, None]
    params = init_params(k_p, D, F, L)

    output, hidden = transformer_encoder_forward(
        embed_src, src_length, mask, params, num_heads=H)
    jax.block_until_ready(output)

    out_ref = reference_forward(embed_src, mask, params, H)
    np.testing.assert_allclose(np.asarray(output), np.asarray(out_ref),
                               rtol=2e-2, atol=2e-2)

    assert output.shape == (B, T, D)
    assert hidden is None
    print("KERNEL_OK")
</pallas_src>

<mosaic_0001>
module attributes {stable_mosaic.version = 11 : i64} {
  func.func @_transformer_encoder_kernel(%arg0: i32, %arg1: memref<1x16x128xf32, #tpu.memory_space<vmem>>, %arg2: memref<16x128xf32, #tpu.memory_space<vmem>>, %arg3: memref<1x1x16xf32, #tpu.memory_space<vmem>>, %arg4: memref<2x1x128xf32, #tpu.memory_space<vmem>>, %arg5: memref<2x1x128xf32, #tpu.memory_space<vmem>>, %arg6: memref<2x128x384xf32, #tpu.memory_space<vmem>>, %arg7: memref<2x1x384xf32, #tpu.memory_space<vmem>>, %arg8: memref<2x128x128xf32, #tpu.memory_space<vmem>>, %arg9: memref<2x1x128xf32, #tpu.memory_space<vmem>>, %arg10: memref<2x1x128xf32, #tpu.memory_space<vmem>>, %arg11: memref<2x1x128xf32, #tpu.memory_space<vmem>>, %arg12: memref<2x128x256xf32, #tpu.memory_space<vmem>>, %arg13: memref<2x1x256xf32, #tpu.memory_space<vmem>>, %arg14: memref<2x256x128xf32, #tpu.memory_space<vmem>>, %arg15: memref<2x1x128xf32, #tpu.memory_space<vmem>>, %arg16: memref<1x128xf32, #tpu.memory_space<vmem>>, %arg17: memref<1x128xf32, #tpu.memory_space<vmem>>, %arg18: memref<1x16x128xf32, #tpu.memory_space<vmem>>) attributes {dimension_semantics = [#tpu.dimension_semantics<parallel>], iteration_bounds = array<i64: 2>, scalar_prefetch = 0 : i64, scratch_operands = 0 : i64, tpu.core_type = #tpu.core_type<tc>, window_params = [{transform_indices = @transform_0, window_bounds = array<i64: 1, 16, 128>}, {pipeline_mode = #tpu.pipeline_mode<synchronous>, transform_indices = @transform_1, window_bounds = array<i64: 16, 128>}, {transform_indices = @transform_2, window_bounds = array<i64: 1, 1, 16>}, {pipeline_mode = #tpu.pipeline_mode<synchronous>, transform_indices = @transform_3, window_bounds = array<i64: 2, 1, 128>}, {pipeline_mode = #tpu.pipeline_mode<synchronous>, transform_indices = @transform_4, window_bounds = array<i64: 2, 1, 128>}, {pipeline_mode = #tpu.pipeline_mode<synchronous>, transform_indices = @transform_5, window_bounds = array<i64: 2, 128, 384>}, {pipeline_mode = #tpu.pipeline_mode<synchronous>, transform_indices = @transform_6, window_bounds = array<i64: 2, 1, 384>}, {pipeline_mode = #tpu.pipeline_mode<synchronous>, transform_indices = @transform_7, window_bounds = array<i64: 2, 128, 128>}, {pipeline_mode = #tpu.pipeline_mode<synchronous>, transform_indices = @transform_8, window_bounds = array<i64: 2, 1, 128>}, {pipeline_mode = #tpu.pipeline_mode<synchronous>, transform_indices = @transform_9, window_bounds = array<i64: 2, 1, 128>}, {pipeline_mode = #tpu.pipeline_mode<synchronous>, transform_indices = @transform_10, window_bounds = array<i64: 2, 1, 128>}, {pipeline_mode = #tpu.pipeline_mode<synchronous>, transform_indices = @transform_11, window_bounds = array<i64: 2, 128, 256>}, {pipeline_mode = #tpu.pipeline_mode<synchronous>, transform_indices = @transform_12, window_bounds = array<i64: 2, 1, 256>}, {pipeline_mode = #tpu.pipeline_mode<synchronous>, transform_indices = @transform_13, window_bounds = array<i64: 2, 256, 128>}, {pipeline_mode = #tpu.pipeline_mode<synchronous>, transform_indices = @transform_14, window_bounds = array<i64: 2, 1, 128>}, {pipeline_mode = #tpu.pipeline_mode<synchronous>, transform_indices = @transform_15, window_bounds = array<i64: 1, 128>}, {pipeline_mode = #tpu.pipeline_mode<synchronous>, transform_indices = @transform_16, window_bounds = array<i64: 1, 128>}, {transform_indices = @transform_17, window_bounds = array<i64: 1, 16, 128>}]} {
    %c0 = arith.constant 0 : index
    %c0_0 = arith.constant 0 : index
    %c0_1 = arith.constant 0 : index
    %0 = vector.load %arg1[%c0, %c0_0, %c0_1] : memref<1x16x128xf32, #tpu.memory_space<vmem>>, vector<1x16x128xf32>
    %1 = vector.shape_cast %0 : vector<1x16x128xf32> to vector<16x128xf32>
    %c0_2 = arith.constant 0 : index
    %c0_3 = arith.constant 0 : index
    %2 = vector.load %arg2[%c0_2, %c0_3] : memref<16x128xf32, #tpu.memory_space<vmem>>, vector<16x128xf32>
    %3 = arith.addf %1, %2 : vector<16x128xf32>
    %c0_4 = arith.constant 0 : index
    %c0_5 = arith.constant 0 : index
    %c0_6 = arith.constant 0 : index
    %4 = vector.load %arg3[%c0_4, %c0_5, %c0_6] : memref<1x1x16xf32, #tpu.memory_space<vmem>>, vector<1x1x16xf32>
    %5 = vector.shape_cast %4 : vector<1x1x16xf32> to vector<1x16xf32>
    %c0_7 = arith.constant 0 : index
    %c0_8 = arith.constant 0 : index
    %c0_9 = arith.constant 0 : index
    %6 = vector.load %arg4[%c0_7, %c0_8, %c0_9] : memref<2x1x128xf32, #tpu.memory_space<vmem>>, vector<1x1x128xf32>
    %7 = vector.shape_cast %6 : vector<1x1x128xf32> to vector<1x128xf32>
    %c0_10 = arith.constant 0 : index
    %c0_11 = arith.constant 0 : index
    %c0_12 = arith.constant 0 : index
    %8 = vector.load %arg5[%c0_10, %c0_11, %c0_12] : memref<2x1x128xf32, #tpu.memory_space<vmem>>, vector<1x1x128xf32>
    %9 = vector.shape_cast %8 : vector<1x1x128xf32> to vector<1x128xf32>
    %cst = arith.constant dense<0.000000e+00> : vector<16xf32>
    %10 = vector.multi_reduction <add>, %3, %cst [1] : vector<16x128xf32> to vector<16xf32>
    %11 = vector.shape_cast %10 : vector<16xf32> to vector<16x1xf32>
    %cst_13 = arith.constant 1.280000e+02 : f32
    %12 = vector.broadcast %cst_13 : f32 to vector<16x1xf32>
    %13 = arith.divf %11, %12 : vector<16x1xf32>
    %14 = vector.broadcast %13 : vector<16x1xf32> to vector<16x128xf32>
    %15 = arith.subf %3, %14 : vector<16x128xf32>
    %16 = arith.mulf %15, %15 : vector<16x128xf32>
    %cst_14 = arith.constant dense<0.000000e+00> : vector<16xf32>
    %17 = vector.multi_reduction <add>, %16, %cst_14 [1] : vector<16x128xf32> to vector<16xf32>
    %18 = vector.shape_cast %17 : vector<16xf32> to vector<16x1xf32>
    %cst_15 = arith.constant 1.280000e+02 : f32
    %19 = vector.broadcast %cst_15 : f32 to vector<16x1xf32>
    %20 = arith.divf %18, %19 : vector<16x1xf32>
    %cst_16 = arith.constant 9.99999997E-7 : f32
    %21 = vector.broadcast %cst_16 : f32 to vector<16x1xf32>
    %22 = arith.addf %20, %21 : vector<16x1xf32>
    %23 = math.rsqrt %22 : vector<16x1xf32>
    %24 = vector.broadcast %23 : vector<16x1xf32> to vector<16x128xf32>
    %25 = arith.mulf %15, %24 : vector<16x128xf32>
    %26 = vector.broadcast %7 : vector<1x128xf32> to vector<16x128xf32>
    %27 = arith.mulf %25, %26 : vector<16x128xf32>
    %28 = vector.broadcast %9 : vector<1x128xf32> to vector<16x128xf32>
    %29 = arith.addf %27, %28 : vector<16x128xf32>
    %c0_17 = arith.constant 0 : index
    %c0_18 = arith.constant 0 : index
    %c0_19 = arith.constant 0 : index
    %30 = vector.load %arg6[%c0_17, %c0_18, %c0_19] : memref<2x128x384xf32, #tpu.memory_space<vmem>>, vector<1x128x384xf32>
    %31 = vector.shape_cast %30 : vector<1x128x384xf32> to vector<128x384xf32>
    %cst_20 = arith.constant dense<0.000000e+00> : vector<16x384xf32>
    %32 = tpu.matmul %29, %31, %cst_20 {dimension_numbers = #tpu.dot_dimension_numbers<[1], [0], [0], [1], [0, 0, 1, 1], [], []>} : vector<16x128xf32>, vector<128x384xf32>, vector<16x384xf32> -> vector<16x384xf32>
    %c0_21 = arith.constant 0 : index
    %c0_22 = arith.constant 0 : index
    %c0_23 = arith.constant 0 : index
    %33 = vector.load %arg7[%c0_21, %c0_22, %c0_23] : memref<2x1x384xf32, #tpu.memory_space<vmem>>, vector<1x1x384xf32>
    %34 = vector.shape_cast %33 : vector<1x1x384xf32> to vector<1x384xf32>
    %35 = vector.broadcast %34 : vector<1x384xf32> to vector<16x384xf32>
    %36 = arith.addf %32, %35 : vector<16x384xf32>
    %37 = vector.extract_strided_slice %36 {offsets = [0, 0], sizes = [16, 128], strides = [1, 1]} : vector<16x384xf32> to vector<16x128xf32>
    %cst_24 = arith.constant 0.176776692 : f32
    %38 = vector.broadcast %cst_24 : f32 to vector<16x128xf32>
    %39 = arith.mulf %37, %38 : vector<16x128xf32>
    %40 = vector.extract_strided_slice %36 {offsets = [0, 128], sizes = [16, 128], strides = [1, 1]} : vector<16x384xf32> to vector<16x128xf32>
    %41 = vector.extract_strided_slice %36 {offsets = [0, 256], sizes = [16, 128], strides = [1, 1]} : vector<16x384xf32> to vector<16x128xf32>
    %c0_25 = arith.constant 0 : index
    %c0_26 = arith.constant 0 : index
    %c0_27 = arith.constant 0 : index
    %42 = vector.load %arg8[%c0_25, %c0_26, %c0_27] : memref<2x128x128xf32, #tpu.memory_space<vmem>>, vector<1x128x128xf32>
    %43 = vector.shape_cast %42 : vector<1x128x128xf32> to vector<128x128xf32>
    %cst_28 = arith.constant 0.000000e+00 : f32
    %44 = vector.broadcast %cst_28 : f32 to vector<16x128xf32>
    %45 = vector.extract_strided_slice %39 {offsets = [0, 0], sizes = [16, 32], strides = [1, 1]} : vector<16x128xf32> to vector<16x32xf32>
    %46 = vector.extract_strided_slice %40 {offsets = [0, 0], sizes = [16, 32], strides = [1, 1]} : vector<16x128xf32> to vector<16x32xf32>
    %cst_29 = arith.constant dense<0.000000e+00> : vector<16x16xf32>
    %47 = tpu.matmul %45, %46, %cst_29 {dimension_numbers = #tpu.dot_dimension_numbers<[1], [1], [0], [0], [0, 0, 1, 0], [], []>} : vector<16x32xf32>, vector<16x32xf32>, vector<16x16xf32> -> vector<16x16xf32>
    %48 = vector.broadcast %5 : vector<1x16xf32> to vector<16x16xf32>
    %49 = arith.addf %47, %48 : vector<16x16xf32>
    %cst_30 = arith.constant dense<0xFF800000> : vector<16xf32>
    %50 = vector.multi_reduction <maximumf>, %49, %cst_30 [1] : vector<16x16xf32> to vector<16xf32>
    %51 = vector.shape_cast %50 : vector<16xf32> to vector<16x1xf32>
    %52 = vector.broadcast %51 : vector<16x1xf32> to vector<16x16xf32>
    %53 = arith.subf %49, %52 : vector<16x16xf32>
    %54 = math.exp %53 : vector<16x16xf32>
    %cst_31 = arith.constant dense<0.000000e+00> : vector<16xf32>
    %55 = vector.multi_reduction <add>, %54, %cst_31 [1] : vector<16x16xf32> to vector<16xf32>
    %56 = vector.shape_cast %55 : vector<16xf32> to vector<16x1xf32>
    %57 = vector.broadcast %56 : vector<16x1xf32> to vector<16x16xf32>
    %58 = arith.divf %54, %57 : vector<16x16xf32>
    %59 = vector.extract_strided_slice %41 {offsets = [0, 0], sizes = [16, 32], strides = [1, 1]} : vector<16x128xf32> to vector<16x32xf32>
    %cst_32 = arith.constant dense<0.000000e+00> : vector<16x32xf32>
    %60 = tpu.matmul %58, %59, %cst_32 {dimension_numbers = #tpu.dot_dimension_numbers<[1], [0], [0], [1], [0, 0, 1, 1], [], []>} : vector<16x16xf32>, vector<16x32xf32>, vector<16x32xf32> -> vector<16x32xf32>
    %61 = vector.extract_strided_slice %43 {offsets = [0, 0], sizes = [32, 128], strides = [1, 1]} : vector<128x128xf32> to vector<32x128xf32>
    %cst_33 = arith.constant dense<0.000000e+00> : vector<16x128xf32>
    %62 = tpu.matmul %60, %61, %cst_33 {dimension_numbers = #tpu.dot_dimension_numbers<[1], [0], [0], [1], [0, 0, 1, 1], [], []>} : vector<16x32xf32>, vector<32x128xf32>, vector<16x128xf32> -> vector<16x128xf32>
    %63 = arith.addf %44, %62 : vector<16x128xf32>
    %64 = vector.extract_strided_slice %39 {offsets = [0, 32], sizes = [16, 32], strides = [1, 1]} : vector<16x128xf32> to vector<16x32xf32>
    %65 = vector.extract_strided_slice %40 {offsets = [0, 32], sizes = [16, 32], strides = [1, 1]} : vector<16x128xf32> to vector<16x32xf32>
    %cst_34 = arith.constant dense<0.000000e+00> : vector<16x16xf32>
    %66 = tpu.matmul %64, %65, %cst_34 {dimension_numbers = #tpu.dot_dimension_numbers<[1], [1], [0], [0], [0, 0, 1, 0], [], []>} : vector<16x32xf32>, vector<16x32xf32>, vector<16x16xf32> -> vector<16x16xf32>
    %67 = vector.broadcast %5 : vector<1x16xf32> to vector<16x16xf32>
    %68 = arith.addf %66, %67 : vector<16x16xf32>
    %cst_35 = arith.constant dense<0xFF800000> : vector<16xf32>
    %69 = vector.multi_reduction <maximumf>, %68, %cst_35 [1] : vector<16x16xf32> to vector<16xf32>
    %70 = vector.shape_cast %69 : vector<16xf32> to vector<16x1xf32>
    %71 = vector.broadcast %70 : vector<16x1xf32> to vector<16x16xf32>
    %72 = arith.subf %68, %71 : vector<16x16xf32>
    %73 = math.exp %72 : vector<16x16xf32>
    %cst_36 = arith.constant dense<0.000000e+00> : vector<16xf32>
    %74 = vector.multi_reduction <add>, %73, %cst_36 [1] : vector<16x16xf32> to vector<16xf32>
    %75 = vector.shape_cast %74 : vector<16xf32> to vector<16x1xf32>
    %76 = vector.broadcast %75 : vector<16x1xf32> to vector<16x16xf32>
    %77 = arith.divf %73, %76 : vector<16x16xf32>
    %78 = vector.extract_strided_slice %41 {offsets = [0, 32], sizes = [16, 32], strides = [1, 1]} : vector<16x128xf32> to vector<16x32xf32>
    %cst_37 = arith.constant dense<0.000000e+00> : vector<16x32xf32>
    %79 = tpu.matmul %77, %78, %cst_37 {dimension_numbers = #tpu.dot_dimension_numbers<[1], [0], [0], [1], [0, 0, 1, 1], [], []>} : vector<16x16xf32>, vector<16x32xf32>, vector<16x32xf32> -> vector<16x32xf32>
    %80 = vector.extract_strided_slice %43 {offsets = [32, 0], sizes = [32, 128], strides = [1, 1]} : vector<128x128xf32> to vector<32x128xf32>
    %cst_38 = arith.constant dense<0.000000e+00> : vector<16x128xf32>
    %81 = tpu.matmul %79, %80, %cst_38 {dimension_numbers = #tpu.dot_dimension_numbers<[1], [0], [0], [1], [0, 0, 1, 1], [], []>} : vector<16x32xf32>, vector<32x128xf32>, vector<16x128xf32> -> vector<16x128xf32>
    %82 = arith.addf %63, %81 : vector<16x128xf32>
    %83 = vector.extract_strided_slice %39 {offsets = [0, 64], sizes = [16, 32], strides = [1, 1]} : vector<16x128xf32> to vector<16x32xf32>
    %84 = vector.extract_strided_slice %40 {offsets = [0, 64], sizes = [16, 32], strides = [1, 1]} : vector<16x128xf32> to vector<16x32xf32>
    %cst_39 = arith.constant dense<0.000000e+00> : vector<16x16xf32>
    %85 = tpu.matmul %83, %84, %cst_39 {dimension_numbers = #tpu.dot_dimension_numbers<[1], [1], [0], [0], [0, 0, 1, 0], [], []>} : vector<16x32xf32>, vector<16x32xf32>, vector<16x16xf32> -> vector<16x16xf32>
    %86 = vector.broadcast %5 : vector<1x16xf32> to vector<16x16xf32>
    %87 = arith.addf %85, %86 : vector<16x16xf32>
    %cst_40 = arith.constant dense<0xFF800000> : vector<16xf32>
    %88 = vector.multi_reduction <maximumf>, %87, %cst_40 [1] : vector<16x16xf32> to vector<16xf32>
    %89 = vector.shape_cast %88 : vector<16xf32> to vector<16x1xf32>
    %90 = vector.broadcast %89 : vector<16x1xf32> to vector<16x16xf32>
    %91 = arith.subf %87, %90 : vector<16x16xf32>
    %92 = math.exp %91 : vector<16x16xf32>
    %cst_41 = arith.constant dense<0.000000e+00> : vector<16xf32>
    %93 = vector.multi_reduction <add>, %92, %cst_41 [1] : vector<16x16xf32> to vector<16xf32>
    %94 = vector.shape_cast %93 : vector<16xf32> to vector<16x1xf32>
    %95 = vector.broadcast %94 : vector<16x1xf32> to vector<16x16xf32>
    %96 = arith.divf %92, %95 : vector<16x16xf32>
    %97 = vector.extract_strided_slice %41 {offsets = [0, 64], sizes = [16, 32], strides = [1, 1]} : vector<16x128xf32> to vector<16x32xf32>
    %cst_42 = arith.constant dense<0.000000e+00> : vector<16x32xf32>
    %98 = tpu.matmul %96, %97, %cst_42 {dimension_numbers = #tpu.dot_dimension_numbers<[1], [0], [0], [1], [0, 0, 1, 1], [], []>} : vector<16x16xf32>, vector<16x32xf32>, vector<16x32xf32> -> vector<16x32xf32>
    %99 = vector.extract_strided_slice %43 {offsets = [64, 0], sizes = [32, 128], strides = [1, 1]} : vector<128x128xf32> to vector<32x128xf32>
    %cst_43 = arith.constant dense<0.000000e+00> : vector<16x128xf32>
    %100 = tpu.matmul %98, %99, %cst_43 {dimension_numbers = #tpu.dot_dimension_numbers<[1], [0], [0], [1], [0, 0, 1, 1], [], []>} : vector<16x32xf32>, vector<32x128xf32>, vector<16x128xf32> -> vector<16x128xf32>
    %101 = arith.addf %82, %100 : vector<16x128xf32>
    %102 = vector.extract_strided_slice %39 {offsets = [0, 96], sizes = [16, 32], strides = [1, 1]} : vector<16x128xf32> to vector<16x32xf32>
    %103 = vector.extract_strided_slice %40 {offsets = [0, 96], sizes = [16, 32], strides = [1, 1]} : vector<16x128xf32> to vector<16x32xf32>
    %cst_44 = arith.constant dense<0.000000e+00> : vector<16x16xf32>
    %104 = tpu.matmul %102, %103, %cst_44 {dimension_numbers = #tpu.dot_dimension_numbers<[1], [1], [0], [0], [0, 0, 1, 0], [], []>} : vector<16x32xf32>, vector<16x32xf32>, vector<16x16xf32> -> vector<16x16xf32>
    %105 = vector.broadcast %5 : vector<1x16xf32> to vector<16x16xf32>
    %106 = arith.addf %104, %105 : vector<16x16xf32>
    %cst_45 = arith.constant dense<0xFF800000> : vector<16xf32>
    %107 = vector.multi_reduction <maximumf>, %106, %cst_45 [1] : vector<16x16xf32> to vector<16xf32>
    %108 = vector.shape_cast %107 : vector<16xf32> to vector<16x1xf32>
    %109 = vector.broadcast %108 : vector<16x1xf32> to vector<16x16xf32>
    %110 = arith.subf %106, %109 : vector<16x16xf32>
    %111 = math.exp %110 : vector<16x16xf32>
    %cst_46 = arith.constant dense<0.000000e+00> : vector<16xf32>
    %112 = vector.multi_reduction <add>, %111, %cst_46 [1] : vector<16x16xf32> to vector<16xf32>
    %113 = vector.shape_cast %112 : vector<16xf32> to vector<16x1xf32>
    %114 = vector.broadcast %113 : vector<16x1xf32> to vector<16x16xf32>
    %115 = arith.divf %111, %114 : vector<16x16xf32>
    %116 = vector.extract_strided_slice %41 {offsets = [0, 96], sizes = [16, 32], strides = [1, 1]} : vector<16x128xf32> to vector<16x32xf32>
    %cst_47 = arith.constant dense<0.000000e+00> : vector<16x32xf32>
    %117 = tpu.matmul %115, %116, %cst_47 {dimension_numbers = #tpu.dot_dimension_numbers<[1], [0], [0], [1], [0, 0, 1, 1], [], []>} : vector<16x16xf32>, vector<16x32xf32>, vector<16x32xf32> -> vector<16x32xf32>
    %118 = vector.extract_strided_slice %43 {offsets = [96, 0], sizes = [32, 128], strides = [1, 1]} : vector<128x128xf32> to vector<32x128xf32>
    %cst_48 = arith.constant dense<0.000000e+00> : vector<16x128xf32>
    %119 = tpu.matmul %117, %118, %cst_48 {dimension_numbers = #tpu.dot_dimension_numbers<[1], [0], [0], [1], [0, 0, 1, 1], [], []>} : vector<16x32xf32>, vector<32x128xf32>, vector<16x128xf32> -> vector<16x128xf32>
    %120 = arith.addf %101, %119 : vector<16x128xf32>
    %121 = arith.addf %3, %120 : vector<16x128xf32>
    %c0_49 = arith.constant 0 : index
    %c0_50 = arith.constant 0 : index
    %c0_51 = arith.constant 0 : index
    %122 = vector.load %arg9[%c0_49, %c0_50, %c0_51] : memref<2x1x128xf32, #tpu.memory_space<vmem>>, vector<1x1x128xf32>
    %123 = vector.shape_cast %122 : vector<1x1x128xf32> to vector<1x128xf32>
    %124 = vector.broadcast %123 : vector<1x128xf32> to vector<16x128xf32>
    %125 = arith.addf %121, %124 : vector<16x128xf32>
    %c0_52 = arith.constant 0 : index
    %c0_53 = arith.constant 0 : index
    %c0_54 = arith.constant 0 : index
    %126 = vector.load %arg10[%c0_52, %c0_53, %c0_54] : memref<2x1x128xf32, #tpu.memory_space<vmem>>, vector<1x1x128xf32>
    %127 = vector.shape_cast %126 : vector<1x1x128xf32> to vector<1x128xf32>
    %c0_55 = arith.constant 0 : index
    %c0_56 = arith.constant 0 : index
    %c0_57 = arith.constant 0 : index
    %128 = vector.load %arg11[%c0_55, %c0_56, %c0_57] : memref<2x1x128xf32, #tpu.memory_space<vmem>>, vector<1x1x128xf32>
    %129 = vector.shape_cast %128 : vector<1x1x128xf32> to vector<1x128xf32>
    %cst_58 = arith.constant dense<0.000000e+00> : vector<16xf32>
    %130 = vector.multi_reduction <add>, %125, %cst_58 [1] : vector<16x128xf32> to vector<16xf32>
    %131 = vector.shape_cast %130 : vector<16xf32> to vector<16x1xf32>
    %cst_59 = arith.constant 1.280000e+02 : f32
    %132 = vector.broadcast %cst_59 : f32 to vector<16x1xf32>
    %133 = arith.divf %131, %132 : vector<16x1xf32>
    %134 = vector.broadcast %133 : vector<16x1xf32> to vector<16x128xf32>
    %135 = arith.subf %125, %134 : vector<16x128xf32>
    %136 = arith.mulf %135, %135 : vector<16x128xf32>
    %cst_60 = arith.constant dense<0.000000e+00> : vector<16xf32>
    %137 = vector.multi_reduction <add>, %136, %cst_60 [1] : vector<16x128xf32> to vector<16xf32>
    %138 = vector.shape_cast %137 : vector<16xf32> to vector<16x1xf32>
    %cst_61 = arith.constant 1.280000e+02 : f32
    %139 = vector.broadcast %cst_61 : f32 to vector<16x1xf32>
    %140 = arith.divf %138, %139 : vector<16x1xf32>
    %cst_62 = arith.constant 9.99999997E-7 : f32
    %141 = vector.broadcast %cst_62 : f32 to vector<16x1xf32>
    %142 = arith.addf %140, %141 : vector<16x1xf32>
    %143 = math.rsqrt %142 : vector<16x1xf32>
    %144 = vector.broadcast %143 : vector<16x1xf32> to vector<16x128xf32>
    %145 = arith.mulf %135, %144 : vector<16x128xf32>
    %146 = vector.broadcast %127 : vector<1x128xf32> to vector<16x128xf32>
    %147 = arith.mulf %145, %146 : vector<16x128xf32>
    %148 = vector.broadcast %129 : vector<1x128xf32> to vector<16x128xf32>
    %149 = arith.addf %147, %148 : vector<16x128xf32>
    %c0_63 = arith.constant 0 : index
    %c0_64 = arith.constant 0 : index
    %c0_65 = arith.constant 0 : index
    %150 = vector.load %arg12[%c0_63, %c0_64, %c0_65] : memref<2x128x256xf32, #tpu.memory_space<vmem>>, vector<1x128x256xf32>
    %151 = vector.shape_cast %150 : vector<1x128x256xf32> to vector<128x256xf32>
    %cst_66 = arith.constant dense<0.000000e+00> : vector<16x256xf32>
    %152 = tpu.matmul %149, %151, %cst_66 {dimension_numbers = #tpu.dot_dimension_numbers<[1], [0], [0], [1], [0, 0, 1, 1], [], []>} : vector<16x128xf32>, vector<128x256xf32>, vector<16x256xf32> -> vector<16x256xf32>
    %c0_67 = arith.constant 0 : index
    %c0_68 = arith.constant 0 : index
    %c0_69 = arith.constant 0 : index
    %153 = vector.load %arg13[%c0_67, %c0_68, %c0_69] : memref<2x1x256xf32, #tpu.memory_space<vmem>>, vector<1x1x256xf32>
    %154 = vector.shape_cast %153 : vector<1x1x256xf32> to vector<1x256xf32>
    %155 = vector.broadcast %154 : vector<1x256xf32> to vector<16x256xf32>
    %156 = arith.addf %152, %155 : vector<16x256xf32>
    %cst_70 = arith.constant 0.000000e+00 : f32
    %157 = vector.broadcast %cst_70 : f32 to vector<16x256xf32>
    %158 = arith.maximumf %156, %157 : vector<16x256xf32>
    %c0_71 = arith.constant 0 : index
    %c0_72 = arith.constant 0 : index
    %c0_73 = arith.constant 0 : index
    %159 = vector.load %arg14[%c0_71, %c0_72, %c0_73] : memref<2x256x128xf32, #tpu.memory_space<vmem>>, vector<1x256x128xf32>
    %160 = vector.shape_cast %159 : vector<1x256x128xf32> to vector<256x128xf32>
    %cst_74 = arith.constant dense<0.000000e+00> : vector<16x128xf32>
    %161 = tpu.matmul %158, %160, %cst_74 {dimension_numbers = #tpu.dot_dimension_numbers<[1], [0], [0], [1], [0, 0, 1, 1], [], []>} : vector<16x256xf32>, vector<256x128xf32>, vector<16x128xf32> -> vector<16x128xf32>
    %162 = arith.addf %125, %161 : vector<16x128xf32>
    %c0_75 = arith.constant 0 : index
    %c0_76 = arith.constant 0 : index
    %c0_77 = arith.constant 0 : index
    %163 = vector.load %arg15[%c0_75, %c0_76, %c0_77] : memref<2x1x128xf32, #tpu.memory_space<vmem>>, vector<1x1x128xf32>
    %164 = vector.shape_cast %163 : vector<1x1x128xf32> to vector<1x128xf32>
    %165 = vector.broadcast %164 : vector<1x128xf32> to vector<16x128xf32>
    %166 = arith.addf %162, %165 : vector<16x128xf32>
    %c1 = arith.constant 1 : index
    %c0_78 = arith.constant 0 : index
    %c0_79 = arith.constant 0 : index
    %167 = vector.load %arg4[%c1, %c0_78, %c0_79] : memref<2x1x128xf32, #tpu.memory_space<vmem>>, vector<1x1x128xf32>
    %168 = vector.shape_cast %167 : vector<1x1x128xf32> to vector<1x128xf32>
    %c1_80 = arith.constant 1 : index
    %c0_81 = arith.constant 0 : index
    %c0_82 = arith.constant 0 : index
    %169 = vector.load %arg5[%c1_80, %c0_81, %c0_82] : memref<2x1x128xf32, #tpu.memory_space<vmem>>, vector<1x1x128xf32>
    %170 = vector.shape_cast %169 : vector<1x1x128xf32> to vector<1x128xf32>
    %cst_83 = arith.constant dense<0.000000e+00> : vector<16xf32>
    %171 = vector.multi_reduction <add>, %166, %cst_83 [1] : vector<16x128xf32> to vector<16xf32>
    %172 = vector.shape_cast %171 : vector<16xf32> to vector<16x1xf32>
    %cst_84 = arith.constant 1.280000e+02 : f32
    %173 = vector.broadcast %cst_84 : f32 to vector<16x1xf32>
    %174 = arith.divf %172, %173 : vector<16x1xf32>
    %175 = vector.broadcast %174 : vector<16x1xf32> to vector<16x128xf32>
    %176 = arith.subf %166, %175 : vector<16x128xf32>
    %177 = arith.mulf %176, %176 : vector<16x128xf32>
    %cst_85 = arith.constant dense<0.000000e+00> : vector<16xf32>
    %178 = vector.multi_reduction <add>, %177, %cst_85 [1] : vector<16x128xf32> to vector<16xf32>
    %179 = vector.shape_cast %178 : vector<16xf32> to vector<16x1xf32>
    %cst_86 = arith.constant 1.280000e+02 : f32
    %180 = vector.broadcast %cst_86 : f32 to vector<16x1xf32>
    %181 = arith.divf %179, %180 : vector<16x1xf32>
    %cst_87 = arith.constant 9.99999997E-7 : f32
    %182 = vector.broadcast %cst_87 : f32 to vector<16x1xf32>
    %183 = arith.addf %181, %182 : vector<16x1xf32>
    %184 = math.rsqrt %183 : vector<16x1xf32>
    %185 = vector.broadcast %184 : vector<16x1xf32> to vector<16x128xf32>
    %186 = arith.mulf %176, %185 : vector<16x128xf32>
    %187 = vector.broadcast %168 : vector<1x128xf32> to vector<16x128xf32>
    %188 = arith.mulf %186, %187 : vector<16x128xf32>
    %189 = vector.broadcast %170 : vector<1x128xf32> to vector<16x128xf32>
    %190 = arith.addf %188, %189 : vector<16x128xf32>
    %c1_88 = arith.constant 1 : index
    %c0_89 = arith.constant 0 : index
    %c0_90 = arith.constant 0 : index
    %191 = vector.load %arg6[%c1_88, %c0_89, %c0_90] : memref<2x128x384xf32, #tpu.memory_space<vmem>>, vector<1x128x384xf32>
    %192 = vector.shape_cast %191 : vector<1x128x384xf32> to vector<128x384xf32>
    %cst_91 = arith.constant dense<0.000000e+00> : vector<16x384xf32>
    %193 = tpu.matmul %190, %192, %cst_91 {dimension_numbers = #tpu.dot_dimension_numbers<[1], [0], [0], [1], [0, 0, 1, 1], [], []>} : vector<16x128xf32>, vector<128x384xf32>, vector<16x384xf32> -> vector<16x384xf32>
    %c1_92 = arith.constant 1 : index
    %c0_93 = arith.constant 0 : index
    %c0_94 = arith.constant 0 : index
    %194 = vector.load %arg7[%c1_92, %c0_93, %c0_94] : memref<2x1x384xf32, #tpu.memory_space<vmem>>, vector<1x1x384xf32>
    %195 = vector.shape_cast %194 : vector<1x1x384xf32> to vector<1x384xf32>
    %196 = vector.broadcast %195 : vector<1x384xf32> to vector<16x384xf32>
    %197 = arith.addf %193, %196 : vector<16x384xf32>
    %198 = vector.extract_strided_slice %197 {offsets = [0, 0], sizes = [16, 128], strides = [1, 1]} : vector<16x384xf32> to vector<16x128xf32>
    %cst_95 = arith.constant 0.176776692 : f32
    %199 = vector.broadcast %cst_95 : f32 to vector<16x128xf32>
    %200 = arith.mulf %198, %199 : vector<16x128xf32>
    %201 = vector.extract_strided_slice %197 {offsets = [0, 128], sizes = [16, 128], strides = [1, 1]} : vector<16x384xf32> to vector<16x128xf32>
    %202 = vector.extract_strided_slice %197 {offsets = [0, 256], sizes = [16, 128], strides = [1, 1]} : vector<16x384xf32> to vector<16x128xf32>
    %c1_96 = arith.constant 1 : index
    %c0_97 = arith.constant 0 : index
    %c0_98 = arith.constant 0 : index
    %203 = vector.load %arg8[%c1_96, %c0_97, %c0_98] : memref<2x128x128xf32, #tpu.memory_space<vmem>>, vector<1x128x128xf32>
    %204 = vector.shape_cast %203 : vector<1x128x128xf32> to vector<128x128xf32>
    %cst_99 = arith.constant 0.000000e+00 : f32
    %205 = vector.broadcast %cst_99 : f32 to vector<16x128xf32>
    %206 = vector.extract_strided_slice %200 {offsets = [0, 0], sizes = [16, 32], strides = [1, 1]} : vector<16x128xf32> to vector<16x32xf32>
    %207 = vector.extract_strided_slice %201 {offsets = [0, 0], sizes = [16, 32], strides = [1, 1]} : vector<16x128xf32> to vector<16x32xf32>
    %cst_100 = arith.constant dense<0.000000e+00> : vector<16x16xf32>
    %208 = tpu.matmul %206, %207, %cst_100 {dimension_numbers = #tpu.dot_dimension_numbers<[1], [1], [0], [0], [0, 0, 1, 0], [], []>} : vector<16x32xf32>, vector<16x32xf32>, vector<16x16xf32> -> vector<16x16xf32>
    %209 = vector.broadcast %5 : vector<1x16xf32> to vector<16x16xf32>
    %210 = arith.addf %208, %209 : vector<16x16xf32>
    %cst_101 = arith.constant dense<0xFF800000> : vector<16xf32>
    %211 = vector.multi_reduction <maximumf>, %210, %cst_101 [1] : vector<16x16xf32> to vector<16xf32>
    %212 = vector.shape_cast %211 : vector<16xf32> to vector<16x1xf32>
    %213 = vector.broadcast %212 : vector<16x1xf32> to vector<16x16xf32>
    %214 = arith.subf %210, %213 : vector<16x16xf32>
    %215 = math.exp %214 : vector<16x16xf32>
    %cst_102 = arith.constant dense<0.000000e+00> : vector<16xf32>
    %216 = vector.multi_reduction <add>, %215, %cst_102 [1] : vector<16x16xf32> to vector<16xf32>
    %217 = vector.shape_cast %216 : vector<16xf32> to vector<16x1xf32>
    %218 = vector.broadcast %217 : vector<16x1xf32> to vector<16x16xf32>
    %219 = arith.divf %215, %218 : vector<16x16xf32>
    %220 = vector.extract_strided_slice %202 {offsets = [0, 0], sizes = [16, 32], strides = [1, 1]} : vector<16x128xf32> to vector<16x32xf32>
    %cst_103 = arith.constant dense<0.000000e+00> : vector<16x32xf32>
    %221 = tpu.matmul %219, %220, %cst_103 {dimension_numbers = #tpu.dot_dimension_numbers<[1], [0], [0], [1], [0, 0, 1, 1], [], []>} : vector<16x16xf32>, vector<16x32xf32>, vector<16x32xf32> -> vector<16x32xf32>
    %222 = vector.extract_strided_slice %204 {offsets = [0, 0], sizes = [32, 128], strides = [1, 1]} : vector<128x128xf32> to vector<32x128xf32>
    %cst_104 = arith.constant dense<0.000000e+00> : vector<16x128xf32>
    %223 = tpu.matmul %221, %222, %cst_104 {dimension_numbers = #tpu.dot_dimension_numbers<[1], [0], [0], [1], [0, 0, 1, 1], [], []>} : vector<16x32xf32>, vector<32x128xf32>, vector<16x128xf32> -> vector<16x128xf32>
    %224 = arith.addf %205, %223 : vector<16x128xf32>
    %225 = vector.extract_strided_slice %200 {offsets = [0, 32], sizes = [16, 32], strides = [1, 1]} : vector<16x128xf32> to vector<16x32xf32>
    %226 = vector.extract_strided_slice %201 {offsets = [0, 32], sizes = [16, 32], strides = [1, 1]} : vector<16x128xf32> to vector<16x32xf32>
    %cst_105 = arith.constant dense<0.000000e+00> : vector<16x16xf32>
    %227 = tpu.matmul %225, %226, %cst_105 {dimension_numbers = #tpu.dot_dimension_numbers<[1], [1], [0], [0], [0, 0, 1, 0], [], []>} : vector<16x32xf32>, vector<16x32xf32>, vector<16x16xf32> -> vector<16x16xf32>
    %228 = vector.broadcast %5 : vector<1x16xf32> to vector<16x16xf32>
    %229 = arith.addf %227, %228 : vector<16x16xf32>
    %cst_106 = arith.constant dense<0xFF800000> : vector<16xf32>
    %230 = vector.multi_reduction <maximumf>, %229, %cst_106 [1] : vector<16x16xf32> to vector<16xf32>
    %231 = vector.shape_cast %230 : vector<16xf32> to vector<16x1xf32>
    %232 = vector.broadcast %231 : vector<16x1xf32> to vector<16x16xf32>
    %233 = arith.subf %229, %232 : vector<16x16xf32>
    %234 = math.exp %233 : vector<16x16xf32>
    %cst_107 = arith.constant dense<0.000000e+00> : vector<16xf32>
    %235 = vector.multi_reduction <add>, %234, %cst_107 [1] : vector<16x16xf32> to vector<16xf32>
    %236 = vector.shape_cast %235 : vector<16xf32> to vector<16x1xf32>
    %237 = vector.broadcast %236 : vector<16x1xf32> to vector<16x16xf32>
    %238 = arith.divf %234, %237 : vector<16x16xf32>
    %239 = vector.extract_strided_slice %202 {offsets = [0, 32], sizes = [16, 32], strides = [1, 1]} : vector<16x128xf32> to vector<16x32xf32>
    %cst_108 = arith.constant dense<0.000000e+00> : vector<16x32xf32>
    %240 = tpu.matmul %238, %239, %cst_108 {dimension_numbers = #tpu.dot_dimension_numbers<[1], [0], [0], [1], [0, 0, 1, 1], [], []>} : vector<16x16xf32>, vector<16x32xf32>, vector<16x32xf32> -> vector<16x32xf32>
    %241 = vector.extract_strided_slice %204 {offsets = [32, 0], sizes = [32, 128], strides = [1, 1]} : vector<128x128xf32> to vector<32x128xf32>
    %cst_109 = arith.constant dense<0.000000e+00> : vector<16x128xf32>
    %242 = tpu.matmul %240, %241, %cst_109 {dimension_numbers = #tpu.dot_dimension_numbers<[1], [0], [0], [1], [0, 0, 1, 1], [], []>} : vector<16x32xf32>, vector<32x128xf32>, vector<16x128xf32> -> vector<16x128xf32>
    %243 = arith.addf %224, %242 : vector<16x128xf32>
    %244 = vector.extract_strided_slice %200 {offsets = [0, 64], sizes = [16, 32], strides = [1, 1]} : vector<16x128xf32> to vector<16x32xf32>
    %245 = vector.extract_strided_slice %201 {offsets = [0, 64], sizes = [16, 32], strides = [1, 1]} : vector<16x128xf32> to vector<16x32xf32>
    %cst_110 = arith.constant dense<0.000000e+00> : vector<16x16xf32>
    %246 = tpu.matmul %244, %245, %cst_110 {dimension_numbers = #tpu.dot_dimension_numbers<[1], [1], [0], [0], [0, 0, 1, 0], [], []>} : vector<16x32xf32>, vector<16x32xf32>, vector<16x16xf32> -> vector<16x16xf32>
    %247 = vector.broadcast %5 : vector<1x16xf32> to vector<16x16xf32>
    %248 = arith.addf %246, %247 : vector<16x16xf32>
    %cst_111 = arith.constant dense<0xFF800000> : vector<16xf32>
    %249 = vector.multi_reduction <maximumf>, %248, %cst_111 [1] : vector<16x16xf32> to vector<16xf32>
    %250 = vector.shape_cast %249 : vector<16xf32> to vector<16x1xf32>
    %251 = vector.broadcast %250 : vector<16x1xf32> to vector<16x16xf32>
    %252 = arith.subf %248, %251 : vector<16x16xf32>
    %253 = math.exp %252 : vector<16x16xf32>
    %cst_112 = arith.constant dense<0.000000e+00> : vector<16xf32>
    %254 = vector.multi_reduction <add>, %253, %cst_112 [1] : vector<16x16xf32> to vector<16xf32>
    %255 = vector.shape_cast %254 : vector<16xf32> to vector<16x1xf32>
    %256 = vector.broadcast %255 : vector<16x1xf32> to vector<16x16xf32>
    %257 = arith.divf %253, %256 : vector<16x16xf32>
    %258 = vector.extract_strided_slice %202 {offsets = [0, 64], sizes = [16, 32], strides = [1, 1]} : vector<16x128xf32> to vector<16x32xf32>
    %cst_113 = arith.constant dense<0.000000e+00> : vector<16x32xf32>
    %259 = tpu.matmul %257, %258, %cst_113 {dimension_numbers = #tpu.dot_dimension_numbers<[1], [0], [0], [1], [0, 0, 1, 1], [], []>} : vector<16x16xf32>, vector<16x32xf32>, vector<16x32xf32> -> vector<16x32xf32>
    %260 = vector.extract_strided_slice %204 {offsets = [64, 0], sizes = [32, 128], strides = [1, 1]} : vector<128x128xf32> to vector<32x128xf32>
    %cst_114 = arith.constant dense<0.000000e+00> : vector<16x128xf32>
    %261 = tpu.matmul %259, %260, %cst_114 {dimension_numbers = #tpu.dot_dimension_numbers<[1], [0], [0], [1], [0, 0, 1, 1], [], []>} : vector<16x32xf32>, vector<32x128xf32>, vector<16x128xf32> -> vector<16x128xf32>
    %262 = arith.addf %243, %261 : vector<16x128xf32>
    %263 = vector.extract_strided_slice %200 {offsets = [0, 96], sizes = [16, 32], strides = [1, 1]} : vector<16x128xf32> to vector<16x32xf32>
    %264 = vector.extract_strided_slice %201 {offsets = [0, 96], sizes = [16, 32], strides = [1, 1]} : vector<16x128xf32> to vector<16x32xf32>
    %cst_115 = arith.constant dense<0.000000e+00> : vector<16x16xf32>
    %265 = tpu.matmul %263, %264, %cst_115 {dimension_numbers = #tpu.dot_dimension_numbers<[1], [1], [0], [0], [0, 0, 1, 0], [], []>} : vector<16x32xf32>, vector<16x32xf32>, vector<16x16xf32> -> vector<16x16xf32>
    %266 = vector.broadcast %5 : vector<1x16xf32> to vector<16x16xf32>
    %267 = arith.addf %265, %266 : vector<16x16xf32>
    %cst_116 = arith.constant dense<0xFF800000> : vector<16xf32>
    %268 = vector.multi_reduction <maximumf>, %267, %cst_116 [1] : vector<16x16xf32> to vector<16xf32>
    %269 = vector.shape_cast %268 : vector<16xf32> to vector<16x1xf32>
    %270 = vector.broadcast %269 : vector<16x1xf32> to vector<16x16xf32>
    %271 = arith.subf %267, %270 : vector<16x16xf32>
    %272 = math.exp %271 : vector<16x16xf32>
    %cst_117 = arith.constant dense<0.000000e+00> : vector<16xf32>
    %273 = vector.multi_reduction <add>, %272, %cst_117 [1] : vector<16x16xf32> to vector<16xf32>
    %274 = vector.shape_cast %273 : vector<16xf32> to vector<16x1xf32>
    %275 = vector.broadcast %274 : vector<16x1xf32> to vector<16x16xf32>
    %276 = arith.divf %272, %275 : vector<16x16xf32>
    %277 = vector.extract_strided_slice %202 {offsets = [0, 96], sizes = [16, 32], strides = [1, 1]} : vector<16x128xf32> to vector<16x32xf32>
    %cst_118 = arith.constant dense<0.000000e+00> : vector<16x32xf32>
    %278 = tpu.matmul %276, %277, %cst_118 {dimension_numbers = #tpu.dot_dimension_numbers<[1], [0], [0], [1], [0, 0, 1, 1], [], []>} : vector<16x16xf32>, vector<16x32xf32>, vector<16x32xf32> -> vector<16x32xf32>
    %279 = vector.extract_strided_slice %204 {offsets = [96, 0], sizes = [32, 128], strides = [1, 1]} : vector<128x128xf32> to vector<32x128xf32>
    %cst_119 = arith.constant dense<0.000000e+00> : vector<16x128xf32>
    %280 = tpu.matmul %278, %279, %cst_119 {dimension_numbers = #tpu.dot_dimension_numbers<[1], [0], [0], [1], [0, 0, 1, 1], [], []>} : vector<16x32xf32>, vector<32x128xf32>, vector<16x128xf32> -> vector<16x128xf32>
    %281 = arith.addf %262, %280 : vector<16x128xf32>
    %282 = arith.addf %166, %281 : vector<16x128xf32>
    %c1_120 = arith.constant 1 : index
    %c0_121 = arith.constant 0 : index
    %c0_122 = arith.constant 0 : index
    %283 = vector.load %arg9[%c1_120, %c0_121, %c0_122] : memref<2x1x128xf32, #tpu.memory_space<vmem>>, vector<1x1x128xf32>
    %284 = vector.shape_cast %283 : vector<1x1x128xf32> to vector<1x128xf32>
    %285 = vector.broadcast %284 : vector<1x128xf32> to vector<16x128xf32>
    %286 = arith.addf %282, %285 : vector<16x128xf32>
    %c1_123 = arith.constant 1 : index
    %c0_124 = arith.constant 0 : index
    %c0_125 = arith.constant 0 : index
    %287 = vector.load %arg10[%c1_123, %c0_124, %c0_125] : memref<2x1x128xf32, #tpu.memory_space<vmem>>, vector<1x1x128xf32>
    %288 = vector.shape_cast %287 : vector<1x1x128xf32> to vector<1x128xf32>
    %c1_126 = arith.constant 1 : index
    %c0_127 = arith.constant 0 : index
    %c0_128 = arith.constant 0 : index
    %289 = vector.load %arg11[%c1_126, %c0_127, %c0_128] : memref<2x1x128xf32, #tpu.memory_space<vmem>>, vector<1x1x128xf32>
    %290 = vector.shape_cast %289 : vector<1x1x128xf32> to vector<1x128xf32>
    %cst_129 = arith.constant dense<0.000000e+00> : vector<16xf32>
    %291 = vector.multi_reduction <add>, %286, %cst_129 [1] : vector<16x128xf32> to vector<16xf32>
    %292 = vector.shape_cast %291 : vector<16xf32> to vector<16x1xf32>
    %cst_130 = arith.constant 1.280000e+02 : f32
    %293 = vector.broadcast %cst_130 : f32 to vector<16x1xf32>
    %294 = arith.divf %292, %293 : vector<16x1xf32>
    %295 = vector.broadcast %294 : vector<16x1xf32> to vector<16x128xf32>
    %296 = arith.subf %286, %295 : vector<16x128xf32>
    %297 = arith.mulf %296, %296 : vector<16x128xf32>
    %cst_131 = arith.constant dense<0.000000e+00> : vector<16xf32>
    %298 = vector.multi_reduction <add>, %297, %cst_131 [1] : vector<16x128xf32> to vector<16xf32>
    %299 = vector.shape_cast %298 : vector<16xf32> to vector<16x1xf32>
    %cst_132 = arith.constant 1.280000e+02 : f32
    %300 = vector.broadcast %cst_132 : f32 to vector<16x1xf32>
    %301 = arith.divf %299, %300 : vector<16x1xf32>
    %cst_133 = arith.constant 9.99999997E-7 : f32
    %302 = vector.broadcast %cst_133 : f32 to vector<16x1xf32>
    %303 = arith.addf %301, %302 : vector<16x1xf32>
    %304 = math.rsqrt %303 : vector<16x1xf32>
    %305 = vector.broadcast %304 : vector<16x1xf32> to vector<16x128xf32>
    %306 = arith.mulf %296, %305 : vector<16x128xf32>
    %307 = vector.broadcast %288 : vector<1x128xf32> to vector<16x128xf32>
    %308 = arith.mulf %306, %307 : vector<16x128xf32>
    %309 = vector.broadcast %290 : vector<1x128xf32> to vector<16x128xf32>
    %310 = arith.addf %308, %309 : vector<16x128xf32>
    %c1_134 = arith.constant 1 : index
    %c0_135 = arith.constant 0 : index
    %c0_136 = arith.constant 0 : index
    %311 = vector.load %arg12[%c1_134, %c0_135, %c0_136] : memref<2x128x256xf32, #tpu.memory_space<vmem>>, vector<1x128x256xf32>
    %312 = vector.shape_cast %311 : vector<1x128x256xf32> to vector<128x256xf32>
    %cst_137 = arith.constant dense<0.000000e+00> : vector<16x256xf32>
    %313 = tpu.matmul %310, %312, %cst_137 {dimension_numbers = #tpu.dot_dimension_numbers<[1], [0], [0], [1], [0, 0, 1, 1], [], []>} : vector<16x128xf32>, vector<128x256xf32>, vector<16x256xf32> -> vector<16x256xf32>
    %c1_138 = arith.constant 1 : index
    %c0_139 = arith.constant 0 : index
    %c0_140 = arith.constant 0 : index
    %314 = vector.load %arg13[%c1_138, %c0_139, %c0_140] : memref<2x1x256xf32, #tpu.memory_space<vmem>>, vector<1x1x256xf32>
    %315 = vector.shape_cast %314 : vector<1x1x256xf32> to vector<1x256xf32>
    %316 = vector.broadcast %315 : vector<1x256xf32> to vector<16x256xf32>
    %317 = arith.addf %313, %316 : vector<16x256xf32>
    %cst_141 = arith.constant 0.000000e+00 : f32
    %318 = vector.broadcast %cst_141 : f32 to vector<16x256xf32>
    %319 = arith.maximumf %317, %318 : vector<16x256xf32>
    %c1_142 = arith.constant 1 : index
    %c0_143 = arith.constant 0 : index
    %c0_144 = arith.constant 0 : index
    %320 = vector.load %arg14[%c1_142, %c0_143, %c0_144] : memref<2x256x128xf32, #tpu.memory_space<vmem>>, vector<1x256x128xf32>
    %321 = vector.shape_cast %320 : vector<1x256x128xf32> to vector<256x128xf32>
    %cst_145 = arith.constant dense<0.000000e+00> : vector<16x128xf32>
    %322 = tpu.matmul %319, %321, %cst_145 {dimension_numbers = #tpu.dot_dimension_numbers<[1], [0], [0], [1], [0, 0, 1, 1], [], []>} : vector<16x256xf32>, vector<256x128xf32>, vector<16x128xf32> -> vector<16x128xf32>
    %323 = arith.addf %286, %322 : vector<16x128xf32>
    %c1_146 = arith.constant 1 : index
    %c0_147 = arith.constant 0 : index
    %c0_148 = arith.constant 0 : index
    %324 = vector.load %arg15[%c1_146, %c0_147, %c0_148] : memref<2x1x128xf32, #tpu.memory_space<vmem>>, vector<1x1x128xf32>
    %325 = vector.shape_cast %324 : vector<1x1x128xf32> to vector<1x128xf32>
    %326 = vector.broadcast %325 : vector<1x128xf32> to vector<16x128xf32>
    %327 = arith.addf %323, %326 : vector<16x128xf32>
    %c0_149 = arith.constant 0 : index
    %c0_150 = arith.constant 0 : index
    %328 = vector.load %arg16[%c0_149, %c0_150] : memref<1x128xf32, #tpu.memory_space<vmem>>, vector<1x128xf32>
    %c0_151 = arith.constant 0 : index
    %c0_152 = arith.constant 0 : index
    %329 = vector.load %arg17[%c0_151, %c0_152] : memref<1x128xf32, #tpu.memory_space<vmem>>, vector<1x128xf32>
    %cst_153 = arith.constant dense<0.000000e+00> : vector<16xf32>
    %330 = vector.multi_reduction <add>, %327, %cst_153 [1] : vector<16x128xf32> to vector<16xf32>
    %331 = vector.shape_cast %330 : vector<16xf32> to vector<16x1xf32>
    %cst_154 = arith.constant 1.280000e+02 : f32
    %332 = vector.broadcast %cst_154 : f32 to vector<16x1xf32>
    %333 = arith.divf %331, %332 : vector<16x1xf32>
    %334 = vector.broadcast %333 : vector<16x1xf32> to vector<16x128xf32>
    %335 = arith.subf %327, %334 : vector<16x128xf32>
    %336 = arith.mulf %335, %335 : vector<16x128xf32>
    %cst_155 = arith.constant dense<0.000000e+00> : vector<16xf32>
    %337 = vector.multi_reduction <add>, %336, %cst_155 [1] : vector<16x128xf32> to vector<16xf32>
    %338 = vector.shape_cast %337 : vector<16xf32> to vector<16x1xf32>
    %cst_156 = arith.constant 1.280000e+02 : f32
    %339 = vector.broadcast %cst_156 : f32 to vector<16x1xf32>
    %340 = arith.divf %338, %339 : vector<16x1xf32>
    %cst_157 = arith.constant 9.99999997E-7 : f32
    %341 = vector.broadcast %cst_157 : f32 to vector<16x1xf32>
    %342 = arith.addf %340, %341 : vector<16x1xf32>
    %343 = math.rsqrt %342 : vector<16x1xf32>
    %344 = vector.broadcast %343 : vector<16x1xf32> to vector<16x128xf32>
    %345 = arith.mulf %335, %344 : vector<16x128xf32>
    %346 = vector.broadcast %328 : vector<1x128xf32> to vector<16x128xf32>
    %347 = arith.mulf %345, %346 : vector<16x128xf32>
    %348 = vector.broadcast %329 : vector<1x128xf32> to vector<16x128xf32>
    %349 = arith.addf %347, %348 : vector<16x128xf32>
    %c0_158 = arith.constant 0 : index
    %c0_159 = arith.constant 0 : index
    %c0_160 = arith.constant 0 : index
    %350 = vector.load %arg18[%c0_158, %c0_159, %c0_160] : memref<1x16x128xf32, #tpu.memory_space<vmem>>, vector<1x16x128xf32>
    %351 = vector.shape_cast %350 : vector<1x16x128xf32> to vector<16x128xf32>
    %352 = vector.shape_cast %349 : vector<16x128xf32> to vector<1x16x128xf32>
    tpu.vector_store %arg18[%c0_158, %c0_159, %c0_160], %352 {strides = array<i32>} : memref<1x16x128xf32, #tpu.memory_space<vmem>>, vector<1x16x128xf32>,
    return
  }
  func.func @transform_0(%arg0: i32) -> (i32, i32, i32) {
    %c0_i32 = arith.constant 0 : i32
    %c0_i32_0 = arith.constant 0 : i32
    %c0_i32_1 = arith.constant 0 : i32
    return %arg0, %c0_i32, %c0_i32_0 : i32, i32, i32
  }
  func.func @transform_1(%arg0: i32) -> (i32, i32) {
    %c0_i32 = arith.constant 0 : i32
    %c0_i32_0 = arith.constant 0 : i32
    %c0_i32_1 = arith.constant 0 : i32
    return %c0_i32, %c0_i32_0 : i32, i32
  }
  func.func @transform_2(%arg0: i32) -> (i32, i32, i32) {
    %c0_i32 = arith.constant 0 : i32
    %c0_i32_0 = arith.constant 0 : i32
    %c0_i32_1 = arith.constant 0 : i32
    return %arg0, %c0_i32, %c0_i32_0 : i32, i32, i32
  }
  func.func @transform_3(%arg0: i32) -> (i32, i32, i32) {
    %c0_i32 = arith.constant 0 : i32
    %c0_i32_0 = arith.constant 0 : i32
    %c0_i32_1 = arith.constant 0 : i32
    %c0_i32_2 = arith.constant 0 : i32
    return %c0_i32, %c0_i32_0, %c0_i32_1 : i32, i32, i32
  }
  func.func @transform_4(%arg0: i32) -> (i32, i32, i32) {
    %c0_i32 = arith.constant 0 : i32
    %c0_i32_0 = arith.constant 0 : i32
    %c0_i32_1 = arith.constant 0 : i32
    %c0_i32_2 = arith.constant 0 : i32
    return %c0_i32, %c0_i32_0, %c0_i32_1 : i32, i32, i32
  }
  func.func @transform_5(%arg0: i32) -> (i32, i32, i32) {
    %c0_i32 = arith.constant 0 : i32
    %c0_i32_0 = arith.constant 0 : i32
    %c0_i32_1 = arith.constant 0 : i32
    %c0_i32_2 = arith.constant 0 : i32
    return %c0_i32, %c0_i32_0, %c0_i32_1 : i32, i32, i32
  }
  func.func @transform_6(%arg0: i32) -> (i32, i32, i32) {
    %c0_i32 = arith.constant 0 : i32
    %c0_i32_0 = arith.constant 0 : i32
    %c0_i32_1 = arith.constant 0 : i32
    %c0_i32_2 = arith.constant 0 : i32
    return %c0_i32, %c0_i32_0, %c0_i32_1 : i32, i32, i32
  }
  func.func @transform_7(%arg0: i32) -> (i32, i32, i32) {
    %c0_i32 = arith.constant 0 : i32
    %c0_i32_0 = arith.constant 0 : i32
    %c0_i32_1 = arith.constant 0 : i32
    %c0_i32_2 = arith.constant 0 : i32
    return %c0_i32, %c0_i32_0, %c0_i32_1 : i32, i32, i32
  }
  func.func @transform_8(%arg0: i32) -> (i32, i32, i32) {
    %c0_i32 = arith.constant 0 : i32
    %c0_i32_0 = arith.constant 0 : i32
    %c0_i32_1 = arith.constant 0 : i32
    %c0_i32_2 = arith.constant 0 : i32
    return %c0_i32, %c0_i32_0, %c0_i32_1 : i32, i32, i32
  }
  func.func @transform_9(%arg0: i32) -> (i32, i32, i32) {
    %c0_i32 = arith.constant 0 : i32
    %c0_i32_0 = arith.constant 0 : i32
    %c0_i32_1 = arith.constant 0 : i32
    %c0_i32_2 = arith.constant 0 : i32
    return %c0_i32, %c0_i32_0, %c0_i32_1 : i32, i32, i32
  }
  func.func @transform_10(%arg0: i32) -> (i32, i32, i32) {
    %c0_i32 = arith.constant 0 : i32
    %c0_i32_0 = arith.constant 0 : i32
    %c0_i32_1 = arith.constant 0 : i32
    %c0_i32_2 = arith.constant 0 : i32
    return %c0_i32, %c0_i32_0, %c0_i32_1 : i32, i32, i32
  }
  func.func @transform_11(%arg0: i32) -> (i32, i32, i32) {
    %c0_i32 = arith.constant 0 : i32
    %c0_i32_0 = arith.constant 0 : i32
    %c0_i32_1 = arith.constant 0 : i32
    %c0_i32_2 = arith.constant 0 : i32
    return %c0_i32, %c0_i32_0, %c0_i32_1 : i32, i32, i32
  }
  func.func @transform_12(%arg0: i32) -> (i32, i32, i32) {
    %c0_i32 = arith.constant 0 : i32
    %c0_i32_0 = arith.constant 0 : i32
    %c0_i32_1 = arith.constant 0 : i32
    %c0_i32_2 = arith.constant 0 : i32
    return %c0_i32, %c0_i32_0, %c0_i32_1 : i32, i32, i32
  }
  func.func @transform_13(%arg0: i32) -> (i32, i32, i32) {
    %c0_i32 = arith.constant 0 : i32
    %c0_i32_0 = arith.constant 0 : i32
    %c0_i32_1 = arith.constant 0 : i32
    %c0_i32_2 = arith.constant 0 : i32
    return %c0_i32, %c0_i32_0, %c0_i32_1 : i32, i32, i32
  }
  func.func @transform_14(%arg0: i32) -> (i32, i32, i32) {
    %c0_i32 = arith.constant 0 : i32
    %c0_i32_0 = arith.constant 0 : i32
    %c0_i32_1 = arith.constant 0 : i32
    %c0_i32_2 = arith.constant 0 : i32
    return %c0_i32, %c0_i32_0, %c0_i32_1 : i32, i32, i32
  }
  func.func @transform_15(%arg0: i32) -> (i32, i32) {
    %c0_i32 = arith.constant 0 : i32
    %c0_i32_0 = arith.constant 0 : i32
    %c0_i32_1 = arith.constant 0 : i32
    return %c0_i32, %c0_i32_0 : i32, i32
  }
  func.func @transform_16(%arg0: i32) -> (i32, i32) {
    %c0_i32 = arith.constant 0 : i32
    %c0_i32_0 = arith.constant 0 : i32
    %c0_i32_1 = arith.constant 0 : i32
    return %c0_i32, %c0_i32_0 : i32, i32
  }
  func.func @transform_17(%arg0: i32) -> (i32, i32, i32) {
    %c0_i32 = arith.constant 0 : i32
    %c0_i32_0 = arith.constant 0 : i32
    %c0_i32_1 = arith.constant 0 : i32
    return %arg0, %c0_i32, %c0_i32_0 : i32, i32, i32
  }
}

</mosaic_0001>

<bundles_post_ra>
// kernel: tpu_custom_call.1
= control target key start
LH: loop header
LB: loop body
LE: loop exit
PB: predicated region body
PF: predicated region fallthrough
CT: control target
= control target key end

     0   :  { %s7507_s0 = inlined_call_operand.hbm [shape: f32[2,16,128], index: 0, kind: input, shape index: {}]   ;;  %s7508_s1 = inlined_call_operand.hbm [shape: f32[16,128], index: 1, kind: input, shape index: {}]   ;;  %s7509_s2 = inlined_call_operand.hbm [shape: f32[2,1,16], index: 2, kind: input, shape index: {}]   ;;  %s7510_s3 = inlined_call_operand.hbm [shape: f32[2,1,128], index: 3, kind: input, shape index: {}]   ;;  %s7511_s4 = inlined_call_operand.hbm [shape: f32[2,1,128], index: 4, kind: input, shape index: {}]   ;;  %s7512_s5 = inlined_call_operand.hbm [shape: f32[2,128,384], index: 5, kind: input, shape index: {}]   ;;  %s7513_s6 = inlined_call_operand.hbm [shape: f32[2,1,384], index: 6, kind: input, shape index: {}]   ;;  %s7514_s7 = inlined_call_operand.hbm [shape: f32[2,128,128], index: 7, kind: input, shape index: {}]   ;;  %s7515_s8 = inlined_call_operand.hbm [shape: f32[2,1,128], index: 8, kind: input, shape index: {}]   ;;  %s7516_s9 = inlined_call_operand.hbm [shape: f32[2,1,128], index: 9, kind: input, shape index: {}]   ;;  %s7517_s10 = inlined_call_operand.hbm [shape: f32[2,1,128], index: 10, kind: input, shape index: {}]   ;;  %s7518_s11 = inlined_call_operand.hbm [shape: f32[2,128,256], index: 11, kind: input, shape index: {}]   ;;  %s7519_s12 = inlined_call_operand.hbm [shape: f32[2,1,256], index: 12, kind: input, shape index: {}]   ;;  %s7520_s13 = inlined_call_operand.hbm [shape: f32[2,256,128], index: 13, kind: input, shape index: {}]   ;;  %s7521_s14 = inlined_call_operand.hbm [shape: f32[2,1,128], index: 14, kind: input, shape index: {}]   ;;  %s7522_s15 = inlined_call_operand.hbm [shape: f32[1,128], index: 15, kind: input, shape index: {}]   ;;  %s7523_s16 = inlined_call_operand.hbm [shape: f32[1,128], index: 16, kind: input, shape index: {}]   ;;  %s7524_s17 = inlined_call_operand.hbm [shape: f32[2,16,128], index: 17, kind: output, shape index: {}]  }
   0x1   :  { %7561 = sst [smem:[#allocation48_spill]] %s7507_s0 }
   0x2   :  { %7562 = sst [smem:[#allocation49_spill]] %s7508_s1 }
   0x3   :  { %7563 = sst [smem:[#allocation50_spill]] %s7509_s2 }
   0x4   :  { %7564 = sst [smem:[#allocation51_spill]] %s7510_s3 }
   0x5   :  { %7565 = sst [smem:[#allocation52_spill]] %s7511_s4 }
   0x6   :  { %7566 = sst [smem:[#allocation53_spill]] %s7513_s6 }
   0x7   :  { %7567 = sst [smem:[#allocation54_spill]] %s7515_s8 }
   0x8   :  { %7568 = sst [smem:[#allocation55_spill]] %s7516_s9 }
   0x9   :  { %7569 = sst [smem:[#allocation56_spill]] %s7517_s10 }
   0xa   :  { %7570 = sst [smem:[#allocation57_spill]] %s7518_s11 }
   0xb   :  { %7571 = sst [smem:[#allocation58_spill]] %s7519_s12 }
   0xc   :  { %7572 = sst [smem:[#allocation59_spill]] %s7520_s13 }
   0xd   :  { %7573 = sst [smem:[#allocation60_spill]] %s7521_s14 }
   0xe   :  { %7574 = sst [smem:[#allocation61_spill]] %s7522_s15 }
   0xf   :  { %7575 = sst [smem:[#allocation62_spill]] %s7523_s16 }
  0x10   :  { %7576 = sst [smem:[#allocation63_spill]] %s7524_s17 }
  0x11   :  { %22 = vsyncpa [#allocation3], 0 }
  0x12   :  { %24 = vsyncpa [#allocation3 + $0x1], 0 }
  0x13   :  { %25 = vsyncpa [#allocation6], 0 }
  0x14   :  { %26 = vsyncpa [#allocation10], 0 }
  0x15   :  { %27 = vsyncpa [#allocation13], 0 }
  0x16   :  { %28 = vsyncpa [#allocation16], 0 }
  0x17   :  { %29 = vsyncpa [#allocation19], 0 }
  0x18   :  { %30 = vsyncpa [#allocation22], 0 }
  0x19   :  { %31 = vsyncpa [#allocation25], 0 }
  0x1a   :  { %32 = vsyncpa [#allocation28], 0 }
  0x1b   :  { %33 = vsyncpa [#allocation4], 0 }
  0x1c   :  { %35 = vsyncpa [#allocation4 + $0x1], 0  ;;  %s6616_s24 = smov 0   ;;  %s6618_s25 = smov 0  }
  0x1d   :  { %s6620_s26 = smov 0   ;;  %s6622_s27 = smov 0  }
  0x1e LB: > { %7577 = sst [smem:[#allocation42_spill]] %s6477_s24  ;;  %s6491_s28 = smov [#allocation5]   ;;  %s6489_s27 = sphi %s6622_s27, %s7645_s27   ;;  %s6485_s26 = sphi %s6620_s26, %s7649_s26   ;;  %s6481_s25 = sphi %s6618_s25, %s7648_s25   ;;  %s6477_s24 = sphi %s6616_s24, %s7647_s24  }
  0x1f   : > { %s451_s29 = sshll.u32 %s6491_s28, 4  ;;  %s6637_s0 = sadd.s32 4294967295, %s6489_s27   ;;  %s6642_s29 = int_to_ptr.vmem [resolvable:$true] %s451_s29 }
  0x20   : > { %p4508_p0 = scmp.ge.s32.totalorder %s6489_s27, 1  ;;  %p7537_p1 = scmp.eq.s32.totalorder %s6637_s0, 0 }
  0x21   : > { %p439_p2 = scmp.lt.s32.totalorder %s6489_s27, 3  ;;  %s6492_s19 = smov [#allocation9]  }
  0x22   : > { %s477_s1 = sshll.u32 %s6492_s19, 4  ;;  %s6493_s20 = smov [#allocation12]   ;;  %s6657_s1 = int_to_ptr.vmem [resolvable:$true] %s477_s1 }
  0x23   : > { %p6644_p3 = pnand %p4508_p0, %p439_p2  ;;  %s6659_s21 = sshll.u32 %s6493_s20, 4  ;;  %s504_s21 = int_to_ptr.vmem [resolvable:$true] %s6659_s21 }
  0x24   : > { %s7581_s28 = sld [smem:[#allocation49_spill]] }
  0x25   : > { %s7578_s30 = scalar_select %p6644_p3, 1, 0 }
  0x26   : > { %p5605_p5 = pneg %p6644_p3 }
  0x27   : > { %7579 = sst [smem:[#allocation43_spill]] %s7578_s30 }
  0x28   : > { %p6653_p6 = pnand %p5605_p5, %p7537_p1 }
  0x2a   : > { %s7580_s18 = scalar_select %p6653_p6, 1, 0 }
  0x2b   : > { %s5903_s17 = scalar_lea.hbm %s7581_s28, 256  ;;  %p6669_p8 = pneg %p6653_p6 }
  0x2c   : > { %p5904_p7 = scmp.ne.s32.totalorder %s7581_s28, %s5903_s17  ;;  %p5910_p11 = scmp.lt.u32.totalorder %s5903_s17, %s7581_s28 }
  0x2e   : > { %p5906_p9 = pnand %p6669_p8, %p5904_p7 }
  0x30   : > { %p5907_p10 = pneg %p5906_p9 }
  0x32   : > { %p5912_p12 = pnand %p5910_p11, %p5907_p10 }
  0x34   : > { %5915 = shalt.err (!%p5912_p12)
}
  0x35   : > { %s5916_s2 = scalar_lea.vmem %s6642_s29, 256  ;;  %p5924_p5 = scmp.lt.s32.totalorder %s6642_s29, %s6642_s29 }
  0x36   : > { %p5917_p13 = scmp.ne.s32.totalorder %s6642_s29, %s5916_s2  ;;  %p5925_p4 = scmp.lt.s32.totalorder %s5916_s2, %s5916_s2 }
  0x38   : > { %p5919_p0 = pnand %p5917_p13, %p6669_p8  ;;  %p5926_p7 = por %p5925_p4, %p5924_p5 }
  0x3a   : > { %p5920_p2 = pneg %p5919_p0 }
  0x3c   : > { %p5927_p9 = pnand %p5926_p7, %p5920_p2 }
  0x3e   : > { %5930 = shalt.err (!%p5927_p9)
}
  0x3f   : > { %s7535_s30 = smov 128   ;;  %s7539_s17 = smov 8  }
  0x40   : > { %5608 = dma.hbm_to_vmem [thread:$0]  (!%p6653_p6), %s7581_s28, 256, %s6642_s29, [#allocation6], %s7535_s30, %s7535_s30, %s7539_s17  }
  0x41   : > { %s7583_s4 = sld [smem:[#allocation52_spill]] }
  0x47   : > { %s5931_s2 = scalar_lea.hbm %s7583_s4, 32 }
  0x48   : > { %p5932_p4 = scmp.ne.s32.totalorder %s7583_s4, %s5931_s2  ;;  %p5938_p12 = scmp.lt.u32.totalorder %s5931_s2, %s7583_s4 }
  0x4a   : > { %p5934_p10 = pnand %p5932_p4, %p6669_p8 }
  0x4c   : > { %p5935_p11 = pneg %p5934_p10 }
  0x4e   : > { %p5940_p13 = pnand %p5938_p12, %p5935_p11 }
  0x50   : > { %5943 = shalt.err (!%p5940_p13)
}
  0x51   : > { %s5944_s29 = scalar_lea.vmem %s6657_s1, 32  ;;  %p5952_p7 = scmp.lt.s32.totalorder %s6657_s1, %s6657_s1 }
  0x52   : > { %p5945_p0 = scmp.ne.s32.totalorder %s6657_s1, %s5944_s29  ;;  %p5953_p9 = scmp.lt.s32.totalorder %s5944_s29, %s5944_s29 }
  0x54   : > { %p5947_p2 = pnand %p5945_p0, %p6669_p8  ;;  %p5954_p4 = por %p5953_p9, %p5952_p7 }
  0x56   : > { %p5948_p5 = pneg %p5947_p2 }
  0x58   : > { %p5955_p10 = pnand %p5954_p4, %p5948_p5 }
  0x5a   : > { %5958 = shalt.err (!%p5955_p10)
}
  0x5b   : > { %s7541_s13 = smov 16   ;;  %s7543_s9 = smov 1  }
  0x5c   : > { %5614 = dma.hbm_to_vmem [thread:$0]  (!%p6653_p6), %s7583_s4, 32, %s6657_s1, [#allocation10], %s7541_s13, %s7541_s13, %s7543_s9  }
  0x5d   : > { %s7584_s6 = sld [smem:[#allocation53_spill]] }
  0x63   : > { %s5959_s19 = scalar_lea.hbm %s7584_s6, 96 }
  0x64   : > { %p5960_p11 = scmp.ne.s32.totalorder %s7584_s6, %s5959_s19  ;;  %p5966_p0 = scmp.lt.u32.totalorder %s5959_s19, %s7584_s6 }
  0x66   : > { %p5962_p12 = pnand %p5960_p11, %p6669_p8 }
  0x68   : > { %p5963_p13 = pneg %p5962_p12 }
  0x6a   : > { %p5968_p2 = pnand %p5966_p0, %p5963_p13 }
  0x6c   : > { %5971 = shalt.err (!%p5968_p2)
}
  0x6d   : > { %s5972_s11 = scalar_lea.vmem %s504_s21, 96  ;;  %p5980_p4 = scmp.lt.s32.totalorder %s504_s21, %s504_s21 }
  0x6e   : > { %p5973_p5 = scmp.ne.s32.totalorder %s504_s21, %s5972_s11  ;;  %p5981_p10 = scmp.lt.s32.totalorder %s5972_s11, %s5972_s11 }
  0x70   : > { %p5975_p7 = pnand %p5973_p5, %p6669_p8  ;;  %p5982_p1 = por %p5981_p10, %p5980_p4 }
  0x72   : > { %p5976_p9 = pneg %p5975_p7 }
  0x74   : > { %p5983_p3 = pnand %p5982_p1, %p5976_p9 }
  0x76   : > { %5986 = shalt.err (!%p5983_p3)
}
  0x77   : > { %s6498_s1 = smov 48   ;;  %s6499_s15 = smov 3  }
  0x78   : > { %5620 = dma.hbm_to_vmem [thread:$0]  (!%p6653_p6), %s7584_s6, 96, %s504_s21, [#allocation13], %s6498_s1, %s6498_s1, %s6499_s15  }
  0x79   : > { %s6500_s23 = smov [#allocation15]   ;;  %s6501_s20 = smov [#allocation18]  }
  0x7a   : > { %s529_s19 = sshll.u32 %s6500_s23, 4  ;;  %s555_s2 = sshll.u32 %s6501_s20, 4  ;;  %s530_s19 = int_to_ptr.vmem [resolvable:$true] %s529_s19  ;;  %s556_s2 = int_to_ptr.vmem [resolvable:$true] %s555_s2 }
  0x7b   : > { %s7585_s8 = sld [smem:[#allocation54_spill]] }
  0x81   : > { %s5987_s11 = scalar_lea.hbm %s7585_s8, 32 }
  0x82   : > { %p5988_p1 = scmp.ne.s32.totalorder %s7585_s8, %s5987_s11  ;;  %p5994_p12 = scmp.lt.u32.totalorder %s5987_s11, %s7585_s8 }
  0x84   : > { %p5990_p3 = pnand %p5988_p1, %p6669_p8 }
  0x86   : > { %p5991_p11 = pneg %p5990_p3 }
  0x88   : > { %p5996_p13 = pnand %p5994_p12, %p5991_p11 }
  0x8a   : > { %5999 = shalt.err (!%p5996_p13)
}
  0x8b   : > { %s6000_s21 = scalar_lea.vmem %s530_s19, 32  ;;  %p6008_p7 = scmp.lt.s32.totalorder %s530_s19, %s530_s19 }
  0x8c   : > { %p6001_p0 = scmp.ne.s32.totalorder %s530_s19, %s6000_s21  ;;  %p6009_p9 = scmp.lt.s32.totalorder %s6000_s21, %s6000_s21 }
  0x8e   : > { %p6003_p2 = pnand %p6001_p0, %p6669_p8  ;;  %p6010_p4 = por %p6009_p9, %p6008_p7 }
  0x90   : > { %p6004_p5 = pneg %p6003_p2 }
  0x92   : > { %p6011_p10 = pnand %p6010_p4, %p6004_p5 }
  0x94   : > { %6014 = shalt.err (!%p6011_p10)
}
  0x95   : > { %s7586_s17 = smov 1   ;;  %s7587_s13 = smov 16  }
  0x96   : > { %5626 = dma.hbm_to_vmem [thread:$0]  (!%p6653_p6), %s7585_s8, 32, %s530_s19, [#allocation16], %s7587_s13, %s7587_s13, %s7586_s17  }
  0x97   : > { %s7588_s10 = sld [smem:[#allocation56_spill]] }
  0x9d   : > { %s6015_s15 = scalar_lea.hbm %s7588_s10, 32 }
  0x9e   : > { %p6016_p1 = scmp.ne.s32.totalorder %s7588_s10, %s6015_s15  ;;  %p6022_p12 = scmp.lt.u32.totalorder %s6015_s15, %s7588_s10 }
  0xa0   : > { %p6018_p3 = pnand %p6016_p1, %p6669_p8 }
  0xa2   : > { %p6019_p11 = pneg %p6018_p3 }
  0xa4   : > { %p6024_p13 = pnand %p6022_p12, %p6019_p11 }
  0xa6   : > { %6027 = shalt.err (!%p6024_p13)
}
  0xa7   : > { %s6028_s29 = scalar_lea.vmem %s556_s2, 32  ;;  %p6036_p7 = scmp.lt.s32.totalorder %s556_s2, %s556_s2 }
  0xa8   : > { %p6029_p0 = scmp.ne.s32.totalorder %s556_s2, %s6028_s29  ;;  %p6037_p9 = scmp.lt.s32.totalorder %s6028_s29, %s6028_s29 }
  0xaa   : > { %p6031_p2 = pnand %p6029_p0, %p6669_p8  ;;  %p6038_p4 = por %p6037_p9, %p6036_p7 }
  0xac   : > { %p6032_p5 = pneg %p6031_p2 }
  0xae   : > { %p6039_p10 = pnand %p6038_p4, %p6032_p5 }
  0xb0   : > { %6042 = shalt.err (!%p6039_p10)
}
  0xb1   : > { %5632 = dma.hbm_to_vmem [thread:$0]  (!%p6653_p6), %s7588_s10, 32, %s556_s2, [#allocation19], %s7587_s13, %s7587_s13, %s7586_s17  }
  0xb2   : > { %s6502_s21 = smov [#allocation21]   ;;  %s7589_s12 = sld [smem:[#allocation58_spill]] }
  0xb3   : > { %s581_s4 = sshll.u32 %s6502_s21, 4  ;;  %s582_s4 = int_to_ptr.vmem [resolvable:$true] %s581_s4 }
  0xb8   : > { %s6043_s1 = scalar_lea.hbm %s7589_s12, 64 }
  0xb9   : > { %p6044_p1 = scmp.ne.s32.totalorder %s7589_s12, %s6043_s1  ;;  %p6050_p12 = scmp.lt.u32.totalorder %s6043_s1, %s7589_s12 }
  0xbb   : > { %p6046_p3 = pnand %p6044_p1, %p6669_p8 }
  0xbd   : > { %p6047_p11 = pneg %p6046_p3 }
  0xbf   : > { %p6052_p13 = pnand %p6050_p12, %p6047_p11 }
  0xc1   : > { %6055 = shalt.err (!%p6052_p13)
}
  0xc2   : > { %s6056_s2 = scalar_lea.vmem %s582_s4, 64  ;;  %p6064_p7 = scmp.lt.s32.totalorder %s582_s4, %s582_s4 }
  0xc3   : > { %p6057_p0 = scmp.ne.s32.totalorder %s582_s4, %s6056_s2  ;;  %p6065_p9 = scmp.lt.s32.totalorder %s6056_s2, %s6056_s2 }
  0xc5   : > { %p6059_p2 = pnand %p6057_p0, %p6669_p8  ;;  %p6066_p4 = por %p6065_p9, %p6064_p7 }
  0xc7   : > { %p6060_p5 = pneg %p6059_p2 }
  0xc9   : > { %p6067_p10 = pnand %p6066_p4, %p6060_p5 }
  0xcb   : > { %6070 = shalt.err (!%p6067_p10)
}
  0xcc   : > { %s6503_s20 = smov 32   ;;  %s6504_s29 = smov 2  }
  0xcd   : > { %5638 = dma.hbm_to_vmem [thread:$0]  (!%p6653_p6), %s7589_s12, 64, %s582_s4, [#allocation22], %s6503_s20, %s6503_s20, %s6504_s29  }
  0xce   : > { %s6505_s21 = smov [#allocation24]   ;;  %s7590_s14 = sld [smem:[#allocation60_spill]] }
  0xcf   : > { %s607_s28 = sshll.u32 %s6505_s21, 4  ;;  %s608_s28 = int_to_ptr.vmem [resolvable:$true] %s607_s28 }
  0xd4   : > { %s6071_s15 = scalar_lea.hbm %s7590_s14, 32 }
  0xd5   : > { %p6072_p1 = scmp.ne.s32.totalorder %s7590_s14, %s6071_s15  ;;  %p6078_p12 = scmp.lt.u32.totalorder %s6071_s15, %s7590_s14 }
  0xd7   : > { %p6074_p3 = pnand %p6072_p1, %p6669_p8 }
  0xd9   : > { %p6075_p11 = pneg %p6074_p3 }
  0xdb   : > { %p6080_p13 = pnand %p6078_p12, %p6075_p11 }
  0xdd   : > { %6083 = shalt.err (!%p6080_p13)
}
  0xde   : > { %s6084_s4 = scalar_lea.vmem %s608_s28, 32  ;;  %p6092_p7 = scmp.lt.s32.totalorder %s608_s28, %s608_s28 }
  0xdf   : > { %p6085_p0 = scmp.ne.s32.totalorder %s608_s28, %s6084_s4  ;;  %p6093_p9 = scmp.lt.s32.totalorder %s6084_s4, %s6084_s4 }
  0xe1   : > { %p6087_p2 = pnand %p6085_p0, %p6669_p8  ;;  %p6094_p4 = por %p6093_p9, %p6092_p7 }
  0xe3   : > { %p6088_p5 = pneg %p6087_p2 }
  0xe5   : > { %p6095_p10 = pnand %p6094_p4, %p6088_p5 }
  0xe7   : > { %6098 = shalt.err (!%p6095_p10)
}
  0xe8   : > { %5644 = dma.hbm_to_vmem [thread:$0]  (!%p6653_p6), %s7590_s14, 32, %s608_s28, [#allocation25], %s7587_s13, %s7587_s13, %s7586_s17  }
  0xe9   : > { %s4507_s19 = sadd.s32 4294967294, %s6489_s27   ;;  %s6821_s11 = sadd.s32 1, %s6489_s27  }
  0xea   : > { %7591 = sst [smem:[#allocation44_spill]] %s6821_s11  ;;  %s48_s21 = sadd.s32 1, %s6485_s26 }
  0xeb   : > { %s45_s9 = ssub.s32 %s6489_s27, %s6821_s11  ;;  %p55_p1 = scmp.ne.s32.totalorder %s6485_s26, %s6481_s25 }
  0xec   : > { %p46_p3 = scmp.eq.s32.totalorder %s45_s9, 0  ;;  %p56_p11 = scmp.eq.s32.totalorder %s6489_s27, 0 }
  0xed   : > { %p61_p12 = scmp.ne.s32.totalorder %s6481_s25, %s6477_s24  ;;  %p426_p13 = scmp.eq.s32.totalorder %s6637_s0, 1 }
  0xee   : > { %s6833_s1 = scalar_select %p46_p3, %s6485_s26, %s48_s21  }
  0xef   : > { %p57_p0 = por %p56_p11, %p55_p1  ;;  %p7593_p2 = scmp.eq.s32.totalorder %s6637_s0, 0 }
  0xf0   : > { %7592 = sst [smem:[#allocation45_spill]] %s6833_s1  ;;  %p6841_p7 = por %p426_p13, %p55_p1 }
  0xf1   : > { %p6837_p5 = por %p7593_p2, %p61_p12  ;;  %p432_p9 = scmp.eq.s32.totalorder %s4507_s19, 1 }
  0xf2   : > { %s7595_s15 = scalar_select %p6841_p7, 1, 0 }
  0xf3   : > { %s7594_s28 = scalar_select %p6837_p5, 1, 0 }
  0xf4   : > { %7596 = sst [smem:[#allocation46_spill]] %s7595_s15  ;;  %p5677_p4 = scmp.lt.s32.totalorder %s6489_s27, 2 }
  0xf5   : > { %s643_s30 = sand.u32 1, %s6489_s27   ;;  %p6847_p10 = por %p432_p9, %p61_p12 }
  0xf6   : > { %s7546_s23 = sand.u32 1, %s6485_s26   ;;  %s4631_s2 = sshll.u32 %s6489_s27, 8 }
  0xf7   : > { %s7597_s22 = scalar_select %p6847_p10, 1, 0 }
  0xf8   : > { %s4525_s4 = sshll.u32 %s7546_s23, 4  ;;  %s7599_s21 = sld [smem:[#allocation48_spill]] }
  0xf9   : > { %7598 = sst [smem:[#allocation47_spill]] %s7597_s22  ;;  %p6860_p1 = pnand %p5677_p4, %p57_p0 }
  0xfa   : > { %s647_s6 = scalar_lea.vmem [#allocation2], %s4525_s4  ;;  %s6866_s23 = scalar_lea.sflag [#allocation3], %s643_s30 }
  0xfb   : > { %s7600_s19 = scalar_select %p6860_p1, 1, 0 }
  0xfc   : > { %s654_s8 = sshll.u32 %s647_s6, 4  ;;  %p7555_p11 = pneg %p6860_p1  ;;  %s6864_s8 = int_to_ptr.vmem [resolvable:$true] %s654_s8 }
  0xfe   : > { %s6858_s9 = scalar_lea.hbm %s7599_s21, %s4631_s2  ;;  %s6104_s29 = scalar_lea.hbm %s7599_s21, 512 }
  0xff   : > { %s6099_s10 = scalar_lea.hbm %s6858_s9, 256  ;;  %p6105_p0 = scmp.lt.u32.totalorder %s6858_s9, %s7599_s21 }
 0x100   : > { %p6100_p3 = scmp.ne.s32.totalorder %s6858_s9, %s6099_s10  ;;  %p6106_p2 = scmp.lt.u32.totalorder %s6104_s29, %s6099_s10 }
 0x101   : > { %p6108_p4 = scmp.lt.u32.totalorder %s6099_s10, %s6858_s9 }
 0x102   : > { %p6102_p12 = pnand %p7555_p11, %p6100_p3  ;;  %p6107_p9 = por %p6106_p2, %p6105_p0 }
 0x104   : > { %p6103_p13 = pneg %p6102_p12  ;;  %p6109_p10 = por %p6108_p4, %p6107_p9 }
 0x106   : > { %p6110_p7 = pnand %p6109_p10, %p6103_p13 }
 0x108   : > { %6113 = shalt.err (!%p6110_p7)
}
 0x109   : > { %s6114_s6 = scalar_lea.vmem %s6864_s8, 256  ;;  %s6506_s30 = smov [#allocation2]  }
 0x10a   : > { %p6115_p3 = scmp.ne.s32.totalorder %s6864_s8, %s6114_s6  ;;  %s6119_s4 = sshll.u32 %s6506_s30, 4  ;;  %s6120_s4 = int_to_ptr.vmem [resolvable:$false] %s6119_s4 }
 0x10b   : > { %s6121_s12 = scalar_lea.vmem %s6120_s4, 512  ;;  %p6122_p6 = scmp.lt.s32.totalorder %s6864_s8, %s6120_s4 }
 0x10c   : > { %p6117_p12 = pnand %p6115_p3, %p7555_p11  ;;  %p6123_p0 = scmp.lt.s32.totalorder %s6121_s12, %s6114_s6 }
 0x10e   : > { %p6118_p5 = pneg %p6117_p12  ;;  %p6124_p2 = por %p6123_p0, %p6122_p6 }
 0x110   : > { %p6125_p9 = pnand %p6124_p2, %p6118_p5 }
 0x112   : > { %6128 = shalt.err (!%p6125_p9)
}
 0x113   : > { %s7601_s10 = smov 8   ;;  %s7602_s14 = smov 128  }
 0x114   : > { %5654 = dma.hbm_to_vmem [thread:$0]  (!%p6860_p1), %s6858_s9, 256, %s6864_s8, %s6866_s23, %s7602_s14, %s7602_s14, %s7601_s10  }
 0x115   : > { %s6507_s2 = smov [#allocation8]   ;;  %s6508_s29 = smov [#allocation11]  }
 0x116   : > { %s464_s20 = sshll.u32 %s6507_s2, 4  ;;  %s490_s30 = sshll.u32 %s6508_s29, 4  ;;  %s465_s20 = int_to_ptr.vmem [resolvable:$true] %s464_s20  ;;  %s491_s30 = int_to_ptr.vmem [resolvable:$true] %s490_s30 }
 0x117   : > { %s7603_s3 = sld [smem:[#allocation51_spill]] }
 0x11d   : > { %s6129_s12 = scalar_lea.hbm %s7603_s3, 32 }
 0x11e   : > { %p6130_p6 = scmp.ne.s32.totalorder %s7603_s3, %s6129_s12  ;;  %p6136_p10 = scmp.lt.u32.totalorder %s6129_s12, %s7603_s3 }
 0x120   : > { %p6132_p5 = pnand %p6130_p6, %p6669_p8 }
 0x122   : > { %p6133_p7 = pneg %p6132_p5 }
 0x124   : > { %p6138_p13 = pnand %p6136_p10, %p6133_p7 }
 0x126   : > { %6141 = shalt.err (!%p6138_p13)
}
 0x127   : > { %s6142_s8 = scalar_lea.vmem %s465_s20, 32  ;;  %p6150_p0 = scmp.lt.s32.totalorder %s465_s20, %s465_s20 }
 0x128   : > { %p6143_p4 = scmp.ne.s32.totalorder %s465_s20, %s6142_s8  ;;  %p6151_p2 = scmp.lt.s32.totalorder %s6142_s8, %s6142_s8 }
 0x12a   : > { %p6145_p3 = pnand %p6143_p4, %p6669_p8  ;;  %p6152_p9 = por %p6151_p2, %p6150_p0 }
 0x12c   : > { %p6146_p12 = pneg %p6145_p3 }
 0x12e   : > { %p6153_p11 = pnand %p6152_p9, %p6146_p12 }
 0x130   : > { %6156 = shalt.err (!%p6153_p11)
}
 0x131   : > { %p7604_p6 = scmp.ne.s32.totalorder %s7580_s18, 0  ;;  %s6157_s9 = scalar_lea.hbm %s7512_s5, 12288 }
 0x132   : > { %p6158_p5 = scmp.ne.s32.totalorder %s7512_s5, %s6157_s9  ;;  %p6164_p10 = scmp.lt.u32.totalorder %s6157_s9, %s7512_s5 }
 0x133   : > { %5611 = dma.hbm_to_vmem [thread:$0]  (!%p7604_p6), %s7603_s3, 32, %s465_s20, [#allocation6], %s7587_s13, %s7587_s13, %s7586_s17  }
 0x134   : > { %p6160_p11 = pnand %p6158_p5, %p6669_p8 }
 0x136   : > { %p6161_p7 = pneg %p6160_p11 }
 0x138   : > { %p6166_p13 = pnand %p6164_p10, %p6161_p7 }
 0x13a   : > { %6169 = shalt.err (!%p6166_p13)
}
 0x13b   : > { %s6170_s12 = scalar_lea.vmem %s491_s30, 12288  ;;  %p6178_p0 = scmp.lt.s32.totalorder %s491_s30, %s491_s30 }
 0x13c   : > { %p6171_p4 = scmp.ne.s32.totalorder %s491_s30, %s6170_s12  ;;  %p6179_p2 = scmp.lt.s32.totalorder %s6170_s12, %s6170_s12 }
 0x13e   : > { %p6173_p3 = pnand %p6171_p4, %p6669_p8  ;;  %p6180_p9 = por %p6179_p2, %p6178_p0 }
 0x140   : > { %p6174_p12 = pneg %p6173_p3 }
 0x142   : > { %p6181_p1 = pnand %p6180_p9, %p6174_p12 }
 0x144   : > { %6184 = shalt.err (!%p6181_p1)
}
 0x145   : > { %s6509_s20 = smov 384   ;;  %s6510_s8 = smov 24  }
 0x146   : > { %5617 = dma.hbm_to_vmem [thread:$0]  (!%p7604_p6), %s7512_s5, 12288, %s491_s30, [#allocation10], %s6509_s20, %s6509_s20, %s6510_s8  }
 0x147   : > { %s6511_s22 = smov [#allocation14]   ;;  %s6512_s9 = smov [#allocation17]  }
 0x148   : > { %s516_s21 = sshll.u32 %s6511_s22, 4  ;;  %s542_s2 = sshll.u32 %s6512_s9, 4  ;;  %s517_s21 = int_to_ptr.vmem [resolvable:$true] %s516_s21  ;;  %s543_s2 = int_to_ptr.vmem [resolvable:$true] %s542_s2 }
 0x149   : > { %s6185_s6 = scalar_lea.hbm %s7514_s7, 4096 }
 0x14a   : > { %p6186_p1 = scmp.ne.s32.totalorder %s7514_s7, %s6185_s6  ;;  %p6192_p7 = scmp.lt.u32.totalorder %s6185_s6, %s7514_s7 }
 0x14c   : > { %p6188_p5 = pnand %p6186_p1, %p6669_p8 }
 0x14e   : > { %p6189_p11 = pneg %p6188_p5 }
 0x150   : > { %p6194_p10 = pnand %p6192_p7, %p6189_p11 }
 0x152   : > { %6197 = shalt.err (!%p6194_p10)
}
 0x153   : > { %s6198_s30 = scalar_lea.vmem %s517_s21, 4096  ;;  %p6206_p12 = scmp.lt.s32.totalorder %s517_s21, %s517_s21 }
 0x154   : > { %p6199_p13 = scmp.ne.s32.totalorder %s517_s21, %s6198_s30  ;;  %p6207_p0 = scmp.lt.s32.totalorder %s6198_s30, %s6198_s30 }
 0x156   : > { %p6201_p4 = pnand %p6199_p13, %p6669_p8  ;;  %p6208_p2 = por %p6207_p0, %p6206_p12 }
 0x158   : > { %p6202_p3 = pneg %p6201_p4 }
 0x15a   : > { %p6209_p9 = pnand %p6208_p2, %p6202_p3 }
 0x15c   : > { %6212 = shalt.err (!%p6209_p9)
}
 0x15d   : > { %5623 = dma.hbm_to_vmem [thread:$0]  (!%p7604_p6), %s7514_s7, 4096, %s517_s21, [#allocation13], %s7602_s14, %s7602_s14, %s7601_s10  }
 0x15e   : > { %s7605_s8 = sld [smem:[#allocation55_spill]] }
 0x164   : > { %s6213_s11 = scalar_lea.hbm %s7605_s8, 32 }
 0x165   : > { %p6214_p1 = scmp.ne.s32.totalorder %s7605_s8, %s6213_s11  ;;  %p6220_p7 = scmp.lt.u32.totalorder %s6213_s11, %s7605_s8 }
 0x167   : > { %p6216_p5 = pnand %p6214_p1, %p6669_p8 }
 0x169   : > { %p6217_p11 = pneg %p6216_p5 }
 0x16b   : > { %p6222_p10 = pnand %p6220_p7, %p6217_p11 }
 0x16d   : > { %6225 = shalt.err (!%p6222_p10)
}
 0x16e   : > { %s6226_s4 = scalar_lea.vmem %s543_s2, 32  ;;  %p6234_p12 = scmp.lt.s32.totalorder %s543_s2, %s543_s2 }
 0x16f   : > { %p6227_p13 = scmp.ne.s32.totalorder %s543_s2, %s6226_s4  ;;  %p6235_p0 = scmp.lt.s32.totalorder %s6226_s4, %s6226_s4 }
 0x171   : > { %p6229_p4 = pnand %p6227_p13, %p6669_p8  ;;  %p6236_p2 = por %p6235_p0, %p6234_p12 }
 0x173   : > { %p6230_p3 = pneg %p6229_p4 }
 0x175   : > { %p6237_p9 = pnand %p6236_p2, %p6230_p3 }
 0x177   : > { %6240 = shalt.err (!%p6237_p9)
}
 0x178   : > { %5629 = dma.hbm_to_vmem [thread:$0]  (!%p7604_p6), %s7605_s8, 32, %s543_s2, [#allocation16], %s7587_s13, %s7587_s13, %s7586_s17  }
 0x179   : > { %s6513_s12 = smov [#allocation20]   ;;  %s7606_s15 = sld [smem:[#allocation57_spill]] }
 0x17a   : > { %s568_s30 = sshll.u32 %s6513_s12, 4  ;;  %s569_s30 = int_to_ptr.vmem [resolvable:$true] %s568_s30 }
 0x17f   : > { %s6241_s20 = scalar_lea.hbm %s7606_s15, 8192 }
 0x180   : > { %p6242_p1 = scmp.ne.s32.totalorder %s7606_s15, %s6241_s20  ;;  %p6248_p7 = scmp.lt.u32.totalorder %s6241_s20, %s7606_s15 }
 0x182   : > { %p6244_p5 = pnand %p6242_p1, %p6669_p8 }
 0x184   : > { %p6245_p11 = pneg %p6244_p5 }
 0x186   : > { %p6250_p10 = pnand %p6248_p7, %p6245_p11 }
 0x188   : > { %6253 = shalt.err (!%p6250_p10)
}
 0x189   : > { %s6254_s17 = scalar_lea.vmem %s569_s30, 8192  ;;  %p6262_p12 = scmp.lt.s32.totalorder %s569_s30, %s569_s30 }
 0x18a   : > { %p6255_p13 = scmp.ne.s32.totalorder %s569_s30, %s6254_s17  ;;  %p6263_p0 = scmp.lt.s32.totalorder %s6254_s17, %s6254_s17 }
 0x18c   : > { %p6257_p4 = pnand %p6255_p13, %p6669_p8  ;;  %p6264_p2 = por %p6263_p0, %p6262_p12 }
 0x18e   : > { %p6258_p3 = pneg %p6257_p4 }
 0x190   : > { %p6265_p9 = pnand %p6264_p2, %p6258_p3 }
 0x192   : > { %6268 = shalt.err (!%p6265_p9)
}
 0x193   : > { %s6514_s2 = smov 256   ;;  %s6515_s21 = smov [#allocation23]  }
 0x194   : > { %5635 = dma.hbm_to_vmem [thread:$0]  (!%p7604_p6), %s7606_s15, 8192, %s569_s30, [#allocation19], %s6514_s2, %s6514_s2, %s7587_s13  }
 0x195   : > { %s594_s6 = sshll.u32 %s6515_s21, 4  ;;  %s6516_s12 = smov [#allocation26]   ;;  %s595_s6 = int_to_ptr.vmem [resolvable:$true] %s594_s6 }
 0x196   : > { %s621_s3 = sshll.u32 %s6516_s12, 4  ;;  %s7607_s11 = sld [smem:[#allocation59_spill]]  ;;  %s622_s3 = int_to_ptr.vmem [resolvable:$true] %s621_s3 }
 0x19c   : > { %s6269_s1 = scalar_lea.hbm %s7607_s11, 8192 }
 0x19d   : > { %p6270_p1 = scmp.ne.s32.totalorder %s7607_s11, %s6269_s1  ;;  %p6276_p7 = scmp.lt.u32.totalorder %s6269_s1, %s7607_s11 }
 0x19f   : > { %p6272_p5 = pnand %p6270_p1, %p6669_p8 }
 0x1a1   : > { %p6273_p11 = pneg %p6272_p5 }
 0x1a3   : > { %p6278_p10 = pnand %p6276_p7, %p6273_p11 }
 0x1a5   : > { %6281 = shalt.err (!%p6278_p10)
}
 0x1a6   : > { %s6282_s13 = scalar_lea.vmem %s595_s6, 8192  ;;  %p6290_p12 = scmp.lt.s32.totalorder %s595_s6, %s595_s6 }
 0x1a7   : > { %p6283_p13 = scmp.ne.s32.totalorder %s595_s6, %s6282_s13  ;;  %p6291_p0 = scmp.lt.s32.totalorder %s6282_s13, %s6282_s13 }
 0x1a9   : > { %p6285_p4 = pnand %p6283_p13, %p6669_p8  ;;  %p6292_p2 = por %p6291_p0, %p6290_p12 }
 0x1ab   : > { %p6286_p3 = pneg %p6285_p4 }
 0x1ad   : > { %p6293_p9 = pnand %p6292_p2, %p6286_p3 }
 0x1af   : > { %6296 = shalt.err (!%p6293_p9)
}
 0x1b0   : > { %5641 = dma.hbm_to_vmem [thread:$0]  (!%p7604_p6), %s7607_s11, 8192, %s595_s6, [#allocation22], %s7602_s14, %s7602_s14, %s7601_s10  }
 0x1b1   : > { %s7608_s12 = sld [smem:[#allocation61_spill]] }
 0x1b7   : > { %s6297_s24 = scalar_lea.hbm %s7608_s12, 16 }
 0x1b8   : > { %p6298_p1 = scmp.ne.s32.totalorder %s7608_s12, %s6297_s24  ;;  %p6304_p7 = scmp.lt.u32.totalorder %s6297_s24, %s7608_s12 }
 0x1ba   : > { %p6300_p5 = pnand %p6298_p1, %p6669_p8 }
 0x1bc   : > { %p6301_p11 = pneg %p6300_p5 }
 0x1be   : > { %p6306_p10 = pnand %p6304_p7, %p6301_p11 }
 0x1c0   : > { %6309 = shalt.err (!%p6306_p10)
}
 0x1c1   : > { %s6310_s17 = scalar_lea.vmem %s622_s3, 16  ;;  %s6317_s10 = scalar_lea.vmem %s622_s3, 32 }
 0x1c2   : > { %p6311_p13 = scmp.ne.s32.totalorder %s622_s3, %s6310_s17  ;;  %p6318_p12 = scmp.lt.s32.totalorder %s622_s3, %s622_s3 }
 0x1c3   : > { %p6319_p0 = scmp.lt.s32.totalorder %s6317_s10, %s6310_s17 }
 0x1c4   : > { %p6313_p4 = pnand %p6311_p13, %p6669_p8 }
 0x1c5   : > { %p6320_p2 = por %p6319_p0, %p6318_p12 }
 0x1c6   : > { %p6314_p3 = pneg %p6313_p4 }
 0x1c8   : > { %p6321_p9 = pnand %p6320_p2, %p6314_p3 }
 0x1ca   : > { %6324 = shalt.err (!%p6321_p9)
}
 0x1cb   : > { %5647 = dma.hbm_to_vmem [thread:$0]  (!%p7604_p6), %s7608_s12, 16, %s622_s3, [#allocation25]  }
 0x1cc   : > { %s6517_s29 = smov [#allocation27]   ;;  %s4528_s30 = sshll.u32 %s6489_s27, 4 }
 0x1cd   : > { %s632_s13 = sshll.u32 %s6517_s29, 4  ;;  %s7609_s21 = sld [smem:[#allocation62_spill]]  ;;  %s633_s13 = int_to_ptr.vmem [resolvable:$true] %s632_s13 }
 0x1d3   : > { %s6325_s24 = scalar_lea.hbm %s7609_s21, 16 }
 0x1d4   : > { %p6326_p1 = scmp.ne.s32.totalorder %s7609_s21, %s6325_s24  ;;  %p6332_p7 = scmp.lt.u32.totalorder %s6325_s24, %s7609_s21 }
 0x1d6   : > { %p6328_p5 = pnand %p6326_p1, %p6669_p8 }
 0x1d8   : > { %p6329_p11 = pneg %p6328_p5 }
 0x1da   : > { %p6334_p10 = pnand %p6332_p7, %p6329_p11 }
 0x1dc   : > { %6337 = shalt.err (!%p6334_p10)
}
 0x1dd   : > { %s6338_s3 = scalar_lea.vmem %s633_s13, 16  ;;  %s6345_s17 = scalar_lea.vmem %s633_s13, 32 }
 0x1de   : > { %p6339_p13 = scmp.ne.s32.totalorder %s633_s13, %s6338_s3  ;;  %p6346_p12 = scmp.lt.s32.totalorder %s633_s13, %s633_s13 }
 0x1df   : > { %p6347_p0 = scmp.lt.s32.totalorder %s6345_s17, %s6338_s3 }
 0x1e0   : > { %p6341_p4 = pnand %p6339_p13, %p6669_p8 }
 0x1e1   : > { %p6348_p2 = por %p6347_p0, %p6346_p12 }
 0x1e2   : > { %p6342_p3 = pneg %p6341_p4 }
 0x1e4   : > { %p6349_p9 = pnand %p6348_p2, %p6342_p3 }
 0x1e6   : > { %6352 = shalt.err (!%p6349_p9)
}
 0x1e7   : > { %5650 = dma.hbm_to_vmem [thread:$0]  (!%p7604_p6), %s7609_s21, 16, %s633_s13, [#allocation28]  }
 0x1e8   : > { %s7610_s2 = sld [smem:[#allocation50_spill]]  ;;  %s7611_s4 = sand.u32 1, %s6485_s26  }
 0x1e9   : > { %s667_s24 = scalar_lea.vmem [#allocation7], %s7611_s4  ;;  %p7612_p1 = scmp.ne.s32.totalorder %s7600_s19, 0 }
 0x1ea   : > { %s674_s20 = sshll.u32 %s667_s24, 4  ;;  %s675_s20 = int_to_ptr.vmem [resolvable:$true] %s674_s20 }
 0x1eb   : > { %p7613_p5 = pneg %p7612_p1 }
 0x1ee   : > { %s7058_s16 = scalar_lea.hbm %s7610_s2, %s4528_s30  ;;  %s6358_s22 = scalar_lea.hbm %s7610_s2, 32 }
 0x1ef   : > { %s6353_s18 = scalar_lea.hbm %s7058_s16, 16  ;;  %p6359_p6 = scmp.lt.u32.totalorder %s7058_s16, %s7610_s2 }
 0x1f0   : > { %p6354_p8 = scmp.ne.s32.totalorder %s7058_s16, %s6353_s18  ;;  %p6360_p10 = scmp.lt.u32.totalorder %s6358_s22, %s6353_s18 }
 0x1f1   : > { %p6362_p4 = scmp.lt.u32.totalorder %s6353_s18, %s7058_s16 }
 0x1f2   : > { %p6356_p11 = pnand %p6354_p8, %p7613_p5  ;;  %p6361_p13 = por %p6360_p10, %p6359_p6 }
 0x1f4   : > { %p6357_p7 = pneg %p6356_p11  ;;  %p6363_p3 = por %p6362_p4, %p6361_p13 }
 0x1f6   : > { %p6364_p12 = pnand %p6363_p3, %p6357_p7 }
 0x1f8   : > { %6367 = shalt.err (!%p6364_p12)
}
 0x1f9   : > { %s6368_s3 = scalar_lea.vmem %s675_s20, 16  ;;  %p7614_p2 = pmov %p7613_p5 }
 0x1fa   : > { %p6369_p0 = scmp.ne.s32.totalorder %s675_s20, %s6368_s3  ;;  %s6518_s17 = smov [#allocation7]  }
 0x1fb   : > { %s6373_s10 = sshll.u32 %s6518_s17, 4  ;;  %s6374_s10 = int_to_ptr.vmem [resolvable:$false] %s6373_s10 }
 0x1fc   : > { %p6371_p9 = pnand %p6369_p0, %p7614_p2  ;;  %s6375_s14 = scalar_lea.vmem %s6374_s10, 32 }
 0x1fd   : > { %p6376_p5 = scmp.lt.s32.totalorder %s675_s20, %s6374_s10  ;;  %p6377_p11 = scmp.lt.s32.totalorder %s6375_s14, %s6368_s3 }
 0x1fe   : > { %p6372_p8 = pneg %p6371_p9 }
 0x1ff   : > { %p6378_p6 = por %p6377_p11, %p6376_p5 }
 0x201   : > { %p6379_p10 = pnand %p6378_p6, %p6372_p8 }
 0x203   : > { %6382 = shalt.err (!%p6379_p10)
}
 0x204   : > { %5657 = dma.hbm_to_vmem [thread:$0]  (!%p7612_p1), %s7058_s16, 16, %s675_s20, %s6866_s23  }
 0x205   : > { %s7615_s6 = sld [smem:[#allocation43_spill]] }
 0x20b   : > { %p7616_p7 = scmp.ne.s32.totalorder %s7615_s6, 0 }
 0x20c   : > { %s685_s29 = sand.u32 (!%p7616_p7), 1, %s6637_s0   ;;  %s7086_s4 = sand.u32 (!%p7616_p7), 1, %s6481_s25  }
 0x20d   : > { %683 = sbr.rel (%p7616_p7) target bundleno = 7690 (0x1e0a), region = 88  ;;  %s4530_s24 = sshll.u32 (!%p7616_p7), %s7086_s4, 4 }
 0x20e   : > { %s686_s18 = scalar_lea.sflag (!%p7616_p7), [#allocation3], %s685_s29  ;;  %s689_s13 = scalar_lea.vmem (!%p7616_p7), [#allocation2], %s4530_s24 }
 0x20f   : > { %p7617_p13 = scmp.ne.s32.totalorder (!%p7616_p7), %s7594_s28, 0 }
 0x214   : > { %6428 = dma.done.wait (%p7617_p13), %s686_s18, 256  }
 0x215   : > { %6430 = vsyncadd (%p7617_p13), %s686_s18, 4294967040  ;;  %p7618_p1 = scmp.eq.s32.totalorder %s6637_s0, 0 }
 0x217   : > { %6432 = dma.done.wait (%p7618_p1), [#allocation6], 256   ;;  %p7619_p4 = pmov %p7618_p1 }
 0x218   : > { %s701_s23 = scalar_lea.vmem [#allocation7], %s7086_s4 }
 0x219   : > { %6434 = vsyncadd (%p7619_p4), [#allocation6], 4294967040 }
 0x21a   : > { %6436 = dma.done.wait (%p7617_p13), %s686_s18, 16  }
 0x21b   : > { %6438 = vsyncadd (%p7617_p13), %s686_s18, 4294967280  ;;  %p7620_p3 = pmov %p7618_p1 }
 0x21c   : > { %p7621_p12 = pmov %p7618_p1 }
 0x21d   : > { %6440 = dma.done.wait (%p7620_p3), [#allocation6], 32  }
 0x21e   : > { %6442 = vsyncadd (%p7621_p12), [#allocation6], 4294967264  ;;  %p7622_p0 = pmov %p7618_p1 }
 0x220   : > { %6444 = dma.done.wait (%p7622_p0), [#allocation10], 12320   ;;  %p7623_p2 = pmov %p7622_p0 }
 0x221   : > { %p7624_p9 = pmov %p7622_p0 }
 0x222   : > { %6446 = vsyncadd (%p7623_p2), [#allocation10], 4294954976 }
 0x223   : > { %6448 = dma.done.wait (%p7624_p9), [#allocation13], 4192   ;;  %p7625_p8 = pmov %p7622_p0 }
 0x224   : > { %p7626_p5 = pmov %p7622_p0 }
 0x225   : > { %6450 = vsyncadd (%p7625_p8), [#allocation13], 4294963104 }
 0x226   : > { %6452 = dma.done.wait (%p7626_p5), [#allocation16], 64   ;;  %p7627_p11 = pmov %p7622_p0 }
 0x227   : > { %p7628_p6 = pmov %p7622_p0 }
 0x228   : > { %6454 = vsyncadd (%p7627_p11), [#allocation16], 4294967232 }
 0x229   : > { %6456 = dma.done.wait (%p7628_p6), [#allocation19], 8224   ;;  %p7629_p10 = pmov %p7622_p0 }
 0x22a   : > { %p7630_p7 = pmov %p7622_p0 }
 0x22b   : > { %6458 = vsyncadd (%p7629_p10), [#allocation19], 4294959072 }
 0x22c   : > { %6460 = dma.done.wait (%p7630_p7), [#allocation22], 8256   ;;  %p7631_p13 = pmov %p7622_p0 }
 0x22d   : > { %p7632_p1 = pmov %p7622_p0 }
 0x22e   : > { %6462 = vsyncadd (%p7631_p13), [#allocation22], 4294959040 }
 0x22f   : > { %6464 = dma.done.wait (%p7632_p1), [#allocation25], 48   ;;  %p7633_p4 = pmov %p7622_p0 }
 0x230   : > { %p7634_p3 = pmov %p7622_p0 }
 0x231   : > { %6466 = vsyncadd (%p7633_p4), [#allocation25], 4294967248 }
 0x232   : > { %6468 = dma.done.wait (%p7634_p3), [#allocation28], 16   ;;  %p7635_p12 = pmov %p7622_p0 }
 0x233   : > { %v812_v0 = vld [vmem:[%s689_s13] sm:$0xff]  ;;  %v813_v2 = vld [vmem:[%s689_s13 + $0x8] sm:$0xff]  ;;  %vm1101_vm0 = vcmask 261120   ;;  %vm1189_vm2 = vcmask 130048   ;;  %s6520_s28 = smov 96   ;;  %s6521_s19 = smov 64  }
 0x234   : > { %6470 = vsyncadd (%p7635_p12), [#allocation28], 4294967280  ;;  %v814_v1 = vld [vmem:[#allocation5] sm:$0xff]  ;;  %v815_v4 = vld [vmem:[#allocation5 + $0x8] sm:$0xff]  ;;  %s6522_s16 = smov 32   ;;  %s7638_s20 = sld [smem:[#allocation46_spill]] }
 0x235   : > { %v7136_v3 = vadd.f32 %v814_v1, %v812_v0  ;;  %v7139_v5 = vadd.f32 %v815_v4, %v813_v2  ;;  %v861_v6 = vld [vmem:[#allocation11 + $0x8] sm:$0xff]  ;;  %v864_v7 = vld [vmem:[#allocation11 + $0x20] sm:$0xff]  ;;  %v863_v10 = vld [vmem:[#allocation11 + $0x18] sm:$0xff]  ;;  %s4632_s1 = sshll.u32 %s6637_s0, 8  ;;  %s811_s22 = scalar_lea.vmem [#allocation29], %s4530_s24 }
 0x236   : > { %v860_v8 = vld [vmem:[#allocation11] sm:$0xff]  ;;  %v5127_v9 = vpack.c.bf16 %v864_v7, %v861_v6  ;;  %v867_v11 = vld [vmem:[#allocation11 + $0x38] sm:$0xff]  ;;  %v870_v12 = vld [vmem:[#allocation11 + $0x50] sm:$0xff]  ;;  %s4274_s30 = sshll.u32 %s811_s22, 4  ;;  %s7639_s17 = sld [smem:[#allocation63_spill]]  ;;  %s7463_s30 = int_to_ptr.vmem [resolvable:$true] %s4274_s30 }
 0x237   : > { %821 = vadd.xlane.f32.xlu0 %v7136_v3  ;;  %v5129_v13 = vpack.c.bf16 %v863_v10, %v860_v8  ;;  %v5131_v14 = vpack.c.bf16 %v870_v12, %v867_v11  ;;  %v862_v15 = vld [vmem:[#allocation11 + $0x10] sm:$0xff]  ;;  %v865_v16 = vld [vmem:[#allocation11 + $0x28] sm:$0xff]  ;;  %v876_v21 = vld [vmem:[#allocation11 + $0x80] sm:$0xff]  ;;  %v6519_v10 = vmov 0.0   ;;  %s4261_s14 = scalar_lea.sflag [#allocation4], %s7086_s4  ;;  %s6383_s6 = scalar_lea.vmem %s7463_s30, 256 }
 0x238   : > { %v866_v17 = vld [vmem:[#allocation11 + $0x30] sm:$0xff]  ;;  %5128 = vmatprep.subr.bf16.mxu0 %v5127_v9  ;;  %v5159_v18 = vpack.c.bf16 %v865_v16, %v862_v15  ;;  %v869_v19 = vld [vmem:[#allocation11 + $0x48] sm:$0xff]  ;;  %v868_v23 = vld [vmem:[#allocation11 + $0x40] sm:$0xff]  ;;  %989 = vmatprep.mubr.f32.mxu0 %v6519_v10  ;;  %p6384_p0 = scmp.ne.s32.totalorder %s7463_s30, %s6383_s6  ;;  %s6523_s0 = smov [#allocation29]  }
 0x239   : > { %v873_v20 = vld [vmem:[#allocation11 + $0x68] sm:$0xff]  ;;  %5130 = vmatpush1.bf16.msra.mxu0 %v5129_v13  ;;  %v5133_v22 = vpack.c.bf16 %v869_v19, %v866_v17  ;;  %v871_v24 = vld [vmem:[#allocation11 + $0x58] sm:$0xff]  ;;  %v872_v27 = vld [vmem:[#allocation11 + $0x60] sm:$0xff]  ;;  %s6387_s29 = sshll.u32 %s6523_s0, 4  ;;  %s6388_s29 = int_to_ptr.vmem [resolvable:$false] %s6387_s29 }
 0x23a   : > { %5132 = vmatprep.subr.bf16.mxu0 %v5131_v14  ;;  %5160 = vmatprep.subr.bf16.mxu1 %v5159_v18  ;;  %v5135_v25 = vpack.c.bf16 %v876_v21, %v873_v20  ;;  %v5163_v26 = vpack.c.bf16 %v871_v24, %v868_v23  ;;  %v875_v28 = vld [vmem:[#allocation11 + $0x78] sm:$0xff]  ;;  %v882_v39 = vld [vmem:[#allocation11 + $0xb0] sm:$0xff]  ;;  %v877_v42 = vld [vmem:[#allocation11 + $0x88] sm:$0xff]  ;;  %p7640_p2 = scmp.ne.s32.totalorder %s7638_s20, 0  ;;  %s6389_s24 = scalar_lea.vmem %s6388_s29, 512 }
 0x23b   : > { %823 = vadd.xlane.f32.xlu0 %v7139_v5  ;;  %5162 = vmatpush3.bf16.msra.mxu1 %v5159_v18  ;;  %v5137_v29 = vpack.c.bf16 %v875_v28, %v872_v27  ;;  %v879_v38 = vld [vmem:[#allocation11 + $0x98] sm:$0xff]  ;;  %v874_v40 = vld [vmem:[#allocation11 + $0x70] sm:$0xff]  ;;  %v881_v44 = vld [vmem:[#allocation11 + $0xa8] sm:$0xff]  ;;  %p6390_p5 = scmp.lt.s32.totalorder %s7463_s30, %s6388_s29  ;;  %p6391_p11 = scmp.lt.s32.totalorder %s6389_s24, %s6383_s6 }
 0x23c   : > { %5164 = vmatprep.subr.bf16.mxu1 %v5163_v26  ;;  %v5139_v41 = vpack.c.bf16 %v882_v39, %v879_v38  ;;  %v878_v43 = vld [vmem:[#allocation11 + $0x90] sm:$0xff]  ;;  %v5167_v45 = vpack.c.bf16 %v877_v42, %v874_v40  ;;  %v885_v47 = vld [vmem:[#allocation11 + $0xc8] sm:$0xff]  ;;  %v888_v48 = vld [vmem:[#allocation11 + $0xe0] sm:$0xff]  ;;  %s7461_s10 = scalar_lea.hbm %s7639_s17, %s4632_s1  ;;  %p6385_p9 = pnand %p6384_p0, %p7640_p2 }
 0x23d   : > { %5134 = vmatpush1.bf16.msra.mxu0 %v5133_v22  ;;  %v5141_v46 = vpack.c.bf16 %v881_v44, %v878_v43  ;;  %v880_v49 = vld [vmem:[#allocation11 + $0xa0] sm:$0xff]  ;;  %v5143_v50 = vpack.c.bf16 %v888_v48, %v885_v47  ;;  %v883_v51 = vld [vmem:[#allocation11 + $0xb8] sm:$0xff]  ;;  %v894_v57 = vld [vmem:[#allocation11 + $0x110] sm:$0xff]  ;;  %v910_v43 = vlaneseq  ;;  %p6392_p6 = por %p6391_p11, %p6390_p5 }
 0x23e   : > { %5136 = vmatprep.subr.bf16.mxu0 %v5135_v25  ;;  %v884_v52 = vld [vmem:[#allocation11 + $0xc0] sm:$0xff]  ;;  %v887_v53 = vld [vmem:[#allocation11 + $0xd8] sm:$0xff]  ;;  %v5171_v54 = vpack.c.bf16 %v883_v51, %v880_v49  ;;  %v886_v58 = vld [vmem:[#allocation11 + $0xd0] sm:$0xff]  ;;  %p6386_p8 = pneg %p6385_p9 }
 0x23f   : > { %5166 = vmatpush3.bf16.msra.mxu1 %v5163_v26  ;;  %v5145_v55 = vpack.c.bf16 %v887_v53, %v884_v52  ;;  %v891_v56 = vld [vmem:[#allocation11 + $0xf8] sm:$0xff]  ;;  %v889_v60 = vld [vmem:[#allocation11 + $0xe8] sm:$0xff]  ;;  %v890_v61 = vld [vmem:[#allocation11 + $0xf0] sm:$0xff]  ;;  %v7156_v44 = vshrl.u32 %v910_v43, 7 }
 0x240   : > { %5168 = vmatprep.subr.bf16.mxu1 %v5167_v45  ;;  %v5147_v59 = vpack.c.bf16 %v894_v57, %v891_v56  ;;  %v893_v62 = vld [vmem:[#allocation11 + $0x108] sm:$0xff]  ;;  %v5175_v63 = vpack.c.bf16 %v889_v60, %v886_v58  ;;  %v900_v2 = vld [vmem:[#allocation11 + $0x140] sm:$0xff]  ;;  %v895_v7 = vld [vmem:[#allocation11 + $0x118] sm:$0xff]  ;;  %p6393_p10 = pnand %p6392_p6, %p6386_p8 }
 0x241   : > { %5138 = vmatpush1.bf16.msra.mxu0 %v5137_v29  ;;  %v5149_v0 = vpack.c.bf16 %v893_v62, %v890_v61  ;;  %v897_v1 = vld [vmem:[#allocation11 + $0x128] sm:$0xff]  ;;  %v892_v4 = vld [vmem:[#allocation11 + $0x100] sm:$0xff]  ;;  %v899_v9 = vld [vmem:[#allocation11 + $0x138] sm:$0xff]  ;;  %v920_v47 = vsub.s32 2, %v7156_v44 }
 0x242   : > { %5140 = vmatprep.subr.bf16.mxu0 %v5139_v41  ;;  %v5151_v6 = vpack.c.bf16 %v900_v2, %v897_v1  ;;  %v896_v8 = vld [vmem:[#allocation11 + $0x120] sm:$0xff]  ;;  %v5179_v11 = vpack.c.bf16 %v895_v7, %v892_v4  ;;  %v903_v13 = vld [vmem:[#allocation11 + $0x158] sm:$0xff]  ;;  %v906_v14 = vld [vmem:[#allocation11 + $0x170] sm:$0xff] }
 0x243   : > { %5170 = vmatpush3.bf16.msra.mxu1 %v5167_v45  ;;  %v5153_v12 = vpack.c.bf16 %v899_v9, %v896_v8  ;;  %v898_v15 = vld [vmem:[#allocation11 + $0x130] sm:$0xff]  ;;  %v5155_v16 = vpack.c.bf16 %v906_v14, %v903_v13  ;;  %v901_v17 = vld [vmem:[#allocation11 + $0x148] sm:$0xff]  ;;  %v904_v22 = vld [vmem:[#allocation11 + $0x160] sm:$0xff]  ;;  %v7159_v45 = vsub.s32 0, %v7156_v44 }
 0x244   : > { %5172 = vmatprep.subr.bf16.mxu1 %v5171_v54  ;;  %v902_v18 = vld [vmem:[#allocation11 + $0x150] sm:$0xff]  ;;  %v905_v19 = vld [vmem:[#allocation11 + $0x168] sm:$0xff]  ;;  %v5183_v20 = vpack.c.bf16 %v901_v17, %v898_v15  ;;  %v907_v23 = vld [vmem:[#allocation11 + $0x178] sm:$0xff] }
 0x245   : > { %5142 = vmatpush1.bf16.msra.mxu0 %v5141_v46  ;;  %v5157_v21 = vpack.c.bf16 %v905_v19, %v902_v18  ;;  %v5187_v24 = vpack.c.bf16 %v907_v23, %v904_v22  ;;  %vm7175_vm1 = vmpackc.low %vm1101_vm0, %vm1101_vm0  ;;  %v7193_v7 = vld [vmem:[%s701_s23] ss:$0 sm:$0xff] }
 0x246   : > { %5144 = vmatprep.subr.bf16.mxu0 %v5143_v50 }
 0x247   : > { %5174 = vmatpush3.bf16.msra.mxu1 %v5171_v54 }
 0x248   : > { %5176 = vmatprep.subr.bf16.mxu1 %v5175_v63 }
 0x249   : > { %5146 = vmatpush1.bf16.msra.mxu0 %v5145_v55 }
 0x24a   : > { %5148 = vmatprep.subr.bf16.mxu0 %v5147_v59 }
 0x24b   : > { %5178 = vmatpush3.bf16.msra.mxu1 %v5175_v63 }
 0x24c   : > { %5180 = vmatprep.subr.bf16.mxu1 %v5179_v11 }
 0x24d   : > { %5150 = vmatpush1.bf16.msra.mxu0 %v5149_v0 }
 0x24e   : > { %5152 = vmatprep.subr.bf16.mxu0 %v5151_v6 }
 0x24f   : > { %5182 = vmatpush3.bf16.msra.mxu1 %v5179_v11 }
 0x250   : > { %5184 = vmatprep.subr.bf16.mxu1 %v5183_v20 }
 0x251   : > { %5154 = vmatpush1.bf16.msra.mxu0 %v5153_v12 }
 0x252   : > { %5156 = vmatprep.subr.bf16.mxu0 %v5155_v16 }
 0x253   : > { %5186 = vmatpush3.bf16.msra.mxu1 %v5183_v20 }
 0x254   : > { %5188 = vmatprep.subr.bf16.mxu1 %v5187_v24 }
 0x255   : > { %5158 = vmatpush1.bf16.msra.mxu0 %v5157_v21 }
 0x257   : > { %5190 = vmatpush3.bf16.msra.mxu1 %v5187_v24 }
 0x2c4   : > { %v822_v30 = vpop.xlane.xlu0 %821 }
 0x2c5   : > { %v826_v31 = vmul.f32 0.0078125, %v822_v30 }
 0x2c7   : > { %v7143_v32 = vsub.f32 %v7136_v3, %v826_v31 }
 0x2c8   : > { %v824_v33 = vpop.xlane.xlu0 %823 }
 0x2c9   : > { %v827_v34 = vmul.f32 0.0078125, %v824_v33  ;;  %v830_v35 = vmul.f32 %v7143_v32, %v7143_v32  ;;  %v4547_v33 = vld [vmem:[#allocation8] ss:$0 sm:$0xff] }
 0x2cb   : > { %v7148_v36 = vsub.f32 %v7139_v5, %v827_v34  ;;  %832 = vadd.xlane.f32.xlu1 %v830_v35  ;;  %v4548_v35 = vld [vmem:[#allocation9] ss:$0 sm:$0xff] }
 0x2cd   : > { %v831_v37 = vmul.f32 %v7148_v36, %v7148_v36 }
 0x2cf   : > { %834 = vadd.xlane.f32.xlu1 %v831_v37 }
 0x358   : > { %v833_v25 = vpop.xlane.xlu1 %832 }
 0x359   : > { %v836_v26 = vmul.f32 0.0078125, %v833_v25 }
 0x35b   : > { %v838_v27 = vadd.f32 1e-06, %v836_v26 }
 0x35c   : > { %v835_v28 = vpop.xlane.xlu1 %834 }
 0x35d   : > { %5818 = vrsqrt.f32 %v838_v27  ;;  %v837_v29 = vmul.f32 0.0078125, %v835_v28 }
 0x35f   : > { %v839_v30 = vadd.f32 1e-06, %v837_v29 }
 0x361   : > { %5820 = vrsqrt.f32 %v839_v30 }
 0x367   : > { %v5819_v31 = vpop.eup %5818 }
 0x368   : > { %v842_v34 = vmul.f32 %v5819_v31, %v7143_v32  ;;  %v908_v32 = vld [vmem:[#allocation12] sm:$0x7] }
 0x369   : > { %v913_v46 = vrot.slane %v908_v32, %v7159_v45  ;;  %v921_v51 = vrot.slane %v908_v32, %v920_v47 }
 0x36a   : > { %v850_v37 = vmul.f32 %v4547_v33, %v842_v34 }
 0x36b   : > { %v5821_v38 = vpop.eup %5820 }
 0x36c   : > { %v858_v39 = vadd.f32 %v4548_v35, %v850_v37  ;;  %v843_v40 = vmul.f32 %v5821_v38, %v7148_v36  ;;  %v7164_v36 = vsub.s32 1, %v7156_v44 }
 0x36e   : > { %990 = vmatmul.mubr.f32.vlgmr.msra.gmra.mrb[0].mxu0 %v858_v39  ;;  %4889 = vmatprep.mubr.f32.mxu1 %v858_v39  ;;  %v851_v41 = vmul.f32 %v4547_v33, %v843_v40  ;;  %v917_v52 = vrot.slane %v908_v32, %v7164_v36 }
 0x36f   : > { %995 = vmatprep.mubr.f32.mxu0 %v6519_v10 }
 0x370   : > { %v859_v42 = vadd.f32 %v4548_v35, %v851_v41 }
 0x372   : > { %996 = vmatmul.mubr.f32.gmra.mrb[2].mxu0 %v859_v42  ;;  %4890 = vmatmul.mubr.f32.vlgmr.msra.gmra.mrb[0].mxu1 %v859_v42 }
 0x441   : > { %v991_v48 = vpop.f32.mrb[0].mxu0 }
 0x442   : > { %v992_v49 = vadd.f32 %v991_v48, %v913_v46  ;;  %v993_v50 = vpop.f32.mrb[1].mxu0 }
 0x443   : > { %v994_v59 = vadd.f32 %v993_v50, %v917_v52 }
 0x444   : > { %v7169_v53 = vmul.f32 0.17677669, %v992_v49 }
 0x445   : > { %v997_v54 = vpop.f32.mrb[2].mxu0  ;;  %v4891_v55 = vpop.f32.mrb[0].mxu1 }
 0x446   : > { %v1074_v56 = vadd.f32 %v4891_v55, %v921_v51  ;;  %v999_v57 = vpop.f32.mrb[3].mxu0  ;;  %v1068_v58 = vpop.f32.mrb[1].mxu1  ;;  %4896 = vmatprep.mubr.msk.f32.mxu0 %vm1101_vm0, %v7169_v53  ;;  %v998_v4 = vadd.f32 %v997_v54, %v913_v46 }
 0x447   : > { %v1000_v60 = vadd.f32 %v999_v57, %v917_v52  ;;  %v1069_v61 = vadd.f32 %v1068_v58, %v921_v51 }
 0x448   : > { %v7187_v6 = vmul.f32 0.17677669, %v998_v4  ;;  %v1083_v4 = vld [vmem:[#allocation14 + $0x20] sm:$0xff] }
 0x449   : > { %v5191_v63 = vpack.c.bf16 %v1000_v60, %v994_v59  ;;  %v5197_v0 = vpack.c.bf16 %v1074_v56, %v1069_v61  ;;  %v7179_v1 = vpack.i.bf16 %v1000_v60, %v994_v59  ;;  %v7181_v2 = vpack.i.bf16 %v1074_v56, %v1069_v61 }
 0x44b   : > { %5193 = vmatprep.subr.msk.bf16.mxu0 %vm7175_vm1, %v5191_v63  ;;  %5198 = vmatprep.subr.bf16.mxu1 %v5197_v0 }
 0x44c   : > { %5196 = vmatpush3.bf16.xpose.msk.msra.mxu0 %vm7175_vm1, %v5191_v63  ;;  %5200 = vmatpush3.bf16.msra.mxu1 %v5197_v0 }
 0x453   : > { %4897 = vmatmul.mubr.msk.f32.vlgmr.msra.gmra.mrb[4].mxu0 %vm1101_vm0, %v7187_v6 }
 0x526   : > { %v4898_v8 = vpop.f32.mrb[4].mxu0 }
 0x527   : > { %v1186_v9 = vadd.f32 %v4898_v8, %v7193_v7  ;;  %v1180_v11 = vpop.f32.mrb[5].mxu0  ;;  %v1084_v8 = vld [vmem:[#allocation14 + $0x28] sm:$0xff] }
 0x528   : > { %v1181_v12 = vadd.f32 %v7193_v7, %v1180_v11  ;;  %v5211_v11 = vpack.c.bf16 %v1084_v8, %v1083_v4 }
 0x529   : > { %v1193_v13 = vsel %vm1189_vm2, %v1186_v9, -inf }
 0x52a   : > { %1194 = vmax.xlane.f32.xlu1 %v1193_v13  ;;  %v1190_v14 = vsel %vm1189_vm2, %v1181_v12, -inf  ;;  %5212 = vmatprep.subr.bf16.mxu0 %v5211_v11 }
 0x52b   : > { %1191 = vmax.xlane.f32.xlu0 %v1190_v14  ;;  %5214 = vmatpush3.bf16.msra.mxu0 %v5211_v11 }
 0x5b7   : > { %v1195_v15 = vpop.xlane.xlu1 %1194 }
 0x5b8   : > { %v1197_v16 = vsub.f32 %v1186_v9, %v1195_v15  ;;  %v1192_v17 = vpop.xlane.xlu0 %1191  ;;  %v1085_v9 = vld [vmem:[#allocation14 + $0x30] sm:$0xff] }
 0x5b9   : > { %v1196_v18 = vsub.f32 %v1181_v12, %v1192_v17  ;;  %v1086_v12 = vld [vmem:[#allocation14 + $0x38] sm:$0xff] }
 0x5ba   : > { %v1200_v19 = vmul.f32 1.442695, %v1197_v16  ;;  %v5215_v13 = vpack.c.bf16 %v1086_v12, %v1085_v9 }
 0x5bb   : > { %v1198_v20 = vmul.f32 1.442695, %v1196_v18 }
 0x5bc   : > { %5822 = vpow2.f32 %v1200_v19  ;;  %5216 = vmatprep.subr.bf16.mxu0 %v5215_v13 }
 0x5bd   : > { %5824 = vpow2.f32 %v1198_v20  ;;  %5218 = vmatpush3.bf16.msra.mxu0 %v5215_v13 }
 0x5c6   : > { %v5823_v21 = vpop.eup %5822 }
 0x5c7   : > { %v5825_v22 = vpop.eup %5824  ;;  %v1205_v23 = vsel %vm1189_vm2, %v5823_v21, 0.0 }
 0x5c8   : > { %1206 = vadd.xlane.f32.xlu1 %v1205_v23  ;;  %v1202_v24 = vsel %vm1189_vm2, %v5825_v22, 0.0 }
 0x5c9   : > { %1203 = vadd.xlane.f32.xlu0 %v1202_v24 }
 0x5d9   : > { %1293 = vrot.lane.b32.xlu1 %v7169_v53, %s6520_s28 }
 0x5dd   : > { %1295 = vrot.lane.b32.xlu1 %v7187_v6, %s6520_s28 }
 0x5df   : > { %5759 = vrot.lane.b32.xlu0 %v7179_v1, %s6520_s28 }
 0x655   : > { %v1207_v25 = vpop.xlane.xlu1 %1206 }
 0x656   : > { %5826 = vrcp.f32 %v1207_v25  ;;  %v1204_v26 = vpop.xlane.xlu0 %1203 }
 0x657   : > { %5828 = vrcp.f32 %v1204_v26  ;;  %v1079_v26 = vld [vmem:[#allocation14] sm:$0xff] }
 0x659   : > { %v1294_v37 = vpop.permute.xlu1 %1293 }
 0x65a   : > { %v5760_v27 = vpop.permute.xlu0 %5759 }
 0x65b   : > { %v5762_v28 = vunpack.i.h.bf16 %v5760_v27  ;;  %v5761_v29 = vunpack.i.l.bf16 %v5760_v27  ;;  %v1080_v27 = vld [vmem:[#allocation14 + $0x8] sm:$0xff] }
 0x65d   : > { %v5201_v30 = vpack.c.bf16 %v5762_v28, %v5761_v29  ;;  %v1296_v38 = vpop.permute.xlu1 %1295  ;;  %v5219_v28 = vpack.c.bf16 %v1080_v27, %v1079_v26  ;;  %v1081_v29 = vld [vmem:[#allocation14 + $0x10] sm:$0xff] }
 0x65f   : > { %5203 = vmatprep.subr.msk.bf16.mxu1 %vm7175_vm1, %v5201_v30  ;;  %5220 = vmatprep.subr.bf16.mxu0 %v5219_v28 }
 0x660   : > { %v5827_v31 = vpop.eup %5826 }
 0x661   : > { %v5829_v33 = vpop.eup %5828  ;;  %v1211_v35 = vmul.f32 %v5827_v31, %v5823_v21 }
 0x662   : > { %v1209_v34 = vmul.f32 %v5829_v33, %v5825_v22 }
 0x664   : > { %4903 = vmatprep.mubr.msk.f32.mxu1 %vm1189_vm2, %v1209_v34 }
 0x665   : > { %4904 = vmatmul.mubr.msk.f32.vlgmr.msra.gmra.mrb[2].mxu1 %vm1189_vm2, %v1211_v35 }
 0x666   : > { %5206 = vmatpush3.bf16.xpose.msk.msra.mxu1 %vm7175_vm1, %v5201_v30  ;;  %4910 = vmatprep.mubr.msk.f32.mxu1 %vm1101_vm0, %v1294_v37  ;;  %v1082_v30 = vld [vmem:[#allocation14 + $0x18] sm:$0xff] }
 0x667   : > { %v5223_v34 = vpack.c.bf16 %v1082_v30, %v1081_v29 }
 0x66d   : > { %4911 = vmatmul.mubr.msk.f32.vlgmr.msra.gmra.mrb[4].mxu1 %vm1101_vm0, %v1296_v38 }
 0x738   : > { %v7215_v39 = vpop.f32.mrb[2].mxu1 }
 0x739   : > { %v7217_v40 = vpop.f32.mrb[3].mxu1 }
 0x740   : > { %v4912_v41 = vpop.f32.mrb[4].mxu1 }
 0x741   : > { %v1381_v42 = vadd.f32 %v4912_v41, %v7193_v7  ;;  %v1375_v43 = vpop.f32.mrb[5].mxu1 }
 0x742   : > { %v1376_v32 = vadd.f32 %v7193_v7, %v1375_v43 }
 0x743   : > { %v1387_v46 = vsel %vm1189_vm2, %v1381_v42, -inf }
 0x744   : > { %1388 = vmax.xlane.f32.xlu0 %v1387_v46  ;;  %v1384_v48 = vsel %vm1189_vm2, %v1376_v32, -inf }
 0x745   : > { %1385 = vmax.xlane.f32.xlu1 %v1384_v48 }
 0x756   : > { %5764 = vrot.lane.b32.xlu1 %v7181_v2, %s6520_s28 }
 0x75a   : > { %1657 = vrot.lane.b32.xlu1 %v7169_v53, %s6521_s19 }
 0x75e   : > { %1659 = vrot.lane.b32.xlu1 %v7187_v6, %s6521_s19 }
 0x7d1   : > { %v1389_v49 = vpop.xlane.xlu0 %1388 }
 0x7d2   : > { %v1391_v50 = vsub.f32 %v1381_v42, %v1389_v49  ;;  %v1386_v51 = vpop.xlane.xlu1 %1385 }
 0x7d3   : > { %v1390_v52 = vsub.f32 %v1376_v32, %v1386_v51 }
 0x7d4   : > { %v1394_v54 = vmul.f32 1.442695, %v1391_v50 }
 0x7d5   : > { %v1392_v55 = vmul.f32 1.442695, %v1390_v52 }
 0x7d6   : > { %5830 = vpow2.f32 %v1394_v54  ;;  %v5765_v56 = vpop.permute.xlu1 %5764 }
 0x7d7   : > { %v5767_v57 = vunpack.i.h.bf16 %v5765_v56  ;;  %v5766_v58 = vunpack.i.l.bf16 %v5765_v56  ;;  %5832 = vpow2.f32 %v1392_v55 }
 0x7d9   : > { %v5207_v59 = vpack.c.bf16 %v5767_v57, %v5766_v58  ;;  %v1087_v57 = vld [vmem:[#allocation14 + $0x40] sm:$0xff]  ;;  %v1088_v58 = vld [vmem:[#allocation14 + $0x48] sm:$0xff] }
 0x7da   : > { %v1658_v24 = vpop.permute.xlu1 %1657 }
 0x7db   : > { %5208 = vmatprep.subr.bf16.mxu1 %v5207_v59 }
 0x7dc   : > { %5210 = vmatpush3.bf16.msra.mxu1 %v5207_v59  ;;  %v1089_v59 = vld [vmem:[#allocation14 + $0x50] sm:$0xff] }
 0x7de   : > { %v1660_v25 = vpop.permute.xlu1 %1659 }
 0x7e0   : > { %v5831_v60 = vpop.eup %5830 }
 0x7e1   : > { %v1399_v61 = vsel %vm1189_vm2, %v5831_v60, 0.0  ;;  %v5833_v63 = vpop.eup %5832 }
 0x7e2   : > { %1400 = vadd.xlane.f32.xlu0 %v1399_v61  ;;  %v1396_v0 = vsel %vm1189_vm2, %v5833_v63, 0.0  ;;  %v1090_v61 = vld [vmem:[#allocation14 + $0x58] sm:$0xff] }
 0x7e6   : > { %1397 = vadd.xlane.f32.xlu0 %v1396_v0 }
 0x7fc   : > { %5769 = vrot.lane.b32.xlu0 %v7179_v1, %s6521_s19 }
 0x86f   : > { %v1401_v14 = vpop.xlane.xlu0 %1400 }
 0x870   : > { %5834 = vrcp.f32 %v1401_v14 }
 0x873   : > { %v1398_v15 = vpop.xlane.xlu0 %1397 }
 0x874   : > { %5836 = vrcp.f32 %v1398_v15 }
 0x877   : > { %v5770_v16 = vpop.permute.xlu0 %5769 }
 0x878   : > { %v5772_v17 = vunpack.i.h.bf16 %v5770_v16  ;;  %v5771_v18 = vunpack.i.l.bf16 %v5770_v16 }
 0x87a   : > { %v5227_v19 = vpack.c.bf16 %v5772_v17, %v5771_v18  ;;  %v5835_v20 = vpop.eup %5834 }
 0x87b   : > { %v1405_v23 = vmul.f32 %v5835_v20, %v5831_v60  ;;  %v5237_v60 = vpack.c.bf16 %v1088_v58, %v1087_v57 }
 0x87c   : > { %5229 = vmatprep.subr.msk.bf16.mxu1 %vm7175_vm1, %v5227_v19 }
 0x87e   : > { %v5837_v21 = vpop.eup %5836 }
 0x87f   : > { %v1403_v22 = vmul.f32 %v5837_v21, %v5833_v63  ;;  %v5241_v63 = vpack.c.bf16 %v1090_v61, %v1089_v59 }
 0x881   : > { %4917 = vmatprep.mubr.msk.f32.mxu1 %vm1189_vm2, %v1403_v22 }
 0x882   : > { %4918 = vmatmul.mubr.msk.f32.vlgmr.msra.gmra.mrb[6].mxu1 %vm1189_vm2, %v1405_v23 }
 0x883   : > { %5232 = vmatpush3.bf16.xpose.msk.msra.mxu1 %vm7175_vm1, %v5227_v19  ;;  %4946 = vmatprep.mubr.msk.f32.mxu1 %vm1101_vm0, %v1658_v24 }
 0x88a   : > { %4947 = vmatmul.mubr.msk.f32.vlgmr.msra.gmra.mrb[8].mxu1 %vm1101_vm0, %v1660_v25 }
 0x955   : > { %v4919_v31 = vpop.f32.mrb[6].mxu1 }
 0x956   : > { %v1486_v33 = vpop.f32.mrb[7].mxu1 }
 0x957   : > { %4928 = vmatprep.mubr.msk.f32.mxu0 %vm1101_vm0, %v1486_v33 }
 0x958   : > { %4929 = vmatmul.mubr.msk.f32.vlgmr.msra.gmra.mrb[6].mxu0 %vm1101_vm0, %v4919_v31 }
 0x959   : > { %5222 = vmatpush3.bf16.msra.mxu0 %v5219_v28  ;;  %4939 = vmatprep.mubr.msk.f32.mxu0 %vm1101_vm0, %v7217_v40 }
 0x95a   : > { %5224 = vmatprep.subr.bf16.mxu0 %v5223_v34 }
 0x95d   : > { %v4948_v35 = vpop.f32.mrb[8].mxu1  ;;  %5226 = vmatpush3.bf16.msra.mxu0 %v5223_v34 }
 0x95e   : > { %v1745_v37 = vadd.f32 %v4948_v35, %v7193_v7  ;;  %v1739_v38 = vpop.f32.mrb[9].mxu1  ;;  %5238 = vmatprep.subr.bf16.mxu0 %v5237_v60 }
 0x95f   : > { %v1740_v41 = vadd.f32 %v7193_v7, %v1739_v38 }
 0x960   : > { %v1751_v42 = vsel %vm1189_vm2, %v1745_v37, -inf  ;;  %4940 = vmatmul.mubr.msk.f32.vlgmr.msra.gmra.mrb[6].mxu0 %vm1101_vm0, %v7215_v39 }
 0x961   : > { %1752 = vmax.xlane.f32.xlu0 %v1751_v42  ;;  %v1748_v43 = vsel %vm1189_vm2, %v1740_v41, -inf  ;;  %5240 = vmatpush3.bf16.msra.mxu0 %v5237_v60  ;;  %v1091_v42 = vld [vmem:[#allocation14 + $0x60] sm:$0xff] }
 0x962   : > { %1749 = vmax.xlane.f32.xlu1 %v1748_v43  ;;  %5242 = vmatprep.subr.bf16.mxu0 %v5241_v63  ;;  %v1092_v43 = vld [vmem:[#allocation14 + $0x68] sm:$0xff] }
 0x965   : > { %5244 = vmatpush3.bf16.msra.mxu0 %v5241_v63  ;;  %v2275_v63 = vld [vmem:[#allocation20 + $0x8] sm:$0xff] }
 0x973   : > { %5774 = vrot.lane.b32.xlu1 %v7181_v2, %s6521_s19 }
 0x977   : > { %1940 = vrot.lane.b32.xlu1 %v7169_v53, %s6522_s16 }
 0x97b   : > { %1942 = vrot.lane.b32.xlu1 %v7187_v6, %s6522_s16 }
 0x9ee   : > { %v1753_v40 = vpop.xlane.xlu0 %1752 }
 0x9ef   : > { %v1755_v32 = vsub.f32 %v1745_v37, %v1753_v40  ;;  %v1750_v46 = vpop.xlane.xlu1 %1749  ;;  %v1093_v40 = vld [vmem:[#allocation14 + $0x70] sm:$0xff] }
 0x9f0   : > { %v1754_v48 = vsub.f32 %v1740_v41, %v1750_v46  ;;  %v1094_v46 = vld [vmem:[#allocation14 + $0x78] sm:$0xff] }
 0x9f1   : > { %v1758_v49 = vmul.f32 1.442695, %v1755_v32  ;;  %v5255_v32 = vpack.c.bf16 %v1092_v43, %v1091_v42  ;;  %v2295_v43 = vld [vmem:[#allocation20 + $0xa8] sm:$0xff] }
 0x9f2   : > { %v1756_v39 = vmul.f32 1.442695, %v1754_v48  ;;  %v5259_v48 = vpack.c.bf16 %v1094_v46, %v1093_v40  ;;  %v2297_v40 = vld [vmem:[#allocation20 + $0xb8] sm:$0xff]  ;;  %v2294_v46 = vld [vmem:[#allocation20 + $0xa0] sm:$0xff] }
 0x9f3   : > { %5838 = vpow2.f32 %v1758_v49  ;;  %v5775_v50 = vpop.permute.xlu1 %5774  ;;  %5256 = vmatprep.subr.bf16.mxu0 %v5255_v32 }
 0x9f4   : > { %v5777_v51 = vunpack.i.h.bf16 %v5775_v50  ;;  %v5776_v52 = vunpack.i.l.bf16 %v5775_v50  ;;  %5840 = vpow2.f32 %v1756_v39 }
 0x9f6   : > { %v5233_v54 = vpack.c.bf16 %v5777_v51, %v5776_v52 }
 0x9f7   : > { %v1941_v16 = vpop.permute.xlu1 %1940 }
 0x9f8   : > { %5234 = vmatprep.subr.bf16.mxu1 %v5233_v54 }
 0x9f9   : > { %5236 = vmatpush3.bf16.msra.mxu1 %v5233_v54 }
 0x9fb   : > { %v1943_v17 = vpop.permute.xlu1 %1942 }
 0x9fd   : > { %v5839_v55 = vpop.eup %5838 }
 0x9fe   : > { %v1763_v53 = vsel %vm1189_vm2, %v5839_v55, 0.0  ;;  %v5841_v56 = vpop.eup %5840 }
 0x9ff   : > { %1764 = vadd.xlane.f32.xlu0 %v1763_v53  ;;  %v1760_v6 = vsel %vm1189_vm2, %v5841_v56, 0.0 }
 0xa03   : > { %1761 = vadd.xlane.f32.xlu0 %v1760_v6  ;;  %v4582_v6 = vld [vmem:[#allocation15] ss:$0 sm:$0xff] }
 0xa19   : > { %5779 = vrot.lane.b32.xlu0 %v7179_v1, %s6522_s16 }
 0xa8c   : > { %v1765_v0 = vpop.xlane.xlu0 %1764 }
 0xa8d   : > { %5842 = vrcp.f32 %v1765_v0  ;;  %v2277_v0 = vld [vmem:[#allocation20 + $0x18] sm:$0xff] }
 0xa90   : > { %v1762_v4 = vpop.xlane.xlu0 %1761 }
 0xa91   : > { %5844 = vrcp.f32 %v1762_v4  ;;  %v2274_v4 = vld [vmem:[#allocation20] sm:$0xff] }
 0xa94   : > { %v5780_v8 = vpop.permute.xlu0 %5779 }
 0xa95   : > { %v5782_v9 = vunpack.i.h.bf16 %v5780_v8  ;;  %v5781_v11 = vunpack.i.l.bf16 %v5780_v8  ;;  %v5263_v8 = vpack.c.bf16 %v2277_v0, %v2275_v63  ;;  %v2415_v63 = vld [vmem:[#allocation23 + $0x80] sm:$0xff]  ;;  %v2416_v0 = vld [vmem:[#allocation23 + $0x88] sm:$0xff] }
 0xa97   : > { %v5245_v12 = vpack.c.bf16 %v5782_v9, %v5781_v11  ;;  %v5843_v1 = vpop.eup %5842  ;;  %v2276_v9 = vld [vmem:[#allocation20 + $0x10] sm:$0xff]  ;;  %v2279_v11 = vld [vmem:[#allocation20 + $0x28] sm:$0xff] }
 0xa98   : > { %v1769_v15 = vmul.f32 %v5843_v1, %v5839_v55  ;;  %v5265_v1 = vpack.c.bf16 %v2276_v9, %v2274_v4  ;;  %v2399_v4 = vld [vmem:[#allocation23] sm:$0xff]  ;;  %v2400_v9 = vld [vmem:[#allocation23 + $0x8] sm:$0xff] }
 0xa99   : > { %5247 = vmatprep.subr.msk.bf16.mxu1 %vm7175_vm1, %v5245_v12 }
 0xa9b   : > { %v5845_v13 = vpop.eup %5844 }
 0xa9c   : > { %v1767_v14 = vmul.f32 %v5845_v13, %v5841_v56 }
 0xa9e   : > { %4953 = vmatprep.mubr.msk.f32.mxu1 %vm1189_vm2, %v1767_v14  ;;  %v2280_v14 = vld [vmem:[#allocation20 + $0x30] sm:$0xff] }
 0xa9f   : > { %4954 = vmatmul.mubr.msk.f32.vlgmr.msra.gmra.mrb[10].mxu1 %vm1189_vm2, %v1769_v15  ;;  %v2285_v15 = vld [vmem:[#allocation20 + $0x58] sm:$0xff] }
 0xaa0   : > { %5250 = vmatpush3.bf16.xpose.msk.msra.mxu1 %vm7175_vm1, %v5245_v12  ;;  %4971 = vmatprep.mubr.msk.f32.mxu1 %vm1101_vm0, %v1941_v16  ;;  %v2281_v12 = vld [vmem:[#allocation20 + $0x38] sm:$0xff] }
 0xaa1   : > { %v5267_v13 = vpack.c.bf16 %v2281_v12, %v2279_v11  ;;  %v2417_v11 = vld [vmem:[#allocation23 + $0x90] sm:$0xff]  ;;  %v2418_v12 = vld [vmem:[#allocation23 + $0x98] sm:$0xff] }
 0xaa7   : > { %4972 = vmatmul.mubr.msk.f32.vlgmr.msra.gmra.mrb[12].mxu1 %vm1101_vm0, %v1943_v17 }
 0xb72   : > { %v4955_v18 = vpop.f32.mrb[10].mxu1 }
 0xb73   : > { %v1848_v19 = vpop.f32.mrb[11].mxu1 }
 0xb74   : > { %4964 = vmatprep.mubr.msk.f32.mxu0 %vm1101_vm0, %v1848_v19  ;;  %v2284_v19 = vld [vmem:[#allocation20 + $0x50] sm:$0xff] }
 0xb75   : > { %4965 = vmatmul.mubr.msk.f32.vlgmr.msra.gmra.mrb[6].mxu0 %vm1101_vm0, %v4955_v18  ;;  %v2282_v18 = vld [vmem:[#allocation20 + $0x40] sm:$0xff] }
 0xb76   : > { %5258 = vmatpush3.bf16.msra.mxu0 %v5255_v32  ;;  %v5283_v32 = vpack.c.bf16 %v2297_v40, %v2295_v43  ;;  %v2428_v43 = vld [vmem:[#allocation23 + $0xe8] sm:$0xff] }
 0xb77   : > { %5260 = vmatprep.subr.bf16.mxu0 %v5259_v48 }
 0xb7a   : > { %v4973_v20 = vpop.f32.mrb[12].mxu1  ;;  %5262 = vmatpush3.bf16.msra.mxu0 %v5259_v48  ;;  %v2296_v48 = vld [vmem:[#allocation20 + $0xb0] sm:$0xff] }
 0xb7b   : > { %v2028_v21 = vadd.f32 %v4973_v20, %v7193_v7  ;;  %v2022_v22 = vpop.f32.mrb[13].mxu1  ;;  %v5273_v20 = vpack.c.bf16 %v2284_v19, %v2282_v18  ;;  %v2403_v18 = vld [vmem:[#allocation23 + $0x20] sm:$0xff]  ;;  %v2404_v19 = vld [vmem:[#allocation23 + $0x28] sm:$0xff] }
 0xb7c   : > { %v2023_v23 = vadd.f32 %v7193_v7, %v2022_v22 }
 0xb7d   : > { %v2034_v24 = vsel %vm1189_vm2, %v2028_v21, -inf }
 0xb7e   : > { %2035 = vmax.xlane.f32.xlu0 %v2034_v24  ;;  %v2031_v25 = vsel %vm1189_vm2, %v2023_v23, -inf }
 0xb7f   : > { %2032 = vmax.xlane.f32.xlu1 %v2031_v25 }
 0xb90   : > { %5784 = vrot.lane.b32.xlu1 %v7181_v2, %s6522_s16 }
 0xc0b   : > { %v2036_v26 = vpop.xlane.xlu0 %2035 }
 0xc0c   : > { %v2038_v27 = vsub.f32 %v2028_v21, %v2036_v26  ;;  %v2033_v28 = vpop.xlane.xlu1 %2032 }
 0xc0d   : > { %v2037_v29 = vsub.f32 %v2023_v23, %v2033_v28 }
 0xc0e   : > { %v2041_v30 = vmul.f32 1.442695, %v2038_v27 }
 0xc0f   : > { %v2039_v31 = vmul.f32 1.442695, %v2037_v29  ;;  %v2287_v29 = vld [vmem:[#allocation20 + $0x68] sm:$0xff] }
 0xc10   : > { %v5785_v33 = vpop.permute.xlu1 %5784 }
 0xc11   : > { %5846 = vpow2.f32 %v2039_v31  ;;  %v5787_v34 = vunpack.i.h.bf16 %v5785_v33  ;;  %v5786_v35 = vunpack.i.l.bf16 %v5785_v33  ;;  %v2286_v33 = vld [vmem:[#allocation20 + $0x60] sm:$0xff] }
 0xc12   : > { %5848 = vpow2.f32 %v2041_v30  ;;  %v2289_v30 = vld [vmem:[#allocation20 + $0x78] sm:$0xff] }
 0xc13   : > { %v5251_v7 = vpack.c.bf16 %v5787_v34, %v5786_v35  ;;  %v5275_v31 = vpack.c.bf16 %v2289_v30, %v2287_v29  ;;  %v2288_v34 = vld [vmem:[#allocation20 + $0x70] sm:$0xff] }
 0xc14   : > { %v5277_v35 = vpack.c.bf16 %v2288_v34, %v2286_v33  ;;  %v2424_v29 = vld [vmem:[#allocation23 + $0xc8] sm:$0xff]  ;;  %v2407_v33 = vld [vmem:[#allocation23 + $0x40] sm:$0xff] }
 0xc15   : > { %5252 = vmatprep.subr.bf16.mxu1 %v5251_v7  ;;  %v2408_v34 = vld [vmem:[#allocation23 + $0x48] sm:$0xff] }
 0xc16   : > { %5254 = vmatpush3.bf16.msra.mxu1 %v5251_v7  ;;  %v2291_v7 = vld [vmem:[#allocation20 + $0x88] sm:$0xff] }
 0xc17   : > { %5264 = vmatprep.subr.bf16.mxu1 %v5263_v8  ;;  %v5295_v8 = vpack.c.bf16 %v2416_v0, %v2415_v63  ;;  %v2411_v0 = vld [vmem:[#allocation23 + $0x60] sm:$0xff] }
 0xc19   : > { %5296 = vmatprep.subr.bf16.mxu0 %v5295_v8 }
 0xc1b   : > { %v5847_v37 = vpop.eup %5846 }
 0xc1c   : > { %v2043_v38 = vsel %vm1189_vm2, %v5847_v37, 0.0  ;;  %v5849_v41 = vpop.eup %5848 }
 0xc1d   : > { %2044 = vadd.xlane.f32.xlu0 %v2043_v38  ;;  %v2046_v2 = vsel %vm1189_vm2, %v5849_v41, 0.0 }
 0xc21   : > { %2047 = vadd.xlane.f32.xlu0 %v2046_v2  ;;  %v2292_v2 = vld [vmem:[#allocation20 + $0x90] sm:$0xff] }
 0xcaa   : > { %v2045_v49 = vpop.xlane.xlu0 %2044 }
 0xcab   : > { %5850 = vrcp.f32 %v2045_v49  ;;  %v5285_v49 = vpack.c.bf16 %v2296_v48, %v2294_v46 }
 0xcae   : > { %v2048_v39 = vpop.xlane.xlu0 %2047 }
 0xcaf   : > { %5852 = vrcp.f32 %v2048_v39  ;;  %v2299_v39 = vld [vmem:[#allocation20 + $0xc8] sm:$0xff] }
 0xcb5   : > { %v5851_v50 = vpop.eup %5850 }
 0xcb6   : > { %v2050_v51 = vmul.f32 %v5851_v50, %v5847_v37  ;;  %v2293_v37 = vld [vmem:[#allocation20 + $0x98] sm:$0xff] }
 0xcb7   : > { %v5279_v38 = vpack.c.bf16 %v2293_v37, %v2291_v7  ;;  %v2301_v50 = vld [vmem:[#allocation20 + $0xd8] sm:$0xff]  ;;  %v5313_v37 = vpack.c.bf16 %v2408_v34, %v2407_v33 }
 0xcb8   : > { %4978 = vmatprep.mubr.msk.f32.mxu1 %vm1189_vm2, %v2050_v51  ;;  %v2298_v51 = vld [vmem:[#allocation20 + $0xc0] sm:$0xff] }
 0xcb9   : > { %v5853_v52 = vpop.eup %5852  ;;  %v2426_v7 = vld [vmem:[#allocation23 + $0xd8] sm:$0xff] }
 0xcba   : > { %v2052_v54 = vmul.f32 %v5853_v52, %v5849_v41  ;;  %v2290_v41 = vld [vmem:[#allocation20 + $0x80] sm:$0xff]  ;;  %v5287_v52 = vpack.c.bf16 %v2301_v50, %v2299_v39 }
 0xcbb   : > { %v5281_v42 = vpack.c.bf16 %v2292_v2, %v2290_v41  ;;  %v2409_v41 = vld [vmem:[#allocation23 + $0x50] sm:$0xff]  ;;  %v2410_v2 = vld [vmem:[#allocation23 + $0x58] sm:$0xff] }
 0xcbc   : > { %4979 = vmatmul.mubr.msk.f32.vlgmr.msra.gmra.mrb[14].mxu1 %vm1189_vm2, %v2052_v54  ;;  %v2300_v54 = vld [vmem:[#allocation20 + $0xd0] sm:$0xff]  ;;  %v5317_v40 = vpack.c.bf16 %v2410_v2, %v2409_v41  ;;  %v2561_v2 = vld [vmem:[#allocation11 + $0x188] sm:$0xff] }
 0xcbd   : > { %2382 = vmatprep.mubr.f32.mxu1 %v6519_v10  ;;  %5266 = vmatpush1.bf16.msra.mxu1 %v5265_v1  ;;  %v5297_v1 = vpack.c.bf16 %v2400_v9, %v2399_v4  ;;  %v2412_v4 = vld [vmem:[#allocation23 + $0x68] sm:$0xff]  ;;  %v2429_v9 = vld [vmem:[#allocation23 + $0xf0] sm:$0xff] }
 0xcbe   : > { %5268 = vmatprep.subr.bf16.mxu1 %v5267_v13  ;;  %v5299_v13 = vpack.c.bf16 %v2418_v12, %v2417_v11  ;;  %v5321_v8 = vpack.c.bf16 %v2412_v4, %v2411_v0  ;;  %v2413_v12 = vld [vmem:[#allocation23 + $0x70] sm:$0xff] }
 0xd8f   : > { %v4980_v55 = vpop.f32.mrb[14].mxu1 }
 0xd90   : > { %v2131_v53 = vpop.f32.mrb[15].mxu1 }
 0xd91   : > { %4989 = vmatprep.mubr.msk.f32.mxu0 %vm1101_vm0, %v2131_v53  ;;  %v2305_v53 = vld [vmem:[#allocation20 + $0xf8] sm:$0xff] }
 0xd92   : > { %4990 = vmatmul.mubr.msk.f32.vlgmr.msra.gmra.mrb[6].mxu0 %vm1101_vm0, %v4980_v55  ;;  %v2303_v55 = vld [vmem:[#allocation20 + $0xe8] sm:$0xff] }
 0xd93   : > { %5298 = vmatpush3.bf16.msra.mxu0 %v5297_v1  ;;  %v2414_v1 = vld [vmem:[#allocation23 + $0x78] sm:$0xff] }
 0xd94   : > { %5300 = vmatprep.subr.bf16.mxu0 %v5299_v13  ;;  %v5325_v13 = vpack.c.bf16 %v2414_v1, %v2413_v12 }
 0xe65   : > { %v4991_v56 = vpop.f32.mrb[6].mxu0 }
 0xe66   : > { %v2212_v57 = vpop.f32.mrb[7].mxu0  ;;  %v2224_v59 = vadd.f32 %v4991_v56, %v7139_v5  ;;  %v2283_v5 = vld [vmem:[#allocation20 + $0x48] sm:$0xff]  ;;  %v5289_v56 = vpack.c.bf16 %v2300_v54, %v2298_v51  ;;  %v4583_v54 = vld [vmem:[#allocation17] ss:$0 sm:$0xff] }
 0xe67   : > { %v2223_v58 = vadd.f32 %v2212_v57, %v7136_v3  ;;  %v2278_v3 = vld [vmem:[#allocation20 + $0x20] sm:$0xff]  ;;  %v5271_v17 = vpack.c.bf16 %v2285_v15, %v2283_v5  ;;  %v2420_v15 = vld [vmem:[#allocation23 + $0xa8] sm:$0xff] }
 0xe68   : > { %v7289_v61 = vadd.f32 %v4582_v6, %v2224_v59  ;;  %v5269_v16 = vpack.c.bf16 %v2280_v14, %v2278_v3  ;;  %v2302_v57 = vld [vmem:[#allocation20 + $0xe0] sm:$0xff]  ;;  %v2401_v3 = vld [vmem:[#allocation23 + $0x10] sm:$0xff] }
 0xe69   : > { %v7286_v60 = vadd.f32 %v4582_v6, %v2223_v58  ;;  %v5291_v6 = vpack.c.bf16 %v2305_v53, %v2303_v55  ;;  %v2304_v58 = vld [vmem:[#allocation20 + $0xf0] sm:$0xff]  ;;  %v2402_v14 = vld [vmem:[#allocation23 + $0x18] sm:$0xff]  ;;  %v2419_v5 = vld [vmem:[#allocation23 + $0xa0] sm:$0xff] }
 0xe6a   : > { %5270 = vmatpush1.bf16.msra.mxu1 %v5269_v16  ;;  %v5293_v59 = vpack.c.bf16 %v2304_v58, %v2302_v57  ;;  %v5301_v16 = vpack.c.bf16 %v2402_v14, %v2401_v3  ;;  %v4584_v53 = vld [vmem:[#allocation18] ss:$0 sm:$0xff] }
 0xe6b   : > { %2236 = vadd.xlane.f32.xlu0 %v7286_v60  ;;  %5272 = vmatprep.subr.bf16.mxu1 %v5271_v17  ;;  %v5303_v17 = vpack.c.bf16 %v2420_v15, %v2419_v5 }
 0xe6c   : > { %5302 = vmatpush3.bf16.msra.mxu0 %v5301_v16 }
 0xe6d   : > { %5304 = vmatprep.subr.bf16.mxu0 %v5303_v17 }
 0xe6e   : > { %5274 = vmatpush1.bf16.msra.mxu1 %v5273_v20  ;;  %v2421_v20 = vld [vmem:[#allocation23 + $0xb0] sm:$0xff] }
 0xe6f   : > { %2238 = vadd.xlane.f32.xlu0 %v7289_v61  ;;  %5276 = vmatprep.subr.bf16.mxu1 %v5275_v31 }
 0xe72   : > { %5278 = vmatpush1.bf16.msra.mxu1 %v5277_v35  ;;  %v2425_v35 = vld [vmem:[#allocation23 + $0xd0] sm:$0xff] }
 0xe73   : > { %5280 = vmatprep.subr.bf16.mxu1 %v5279_v38  ;;  %v5315_v38 = vpack.c.bf16 %v2426_v7, %v2425_v35 }
 0xe76   : > { %5282 = vmatpush1.bf16.msra.mxu1 %v5281_v42  ;;  %v2427_v42 = vld [vmem:[#allocation23 + $0xe0] sm:$0xff] }
 0xe77   : > { %5284 = vmatprep.subr.bf16.mxu1 %v5283_v32  ;;  %v5319_v32 = vpack.c.bf16 %v2428_v43, %v2427_v42  ;;  %v2564_v42 = vld [vmem:[#allocation11 + $0x1a0] sm:$0xff] }
 0xe78   : > { %v2560_v43 = vld [vmem:[#allocation11 + $0x180] sm:$0xff] }
 0xe7a   : > { %5286 = vmatpush1.bf16.msra.mxu1 %v5285_v49 }
 0xe7b   : > { %5288 = vmatprep.subr.bf16.mxu1 %v5287_v52 }
 0xe7e   : > { %5290 = vmatpush1.bf16.msra.mxu1 %v5289_v56 }
 0xe7f   : > { %5292 = vmatprep.subr.bf16.mxu1 %v5291_v6 }
 0xe82   : > { %5294 = vmatpush1.bf16.msra.mxu1 %v5293_v59 }
 0xef8   : > { %v2237_v21 = vpop.xlane.xlu0 %2236 }
 0xef9   : > { %v2240_v22 = vmul.f32 0.0078125, %v2237_v21  ;;  %v2422_v21 = vld [vmem:[#allocation23 + $0xb8] sm:$0xff] }
 0xefb   : > { %v7293_v23 = vsub.f32 %v7286_v60, %v2240_v22  ;;  %v5305_v22 = vpack.c.bf16 %v2404_v19, %v2403_v18 }
 0xefc   : > { %v2239_v24 = vpop.xlane.xlu0 %2238 }
 0xefd   : > { %v2241_v25 = vmul.f32 0.0078125, %v2239_v24  ;;  %v2244_v26 = vmul.f32 %v7293_v23, %v7293_v23  ;;  %v5307_v24 = vpack.c.bf16 %v2422_v21, %v2421_v20  ;;  %5306 = vmatpush3.bf16.msra.mxu0 %v5305_v22 }
 0xeff   : > { %v7298_v27 = vsub.f32 %v7289_v61, %v2241_v25  ;;  %2246 = vadd.xlane.f32.xlu0 %v2244_v26  ;;  %v2405_v25 = vld [vmem:[#allocation23 + $0x30] sm:$0xff]  ;;  %v2406_v26 = vld [vmem:[#allocation23 + $0x38] sm:$0xff]  ;;  %5308 = vmatprep.subr.bf16.mxu0 %v5307_v24 }
 0xf00   : > { %v5309_v30 = vpack.c.bf16 %v2406_v26, %v2405_v25 }
 0xf01   : > { %v2245_v28 = vmul.f32 %v7298_v27, %v7298_v27 }
 0xf02   : > { %5310 = vmatpush3.bf16.msra.mxu0 %v5309_v30 }
 0xf03   : > { %2248 = vadd.xlane.f32.xlu0 %v2245_v28  ;;  %v2423_v28 = vld [vmem:[#allocation23 + $0xc0] sm:$0xff] }
 0xf04   : > { %v5311_v31 = vpack.c.bf16 %v2424_v29, %v2423_v28 }
 0xf06   : > { %5312 = vmatprep.subr.bf16.mxu0 %v5311_v31  ;;  %v4585_v31 = vld [vmem:[#allocation24] ss:$0 sm:$0xff] }
 0xf07   : > { %5314 = vmatpush3.bf16.msra.mxu0 %v5313_v37 }
 0xf08   : > { %5316 = vmatprep.subr.bf16.mxu0 %v5315_v38 }
 0xf0b   : > { %5318 = vmatpush3.bf16.msra.mxu0 %v5317_v40  ;;  %v5327_v40 = vpack.c.bf16 %v2564_v42, %v2561_v2  ;;  %v2593_v2 = vld [vmem:[#allocation11 + $0x288] sm:$0xff] }
 0xf0c   : > { %5320 = vmatprep.subr.bf16.mxu0 %v5319_v32  ;;  %v2563_v32 = vld [vmem:[#allocation11 + $0x198] sm:$0xff] }
 0xf0d   : > { %5328 = vmatprep.subr.bf16.mxu1 %v5327_v40  ;;  %v2597_v40 = vld [vmem:[#allocation11 + $0x2a8] sm:$0xff] }
 0xf0f   : > { %5322 = vmatpush3.bf16.msra.mxu0 %v5321_v8 }
 0xf8c   : > { %v2247_v46 = vpop.xlane.xlu0 %2246 }
 0xf8d   : > { %v2250_v48 = vmul.f32 0.0078125, %v2247_v46  ;;  %v2567_v46 = vld [vmem:[#allocation11 + $0x1b8] sm:$0xff] }
 0xf8f   : > { %v2252_v49 = vadd.f32 1e-06, %v2250_v48  ;;  %v5329_v48 = vpack.c.bf16 %v2563_v32, %v2560_v43  ;;  %v2600_v32 = vld [vmem:[#allocation11 + $0x2c0] sm:$0xff] }
 0xf90   : > { %v2249_v39 = vpop.xlane.xlu0 %2248 }
 0xf91   : > { %5854 = vrsqrt.f32 %v2252_v49  ;;  %v2251_v50 = vmul.f32 0.0078125, %v2249_v39  ;;  %v2562_v39 = vld [vmem:[#allocation11 + $0x190] sm:$0xff] }
 0xf93   : > { %v2253_v51 = vadd.f32 1e-06, %v2251_v50  ;;  %v2565_v50 = vld [vmem:[#allocation11 + $0x1a8] sm:$0xff] }
 0xf95   : > { %5856 = vrsqrt.f32 %v2253_v51  ;;  %v2566_v51 = vld [vmem:[#allocation11 + $0x1b0] sm:$0xff] }
 0xf9b   : > { %v5855_v52 = vpop.eup %5854 }
 0xf9c   : > { %v2256_v55 = vmul.f32 %v5855_v52, %v7293_v23  ;;  %v2430_v23 = vld [vmem:[#allocation23 + $0xf8] sm:$0xff] }
 0xf9d   : > { %v5323_v11 = vpack.c.bf16 %v2430_v23, %v2429_v9  ;;  %v2569_v52 = vld [vmem:[#allocation11 + $0x1c8] sm:$0xff] }
 0xf9e   : > { %v2264_v56 = vmul.f32 %v4583_v54, %v2256_v55  ;;  %v2576_v55 = vld [vmem:[#allocation11 + $0x200] sm:$0xff] }
 0xf9f   : > { %v5857_v6 = vpop.eup %5856  ;;  %5324 = vmatprep.subr.bf16.mxu0 %v5323_v11 }
 0xfa0   : > { %v2272_v57 = vadd.f32 %v4584_v53, %v2264_v56  ;;  %v2257_v58 = vmul.f32 %v5857_v6, %v7298_v27  ;;  %5326 = vmatpush3.bf16.msra.mxu0 %v5325_v13  ;;  %v2306_v27 = vld [vmem:[#allocation21] sm:$0x3]  ;;  %v2568_v56 = vld [vmem:[#allocation11 + $0x1c0] sm:$0xff]  ;;  %v2571_v6 = vld [vmem:[#allocation11 + $0x1d8] sm:$0xff] }
 0xfa1   : > { %v2311_v3 = vrot.slane %v2306_v27, %v7159_v45  ;;  %v2315_v14 = vrot.slane %v2306_v27, %v7164_v36  ;;  %v2579_v27 = vld [vmem:[#allocation11 + $0x218] sm:$0xff] }
 0xfa2   : > { %2383 = vmatmul.mubr.f32.vlgmr.msra.gmra.mrb[16].mxu1 %v2272_v57  ;;  %v2265_v59 = vmul.f32 %v4583_v54, %v2257_v58  ;;  %v2573_v54 = vld [vmem:[#allocation11 + $0x1e8] sm:$0xff]  ;;  %v5363_v58 = vpack.c.bf16 %v2571_v6, %v2568_v56  ;;  %v2602_v56 = vld [vmem:[#allocation11 + $0x2d0] sm:$0xff] }
 0xfa3   : > { %2388 = vmatprep.mubr.f32.mxu1 %v6519_v10  ;;  %5330 = vmatpush1.bf16.msra.mxu1 %v5329_v48  ;;  %v5335_v57 = vpack.c.bf16 %v2576_v55, %v2573_v54  ;;  %v2595_v48 = vld [vmem:[#allocation11 + $0x298] sm:$0xff]  ;;  %v2598_v54 = vld [vmem:[#allocation11 + $0x2b0] sm:$0xff]  ;;  %v2605_v6 = vld [vmem:[#allocation11 + $0x2e8] sm:$0xff] }
 0xfa4   : > { %v2273_v63 = vadd.f32 %v4584_v53, %v2265_v59  ;;  %v5333_v53 = vpack.c.bf16 %v2569_v52, %v2566_v51  ;;  %v2572_v59 = vld [vmem:[#allocation11 + $0x1e0] sm:$0xff]  ;;  %v2606_v52 = vld [vmem:[#allocation11 + $0x2f0] sm:$0xff] }
 0xfa6   : > { %2389 = vmatmul.mubr.f32.gmra.mrb[18].mxu1 %v2273_v63  ;;  %v2575_v63 = vld [vmem:[#allocation11 + $0x1f8] sm:$0xff] }
 0xfa7   : > { %2690 = vmatprep.mubr.f32.mxu1 %v6519_v10  ;;  %v5337_v0 = vpack.c.bf16 %v2575_v63, %v2572_v59  ;;  %v2604_v59 = vld [vmem:[#allocation11 + $0x2e0] sm:$0xff]  ;;  %v2607_v63 = vld [vmem:[#allocation11 + $0x2f8] sm:$0xff] }
0x1075   : > { %v2384_v5 = vpop.f32.mrb[16].mxu1 }
0x1076   : > { %v2385_v15 = vadd.f32 %v2384_v5, %v2311_v3  ;;  %v2386_v16 = vpop.f32.mrb[17].mxu1 }
0x1077   : > { %v2387_v17 = vadd.f32 %v2386_v16, %v2315_v14  ;;  %v2578_v16 = vld [vmem:[#allocation11 + $0x210] sm:$0xff] }
0x1078   : > { %v2395_v20 = vmax.f32 %v2385_v15, 0.0  ;;  %v2577_v15 = vld [vmem:[#allocation11 + $0x208] sm:$0xff] }
0x1079   : > { %v2396_v18 = vmax.f32 %v2387_v17, 0.0  ;;  %v2390_v19 = vpop.f32.mrb[18].mxu1  ;;  %v2581_v17 = vld [vmem:[#allocation11 + $0x228] sm:$0xff] }
0x107a   : > { %v2391_v21 = vadd.f32 %v2390_v19, %v2311_v3  ;;  %v2392_v22 = vpop.f32.mrb[19].mxu1  ;;  %v2582_v3 = vld [vmem:[#allocation11 + $0x230] sm:$0xff]  ;;  %v5341_v19 = vpack.c.bf16 %v2581_v17, %v2578_v16 }
0x107b   : > { %v2393_v24 = vadd.f32 %v2392_v22, %v2315_v14  ;;  %2495 = vmatprep.mubr.f32.mxu0 %v2396_v18  ;;  %v2574_v14 = vld [vmem:[#allocation11 + $0x1f0] sm:$0xff]  ;;  %v5339_v5 = vpack.c.bf16 %v2582_v3, %v2579_v27  ;;  %v2580_v22 = vld [vmem:[#allocation11 + $0x220] sm:$0xff]  ;;  %v4586_v3 = vld [vmem:[#allocation8 + $0x1] ss:$0 sm:$0xff] }
0x107c   : > { %2496 = vmatmul.mubr.f32.vlgmr.msra.gmra.mrb[8].mxu0 %v2395_v20  ;;  %v2397_v26 = vmax.f32 %v2391_v21, 0.0  ;;  %v5367_v18 = vpack.c.bf16 %v2577_v15, %v2574_v14  ;;  %v2585_v20 = vld [vmem:[#allocation11 + $0x248] sm:$0xff]  ;;  %v2588_v21 = vld [vmem:[#allocation11 + $0x260] sm:$0xff] }
0x107d   : > { %v2398_v25 = vmax.f32 %v2393_v24, 0.0  ;;  %v5343_v24 = vpack.c.bf16 %v2588_v21, %v2585_v20  ;;  %v2609_v21 = vld [vmem:[#allocation12 + $0x3] sm:$0x7] }
0x107f   : > { %2500 = vmatprep.mubr.f32.mxu0 %v2398_v25  ;;  %v2583_v25 = vld [vmem:[#allocation11 + $0x238] sm:$0xff] }
0x1080   : > { %2501 = vmatmul.mubr.f32.gmra.mrb[10].mxu0 %v2397_v26  ;;  %v2584_v26 = vld [vmem:[#allocation11 + $0x240] sm:$0xff] }
0x114f   : > { %v4739_v28 = vpop.f32.mrb[8].mxu0 }
0x1150   : > { %v4740_v29 = vpop.f32.mrb[9].mxu0 }
0x1151   : > { %v4741_v30 = vadd.f32 %v4740_v29, %v4739_v28  ;;  %v2587_v28 = vld [vmem:[#allocation11 + $0x258] sm:$0xff]  ;;  %v5371_v29 = vpack.c.bf16 %v2583_v25, %v2580_v22  ;;  %v2614_v22 = vrot.slane %v2609_v21, %v7159_v45 }
0x1153   : > { %v2506_v33 = vadd.f32 %v4741_v30, %v7286_v60  ;;  %v4742_v34 = vpop.f32.mrb[10].mxu0  ;;  %v2570_v60 = vld [vmem:[#allocation11 + $0x1d0] sm:$0xff]  ;;  %v5345_v30 = vpack.c.bf16 %v2587_v28, %v2584_v26  ;;  %v2622_v26 = vrot.slane %v2609_v21, %v920_v47  ;;  %v2618_v28 = vrot.slane %v2609_v21, %v7164_v36 }
0x1154   : > { %v4743_v35 = vpop.f32.mrb[11].mxu0  ;;  %v5331_v49 = vpack.c.bf16 %v2570_v60, %v2567_v46  ;;  %v2592_v46 = vld [vmem:[#allocation11 + $0x280] sm:$0xff]  ;;  %v5351_v60 = vpack.c.bf16 %v2600_v32, %v2597_v40 }
0x1155   : > { %v4744_v7 = vadd.f32 %v4743_v35, %v4742_v34  ;;  %v7309_v37 = vadd.f32 %v4585_v31, %v2506_v33  ;;  %v2594_v33 = vld [vmem:[#allocation11 + $0x290] sm:$0xff] }
0x1156   : > { %5332 = vmatprep.subr.bf16.mxu1 %v5331_v49  ;;  %v2586_v34 = vld [vmem:[#allocation11 + $0x250] sm:$0xff]  ;;  %v2596_v49 = vld [vmem:[#allocation11 + $0x2a0] sm:$0xff] }
0x1157   : > { %v2507_v38 = vadd.f32 %v4744_v7, %v7289_v61  ;;  %2521 = vadd.xlane.f32.xlu1 %v7309_v37  ;;  %v5359_v61 = vpack.c.bf16 %v2565_v50, %v2562_v39  ;;  %5334 = vmatpush1.bf16.msra.mxu1 %v5333_v53  ;;  %v2589_v7 = vld [vmem:[#allocation11 + $0x268] sm:$0xff]  ;;  %v2599_v39 = vld [vmem:[#allocation11 + $0x2b8] sm:$0xff]  ;;  %v5379_v50 = vpack.c.bf16 %v2595_v48, %v2592_v46 }
0x1158   : > { %5336 = vmatprep.subr.bf16.mxu1 %v5335_v57  ;;  %v5375_v42 = vpack.c.bf16 %v2589_v7, %v2586_v34  ;;  %v5353_v51 = vpack.c.bf16 %v2599_v39, %v2596_v49  ;;  %v2601_v53 = vld [vmem:[#allocation11 + $0x2c8] sm:$0xff] }
0x1159   : > { %v7313_v41 = vadd.f32 %v4585_v31, %v2507_v38  ;;  %5360 = vmatprep.subr.bf16.mxu0 %v5359_v61  ;;  %v2591_v31 = vld [vmem:[#allocation11 + $0x278] sm:$0xff]  ;;  %v2590_v38 = vld [vmem:[#allocation11 + $0x270] sm:$0xff]  ;;  %v5383_v57 = vpack.c.bf16 %v2601_v53, %v2598_v54 }
0x115a   : > { %5362 = vmatpush3.bf16.msra.mxu0 %v5359_v61  ;;  %v5347_v35 = vpack.c.bf16 %v2594_v33, %v2591_v31  ;;  %v5349_v43 = vpack.c.bf16 %v2593_v2, %v2590_v38  ;;  %v2603_v61 = vld [vmem:[#allocation11 + $0x2d8] sm:$0xff] }
0x115b   : > { %2523 = vadd.xlane.f32.xlu0 %v7313_v41  ;;  %5364 = vmatprep.subr.bf16.mxu0 %v5363_v58  ;;  %v5355_v55 = vpack.c.bf16 %v2606_v52, %v2603_v61 }
0x115c   : > { %5338 = vmatpush1.bf16.msra.mxu1 %v5337_v0  ;;  %v5387_v0 = vpack.c.bf16 %v2607_v63, %v2604_v59  ;;  %v7365_v59 = vld [vmem:[%s701_s23] ss:$0 sm:$0xff] }
0x115d   : > { %5340 = vmatprep.subr.bf16.mxu1 %v5339_v5  ;;  %v4587_v5 = vld [vmem:[#allocation9 + $0x1] ss:$0 sm:$0xff] }
0x115e   : > { %5366 = vmatpush3.bf16.msra.mxu0 %v5363_v58  ;;  %v5357_v58 = vpack.c.bf16 %v2605_v6, %v2602_v56 }
0x115f   : > { %5368 = vmatprep.subr.bf16.mxu0 %v5367_v18 }
0x1160   : > { %5342 = vmatpush1.bf16.msra.mxu1 %v5341_v19 }
0x1161   : > { %5344 = vmatprep.subr.bf16.mxu1 %v5343_v24 }
0x1162   : > { %5370 = vmatpush3.bf16.msra.mxu0 %v5367_v18 }
0x1163   : > { %5372 = vmatprep.subr.bf16.mxu0 %v5371_v29 }
0x1164   : > { %5346 = vmatpush1.bf16.msra.mxu1 %v5345_v30 }
0x1165   : > { %5348 = vmatprep.subr.bf16.mxu1 %v5347_v35 }
0x1166   : > { %5374 = vmatpush3.bf16.msra.mxu0 %v5371_v29 }
0x1167   : > { %5376 = vmatprep.subr.bf16.mxu0 %v5375_v42 }
0x1168   : > { %5350 = vmatpush1.bf16.msra.mxu1 %v5349_v43 }
0x1169   : > { %5352 = vmatprep.subr.bf16.mxu1 %v5351_v60 }
0x116a   : > { %5378 = vmatpush3.bf16.msra.mxu0 %v5375_v42 }
0x116b   : > { %5380 = vmatprep.subr.bf16.mxu0 %v5379_v50 }
0x116c   : > { %5354 = vmatpush1.bf16.msra.mxu1 %v5353_v51 }
0x116d   : > { %5356 = vmatprep.subr.bf16.mxu1 %v5355_v55 }
0x116e   : > { %5382 = vmatpush3.bf16.msra.mxu0 %v5379_v50 }
0x116f   : > { %5384 = vmatprep.subr.bf16.mxu0 %v5383_v57 }
0x1170   : > { %5358 = vmatpush1.bf16.msra.mxu1 %v5357_v58 }
0x1172   : > { %5386 = vmatpush3.bf16.msra.mxu0 %v5383_v57 }
0x1173   : > { %5388 = vmatprep.subr.bf16.mxu0 %v5387_v0 }
0x1176   : > { %5390 = vmatpush3.bf16.msra.mxu0 %v5387_v0 }
0x11e4   : > { %v2522_v4 = vpop.xlane.xlu1 %2521 }
0x11e5   : > { %v2525_v8 = vmul.f32 0.0078125, %v2522_v4 }
0x11e7   : > { %v7317_v9 = vsub.f32 %v7309_v37, %v2525_v8 }
0x11e8   : > { %v2524_v23 = vpop.xlane.xlu0 %2523 }
0x11e9   : > { %v2526_v11 = vmul.f32 0.0078125, %v2524_v23  ;;  %v2529_v12 = vmul.f32 %v7317_v9, %v7317_v9 }
0x11eb   : > { %v7322_v1 = vsub.f32 %v7313_v41, %v2526_v11  ;;  %2531 = vadd.xlane.f32.xlu0 %v2529_v12 }
0x11ed   : > { %v2530_v13 = vmul.f32 %v7322_v1, %v7322_v1 }
0x11ef   : > { %2533 = vadd.xlane.f32.xlu0 %v2530_v13 }
0x1278   : > { %v2532_v4 = vpop.xlane.xlu0 %2531 }
0x1279   : > { %v2535_v8 = vmul.f32 0.0078125, %v2532_v4 }
0x127b   : > { %v2537_v23 = vadd.f32 1e-06, %v2535_v8 }
0x127c   : > { %v2534_v11 = vpop.xlane.xlu0 %2533 }
0x127d   : > { %5858 = vrsqrt.f32 %v2537_v23  ;;  %v2536_v12 = vmul.f32 0.0078125, %v2534_v11 }
0x127f   : > { %v2538_v13 = vadd.f32 1e-06, %v2536_v12 }
0x1281   : > { %5860 = vrsqrt.f32 %v2538_v13 }
0x1287   : > { %v5859_v27 = vpop.eup %5858 }
0x1288   : > { %v2541_v14 = vmul.f32 %v5859_v27, %v7317_v9 }
0x128a   : > { %v2549_v15 = vmul.f32 %v4586_v3, %v2541_v14 }
0x128b   : > { %v5861_v16 = vpop.eup %5860 }
0x128c   : > { %v2557_v17 = vadd.f32 %v4587_v5, %v2549_v15  ;;  %v2542_v18 = vmul.f32 %v5861_v16, %v7322_v1 }
0x128e   : > { %2691 = vmatmul.mubr.f32.vlgmr.msra.gmra.mrb[20].mxu1 %v2557_v17  ;;  %5024 = vmatprep.mubr.f32.mxu0 %v2557_v17  ;;  %v2550_v19 = vmul.f32 %v4586_v3, %v2542_v18 }
0x128f   : > { %2696 = vmatprep.mubr.f32.mxu1 %v6519_v10 }
0x1290   : > { %v2558_v20 = vadd.f32 %v4587_v5, %v2550_v19 }
0x1292   : > { %2697 = vmatmul.mubr.f32.gmra.mrb[22].mxu1 %v2558_v20  ;;  %5025 = vmatmul.mubr.f32.vlgmr.msra.gmra.mrb[12].mxu0 %v2558_v20 }
0x1361   : > { %v2692_v24 = vpop.f32.mrb[20].mxu1 }
0x1362   : > { %v2693_v25 = vadd.f32 %v2692_v24, %v2614_v22  ;;  %v2694_v9 = vpop.f32.mrb[21].mxu1 }
0x1363   : > { %v2695_v35 = vadd.f32 %v2694_v9, %v2618_v28 }
0x1364   : > { %v2778_v1 = vmul.f32 0.17677669, %v2693_v25 }
0x1365   : > { %v2698_v29 = vpop.f32.mrb[22].mxu1  ;;  %v5026_v30 = vpop.f32.mrb[12].mxu0 }
0x1366   : > { %v2775_v31 = vadd.f32 %v5026_v30, %v2622_v26  ;;  %v2700_v33 = vpop.f32.mrb[23].mxu1  ;;  %v2769_v34 = vpop.f32.mrb[13].mxu0  ;;  %5031 = vmatprep.mubr.msk.f32.mxu1 %vm1101_vm0, %v2778_v1  ;;  %v2699_v44 = vadd.f32 %v2698_v29, %v2614_v22 }
0x1367   : > { %v2701_v7 = vadd.f32 %v2700_v33, %v2618_v28  ;;  %v2770_v38 = vadd.f32 %v2769_v34, %v2622_v26 }
0x1368   : > { %v2779_v47 = vmul.f32 0.17677669, %v2699_v44 }
0x1369   : > { %v5397_v2 = vpack.c.bf16 %v2775_v31, %v2770_v38  ;;  %v7334_v42 = vpack.i.bf16 %v2701_v7, %v2695_v35  ;;  %v5391_v43 = vpack.c.bf16 %v2701_v7, %v2695_v35  ;;  %v7336_v40 = vpack.i.bf16 %v2775_v31, %v2770_v38 }
0x136b   : > { %5398 = vmatprep.subr.bf16.mxu0 %v5397_v2  ;;  %5794 = vrot.lane.b32.xlu1 %v7334_v42, %s6521_s19 }
0x136c   : > { %5789 = vrot.lane.b32.xlu0 %v7334_v42, %s6520_s28  ;;  %5393 = vmatprep.subr.msk.bf16.mxu1 %vm7175_vm1, %v5391_v43 }
0x136d   : > { %5396 = vmatpush3.bf16.xpose.msk.msra.mxu1 %vm7175_vm1, %v5391_v43  ;;  %5400 = vmatpush3.bf16.msra.mxu0 %v5397_v2 }
0x1370   : > { %2987 = vrot.lane.b32.xlu0 %v2778_v1, %s6520_s28 }
0x1374   : > { %2989 = vrot.lane.b32.xlu0 %v2779_v47, %s6520_s28  ;;  %5032 = vmatmul.mubr.msk.f32.vlgmr.msra.gmra.mrb[24].mxu1 %vm1101_vm0, %v2779_v47 }
0x1378   : > { %3351 = vrot.lane.b32.xlu0 %v2778_v1, %s6521_s19 }
0x137c   : > { %3353 = vrot.lane.b32.xlu0 %v2779_v47, %s6521_s19 }
0x13dd   : > { %v5795_v32 = vpop.permute.xlu1 %5794 }
0x13de   : > { %v5790_v46 = vpop.permute.xlu0 %5789  ;;  %v5797_v60 = vunpack.i.h.bf16 %v5795_v32  ;;  %v5796_v48 = vunpack.i.l.bf16 %v5795_v32 }
0x13df   : > { %v5792_v49 = vunpack.i.h.bf16 %v5790_v46  ;;  %v5791_v39 = vunpack.i.l.bf16 %v5790_v46 }
0x13e0   : > { %v5427_v61 = vpack.c.bf16 %v5797_v60, %v5796_v48 }
0x13e1   : > { %v5401_v50 = vpack.c.bf16 %v5792_v49, %v5791_v39 }
0x13e2   : > { %v2988_v51 = vpop.permute.xlu0 %2987 }
0x13e3   : > { %5403 = vmatprep.subr.msk.bf16.mxu1 %vm7175_vm1, %v5401_v50  ;;  %5045 = vmatprep.mubr.msk.f32.mxu1 %vm1101_vm0, %v2988_v51 }
0x13e4   : > { %5406 = vmatpush3.bf16.xpose.msk.msra.mxu1 %vm7175_vm1, %v5401_v50 }
0x13e5   : > { %5429 = vmatprep.subr.msk.bf16.mxu1 %vm7175_vm1, %v5427_v61 }
0x13e6   : > { %v2990_v52 = vpop.permute.xlu0 %2989 }
0x13ea   : > { %v3352_v54 = vpop.permute.xlu0 %3351 }
0x13eb   : > { %5046 = vmatmul.mubr.msk.f32.vlgmr.msra.gmra.mrb[26].mxu1 %vm1101_vm0, %v2990_v52 }
0x13ec   : > { %5432 = vmatpush3.bf16.xpose.msk.msra.mxu1 %vm7175_vm1, %v5427_v61  ;;  %5081 = vmatprep.mubr.msk.f32.mxu1 %vm1101_vm0, %v3352_v54 }
0x13ee   : > { %v3354_v55 = vpop.permute.xlu0 %3353 }
0x13f3   : > { %5082 = vmatmul.mubr.msk.f32.vlgmr.msra.gmra.mrb[28].mxu1 %vm1101_vm0, %v3354_v55 }
0x1447   : > { %v5033_v53 = vpop.f32.mrb[24].mxu1 }
0x1448   : > { %v2875_v56 = vpop.f32.mrb[25].mxu1  ;;  %v2881_v11 = vadd.f32 %v7365_v59, %v5033_v53 }
0x1449   : > { %v2876_v25 = vadd.f32 %v7365_v59, %v2875_v56 }
0x144a   : > { %v2887_v12 = vsel %vm1189_vm2, %v2881_v11, -inf }
0x144b   : > { %v2884_v26 = vsel %vm1189_vm2, %v2876_v25, -inf }
0x14be   : > { %v5047_v6 = vpop.f32.mrb[26].mxu1 }
0x14bf   : > { %v3069_v57 = vpop.f32.mrb[27].mxu1  ;;  %v3075_v28 = vadd.f32 %v7365_v59, %v5047_v6 }
0x14c0   : > { %v3070_v9 = vadd.f32 %v7365_v59, %v3069_v57 }
0x14c1   : > { %v3081_v29 = vsel %vm1189_vm2, %v3075_v28, -inf }
0x14c6   : > { %v5083_v58 = vpop.f32.mrb[28].mxu1 }
0x14c7   : > { %v3439_v63 = vadd.f32 %v7365_v59, %v5083_v58  ;;  %v3433_v0 = vpop.f32.mrb[29].mxu1 }
0x14c8   : > { %v3434_v4 = vadd.f32 %v7365_v59, %v3433_v0 }
0x14c9   : > { %v3445_v8 = vsel %vm1189_vm2, %v3439_v63, -inf }
0x14ca   : > { %3446 = vmax.xlane.f32.xlu1 %v3445_v8  ;;  %v3442_v23 = vsel %vm1189_vm2, %v3434_v4, -inf }
0x14cb   : > { %3443 = vmax.xlane.f32.xlu0 %v3442_v23 }
0x14db   : > { %5799 = vrot.lane.b32.xlu1 %v7336_v40, %s6521_s19 }
0x14df   : > { %3634 = vrot.lane.b32.xlu1 %v2778_v1, %s6522_s16  ;;  %v3078_v1 = vsel %vm1189_vm2, %v3070_v9, -inf }
0x14e3   : > { %3636 = vrot.lane.b32.xlu1 %v2779_v47, %s6522_s16 }
0x1507   : > { %2888 = vmax.xlane.f32.xlu1 %v2887_v12 }
0x1557   : > { %v3447_v13 = vpop.xlane.xlu1 %3446 }
0x1558   : > { %v3449_v27 = vsub.f32 %v3439_v63, %v3447_v13  ;;  %v3444_v3 = vpop.xlane.xlu0 %3443 }
0x1559   : > { %v3448_v14 = vsub.f32 %v3434_v4, %v3444_v3 }
0x155a   : > { %v3452_v5 = vmul.f32 1.442695, %v3449_v27 }
0x155b   : > { %v3450_v15 = vmul.f32 1.442695, %v3448_v14  ;;  %v5800_v16 = vpop.permute.xlu1 %5799 }
0x155c   : > { %5862 = vpow2.f32 %v3452_v5  ;;  %v5802_v17 = vunpack.i.h.bf16 %v5800_v16  ;;  %v5801_v18 = vunpack.i.l.bf16 %v5800_v16 }
0x155d   : > { %5864 = vpow2.f32 %v3450_v15 }
0x155e   : > { %v5433_v19 = vpack.c.bf16 %v5802_v17, %v5801_v18 }
0x155f   : > { %v3635_v44 = vpop.permute.xlu1 %3634 }
0x1560   : > { %5434 = vmatprep.subr.bf16.mxu1 %v5433_v19 }
0x1561   : > { %5436 = vmatpush3.bf16.msra.mxu1 %v5433_v19 }
0x1563   : > { %v3637_v47 = vpop.permute.xlu1 %3636 }
0x1566   : > { %v5863_v20 = vpop.eup %5862 }
0x1567   : > { %v3457_v21 = vsel %vm1189_vm2, %v5863_v20, 0.0  ;;  %v5865_v22 = vpop.eup %5864 }
0x1568   : > { %3458 = vadd.xlane.f32.xlu0 %v3457_v21  ;;  %v3454_v24 = vsel %vm1189_vm2, %v5865_v22, 0.0 }
0x156c   : > { %3455 = vadd.xlane.f32.xlu0 %v3454_v24 }
0x1582   : > { %5804 = vrot.lane.b32.xlu0 %v7334_v42, %s6522_s16 }
0x1594   : > { %v2889_v60 = vpop.xlane.xlu1 %2888 }
0x1595   : > { %v2891_v48 = vsub.f32 %v2881_v11, %v2889_v60  ;;  %v2781_v60 = vld [vmem:[#allocation14 + $0x80] sm:$0xff] }
0x1597   : > { %v2894_v50 = vmul.f32 1.442695, %v2891_v48  ;;  %v2782_v48 = vld [vmem:[#allocation14 + $0x88] sm:$0xff] }
0x15a1   : > { %2885 = vmax.xlane.f32.xlu0 %v2884_v26 }
0x15a5   : > { %3079 = vmax.xlane.f32.xlu0 %v3078_v1 }
0x15a9   : > { %3082 = vmax.xlane.f32.xlu0 %v3081_v29 }
0x15f5   : > { %v3459_v30 = vpop.xlane.xlu0 %3458 }
0x15f6   : > { %5866 = vrcp.f32 %v3459_v30 }
0x15f9   : > { %v3456_v31 = vpop.xlane.xlu0 %3455 }
0x15fa   : > { %5868 = vrcp.f32 %v3456_v31 }
0x15fb   : > { %5870 = vpow2.f32 %v2894_v50 }
0x15fd   : > { %v5805_v33 = vpop.permute.xlu0 %5804 }
0x15fe   : > { %v5807_v34 = vunpack.i.h.bf16 %v5805_v33  ;;  %v5806_v35 = vunpack.i.l.bf16 %v5805_v33 }
0x1600   : > { %v5445_v7 = vpack.c.bf16 %v5807_v34, %v5806_v35  ;;  %v5867_v38 = vpop.eup %5866 }
0x1601   : > { %v3463_v43 = vmul.f32 %v5867_v38, %v5863_v20 }
0x1602   : > { %5447 = vmatprep.subr.msk.bf16.mxu1 %vm7175_vm1, %v5445_v7 }
0x1604   : > { %v5869_v2 = vpop.eup %5868 }
0x1605   : > { %v3461_v42 = vmul.f32 %v5869_v2, %v5865_v22  ;;  %v5871_v0 = vpop.eup %5870 }
0x1606   : > { %v2899_v23 = vsel %vm1189_vm2, %v5871_v0, 0.0 }
0x1607   : > { %5088 = vmatprep.mubr.msk.f32.mxu1 %vm1189_vm2, %v3461_v42  ;;  %v2785_v42 = vld [vmem:[#allocation14 + $0xa0] sm:$0xff] }
0x1608   : > { %5089 = vmatmul.mubr.msk.f32.vlgmr.msra.gmra.mrb[30].mxu1 %vm1189_vm2, %v3463_v43  ;;  %v2786_v43 = vld [vmem:[#allocation14 + $0xa8] sm:$0xff] }
0x1609   : > { %5450 = vmatpush3.bf16.xpose.msk.msra.mxu1 %vm7175_vm1, %v5445_v7  ;;  %5106 = vmatprep.mubr.msk.f32.mxu1 %vm1101_vm0, %v3635_v44  ;;  %v5411_v44 = vpack.c.bf16 %v2786_v43, %v2785_v42  ;;  %v3980_v43 = vld [vmem:[#allocation20 + $0x140] sm:$0xff] }
0x1610   : > { %5107 = vmatmul.mubr.msk.f32.vlgmr.msra.gmra.mrb[32].mxu1 %vm1101_vm0, %v3637_v47  ;;  %v2787_v47 = vld [vmem:[#allocation14 + $0xb0] sm:$0xff] }
0x162e   : > { %v2886_v32 = vpop.xlane.xlu0 %2885 }
0x162f   : > { %v2890_v49 = vsub.f32 %v2876_v25, %v2886_v32  ;;  %v2788_v32 = vld [vmem:[#allocation14 + $0xb8] sm:$0xff] }
0x1631   : > { %v2892_v61 = vmul.f32 1.442695, %v2890_v49  ;;  %v5419_v49 = vpack.c.bf16 %v2782_v48, %v2781_v60 }
0x1632   : > { %v3080_v46 = vpop.xlane.xlu0 %3079 }
0x1633   : > { %v3084_v52 = vsub.f32 %v3070_v9, %v3080_v46  ;;  %5872 = vpow2.f32 %v2892_v61  ;;  %v5415_v46 = vpack.c.bf16 %v2788_v32, %v2787_v47 }
0x1635   : > { %v3086_v53 = vmul.f32 1.442695, %v3084_v52 }
0x1636   : > { %v3083_v39 = vpop.xlane.xlu0 %3082 }
0x1637   : > { %v3085_v51 = vsub.f32 %v3075_v28, %v3083_v39 }
0x1639   : > { %v3088_v62 = vmul.f32 1.442695, %v3085_v51 }
0x163b   : > { %5874 = vpow2.f32 %v3088_v62 }
0x163c   : > { %5876 = vpow2.f32 %v3086_v53 }
0x163d   : > { %v5873_v8 = vpop.eup %5872 }
0x163e   : > { %v2896_v12 = vsel %vm1189_vm2, %v5873_v8, 0.0 }
0x1645   : > { %v5875_v11 = vpop.eup %5874 }
0x1646   : > { %v5877_v13 = vpop.eup %5876  ;;  %v3093_v27 = vsel %vm1189_vm2, %v5875_v11, 0.0 }
0x16db   : > { %v7395_v54 = vpop.f32.mrb[30].mxu1 }
0x16dc   : > { %v7397_v55 = vpop.f32.mrb[31].mxu1 }
0x16e3   : > { %v5108_v56 = vpop.f32.mrb[32].mxu1 }
0x16e4   : > { %v3722_v6 = vadd.f32 %v7365_v59, %v5108_v56  ;;  %v3716_v57 = vpop.f32.mrb[33].mxu1 }
0x16e5   : > { %v3717_v58 = vadd.f32 %v7365_v59, %v3716_v57  ;;  %v3090_v59 = vsel %vm1189_vm2, %v5877_v13, 0.0 }
0x16e6   : > { %v3728_v63 = vsel %vm1189_vm2, %v3722_v6, -inf }
0x16e7   : > { %3729 = vmax.xlane.f32.xlu0 %v3728_v63  ;;  %v3725_v4 = vsel %vm1189_vm2, %v3717_v58, -inf  ;;  %v2783_v63 = vld [vmem:[#allocation14 + $0x90] sm:$0xff] }
0x16e8   : > { %3726 = vmax.xlane.f32.xlu1 %v3725_v4 }
0x16eb   : > { %2900 = vadd.xlane.f32.xlu0 %v2899_v23 }
0x16ec   : > { %2897 = vadd.xlane.f32.xlu1 %v2896_v12  ;;  %v2790_v12 = vld [vmem:[#allocation14 + $0xc8] sm:$0xff] }
0x16ef   : > { %3094 = vadd.xlane.f32.xlu0 %v3093_v27  ;;  %v2791_v27 = vld [vmem:[#allocation14 + $0xd0] sm:$0xff] }
0x16f0   : > { %3091 = vadd.xlane.f32.xlu1 %v3090_v59  ;;  %v2792_v59 = vld [vmem:[#allocation14 + $0xd8] sm:$0xff] }
0x1701   : > { %5809 = vrot.lane.b32.xlu1 %v7336_v40, %s6520_s28 }
0x1774   : > { %v3730_v3 = vpop.xlane.xlu0 %3729 }
0x1775   : > { %v3732_v14 = vsub.f32 %v3722_v6, %v3730_v3  ;;  %v3727_v5 = vpop.xlane.xlu1 %3726  ;;  %v5441_v3 = vpack.c.bf16 %v2792_v59, %v2791_v27  ;;  %v3997_v27 = vld [vmem:[#allocation20 + $0x1c8] sm:$0xff]  ;;  %v3999_v59 = vld [vmem:[#allocation20 + $0x1d8] sm:$0xff] }
0x1776   : > { %v3731_v15 = vsub.f32 %v3717_v58, %v3727_v5  ;;  %v2794_v5 = vld [vmem:[#allocation14 + $0xe8] sm:$0xff] }
0x1777   : > { %v3735_v16 = vmul.f32 1.442695, %v3732_v14  ;;  %v2793_v14 = vld [vmem:[#allocation14 + $0xe0] sm:$0xff] }
0x1778   : > { %v3733_v17 = vmul.f32 1.442695, %v3731_v15  ;;  %v2901_v18 = vpop.xlane.xlu0 %2900  ;;  %v5455_v15 = vpack.c.bf16 %v2794_v5, %v2793_v14  ;;  %v5487_v14 = vpack.c.bf16 %v3999_v59, %v3997_v27  ;;  %v3996_v5 = vld [vmem:[#allocation20 + $0x1c0] sm:$0xff] }
0x1779   : > { %5878 = vpow2.f32 %v3735_v16  ;;  %v2898_v19 = vpop.xlane.xlu1 %2897  ;;  %v2795_v16 = vld [vmem:[#allocation14 + $0xf0] sm:$0xff] }
0x177a   : > { %5880 = vpow2.f32 %v3733_v17  ;;  %v2796_v17 = vld [vmem:[#allocation14 + $0xf8] sm:$0xff] }
0x177b   : > { %5882 = vrcp.f32 %v2901_v18  ;;  %v5459_v18 = vpack.c.bf16 %v2796_v17, %v2795_v16  ;;  %v4001_v16 = vld [vmem:[#allocation20 + $0x1e8] sm:$0xff]  ;;  %v4003_v17 = vld [vmem:[#allocation20 + $0x1f8] sm:$0xff] }
0x177c   : > { %5884 = vrcp.f32 %v2898_v19  ;;  %v3095_v20 = vpop.xlane.xlu0 %3094 }
0x177d   : > { %v3092_v21 = vpop.xlane.xlu1 %3091 }
0x177e   : > { %5886 = vrcp.f32 %v3092_v21  ;;  %v4620_v21 = vld [vmem:[#allocation15 + $0x1] ss:$0 sm:$0xff] }
0x177f   : > { %5888 = vrcp.f32 %v3095_v20 }
0x1781   : > { %v5810_v22 = vpop.permute.xlu1 %5809 }
0x1782   : > { %v5812_v24 = vunpack.i.h.bf16 %v5810_v22  ;;  %v5811_v25 = vunpack.i.l.bf16 %v5810_v22 }
0x1783   : > { %v5879_v9 = vpop.eup %5878 }
0x1784   : > { %v5881_v26 = vpop.eup %5880  ;;  %v5407_v28 = vpack.c.bf16 %v5812_v24, %v5811_v25  ;;  %v3740_v1 = vsel %vm1189_vm2, %v5879_v9, 0.0 }
0x1785   : > { %v5883_v29 = vpop.eup %5882  ;;  %3741 = vadd.xlane.f32.xlu0 %v3740_v1  ;;  %v3737_v35 = vsel %vm1189_vm2, %v5881_v26, 0.0  ;;  %v3972_v1 = vld [vmem:[#allocation20 + $0x100] sm:$0xff] }
0x1786   : > { %v5885_v30 = vpop.eup %5884  ;;  %5408 = vmatprep.subr.bf16.mxu0 %v5407_v28  ;;  %v2905_v34 = vmul.f32 %v5883_v29, %v5871_v0  ;;  %v2784_v0 = vld [vmem:[#allocation14 + $0x98] sm:$0xff] }
0x1787   : > { %v2903_v31 = vmul.f32 %v5885_v30, %v5873_v8  ;;  %v5423_v23 = vpack.c.bf16 %v2784_v0, %v2783_v63  ;;  %v3974_v30 = vld [vmem:[#allocation20 + $0x110] sm:$0xff]  ;;  %v3988_v63 = vld [vmem:[#allocation20 + $0x180] sm:$0xff] }
0x1788   : > { %v5887_v33 = vpop.eup %5886  ;;  %v3990_v0 = vld [vmem:[#allocation20 + $0x190] sm:$0xff] }
0x1789   : > { %v5889_v7 = vpop.eup %5888  ;;  %5038 = vmatprep.mubr.msk.f32.mxu0 %vm1189_vm2, %v2903_v31  ;;  %3738 = vadd.xlane.f32.xlu0 %v3737_v35  ;;  %v3097_v38 = vmul.f32 %v5887_v33, %v5877_v13  ;;  %v3977_v31 = vld [vmem:[#allocation20 + $0x128] sm:$0xff]  ;;  %v3979_v33 = vld [vmem:[#allocation20 + $0x138] sm:$0xff]  ;;  %v3976_v35 = vld [vmem:[#allocation20 + $0x120] sm:$0xff] }
0x178a   : > { %5039 = vmatmul.mubr.msk.f32.vlgmr.msra.gmra.mrb[14].mxu0 %vm1189_vm2, %v2905_v34  ;;  %v3099_v2 = vmul.f32 %v5889_v7, %v5875_v11  ;;  %v2789_v11 = vld [vmem:[#allocation14 + $0xc0] sm:$0xff]  ;;  %v5465_v34 = vpack.c.bf16 %v3974_v30, %v3972_v1  ;;  %v3978_v7 = vld [vmem:[#allocation20 + $0x130] sm:$0xff] }
0x178b   : > { %5410 = vmatpush3.bf16.msra.mxu0 %v5407_v28  ;;  %5052 = vmatprep.mubr.msk.f32.mxu0 %vm1189_vm2, %v3097_v38  ;;  %v5437_v13 = vpack.c.bf16 %v2790_v12, %v2789_v11  ;;  %v3975_v28 = vld [vmem:[#allocation20 + $0x118] sm:$0xff]  ;;  %v3992_v11 = vld [vmem:[#allocation20 + $0x1a0] sm:$0xff] }
0x178c   : > { %5412 = vmatprep.subr.bf16.mxu0 %v5411_v44  ;;  %v3983_v38 = vld [vmem:[#allocation20 + $0x158] sm:$0xff] }
0x178d   : > { %v4117_v1 = vld [vmem:[#allocation23 + $0x190] sm:$0xff] }
0x178e   : > { %5053 = vmatmul.mubr.msk.f32.vlgmr.msra.gmra.mrb[16].mxu0 %vm1189_vm2, %v3099_v2  ;;  %v5469_v2 = vpack.c.bf16 %v3978_v7, %v3976_v35  ;;  %v4120_v35 = vld [vmem:[#allocation23 + $0x1a8] sm:$0xff] }
0x178f   : > { %5414 = vmatpush3.bf16.msra.mxu0 %v5411_v44  ;;  %v3982_v44 = vld [vmem:[#allocation20 + $0x150] sm:$0xff] }
0x1790   : > { %5416 = vmatprep.subr.bf16.mxu0 %v5415_v46  ;;  %v5473_v47 = vpack.c.bf16 %v3982_v44, %v3980_v43  ;;  %v4122_v43 = vld [vmem:[#allocation23 + $0x1b8] sm:$0xff] }
0x1793   : > { %5418 = vmatpush3.bf16.msra.mxu0 %v5415_v46 }
0x1794   : > { %5420 = vmatprep.subr.bf16.mxu0 %v5419_v49 }
0x179f   : > { %5814 = vrot.lane.b32.xlu0 %v7336_v40, %s6522_s16 }
0x1812   : > { %v3742_v39 = vpop.xlane.xlu0 %3741 }
0x1813   : > { %5890 = vrcp.f32 %v3742_v39 }
0x1816   : > { %v3739_v50 = vpop.xlane.xlu0 %3738 }
0x1817   : > { %5892 = vrcp.f32 %v3739_v50 }
0x181a   : > { %v5815_v51 = vpop.permute.xlu0 %5814 }
0x181b   : > { %v5817_v40 = vunpack.i.h.bf16 %v5815_v51  ;;  %v5816_v61 = vunpack.i.l.bf16 %v5815_v51 }
0x181d   : > { %v5451_v52 = vpack.c.bf16 %v5817_v40, %v5816_v61  ;;  %v5891_v62 = vpop.eup %5890  ;;  %v3985_v40 = vld [vmem:[#allocation20 + $0x168] sm:$0xff]  ;;  %v3987_v61 = vld [vmem:[#allocation20 + $0x178] sm:$0xff] }
0x181e   : > { %v3746_v6 = vmul.f32 %v5891_v62, %v5879_v9  ;;  %v3984_v62 = vld [vmem:[#allocation20 + $0x160] sm:$0xff] }
0x181f   : > { %5452 = vmatprep.subr.bf16.mxu1 %v5451_v52 }
0x1820   : > { %5454 = vmatpush3.bf16.msra.mxu1 %v5451_v52  ;;  %v5475_v52 = vpack.c.bf16 %v3987_v61, %v3985_v40  ;;  %v4107_v40 = vld [vmem:[#allocation23 + $0x140] sm:$0xff]  ;;  %v4108_v61 = vld [vmem:[#allocation23 + $0x148] sm:$0xff] }
0x1821   : > { %v5893_v53 = vpop.eup %5892 }
0x1822   : > { %v3744_v56 = vmul.f32 %v5893_v53, %v5881_v26  ;;  %v3986_v53 = vld [vmem:[#allocation20 + $0x170] sm:$0xff] }
0x1824   : > { %5113 = vmatprep.mubr.msk.f32.mxu1 %vm1189_vm2, %v3744_v56  ;;  %v5477_v56 = vpack.c.bf16 %v3986_v53, %v3984_v62  ;;  %v4126_v62 = vld [vmem:[#allocation23 + $0x1d8] sm:$0xff]  ;;  %v5513_v53 = vpack.c.bf16 %v4108_v61, %v4107_v40 }
0x1825   : > { %5114 = vmatmul.mubr.msk.f32.vlgmr.msra.gmra.mrb[34].mxu1 %vm1189_vm2, %v3746_v6  ;;  %v3989_v6 = vld [vmem:[#allocation20 + $0x188] sm:$0xff] }
0x1826   : > { %4081 = vmatprep.mubr.f32.mxu1 %v6519_v10 }
0x185d   : > { %v5040_v57 = vpop.f32.mrb[14].mxu0 }
0x185e   : > { %v2978_v58 = vpop.f32.mrb[15].mxu0 }
0x1861   : > { %v5054_v4 = vpop.f32.mrb[16].mxu0 }
0x1862   : > { %v3180_v8 = vpop.f32.mrb[17].mxu0 }
0x1863   : > { %5063 = vmatprep.mubr.msk.f32.mxu0 %vm1101_vm0, %v3180_v8  ;;  %v3993_v8 = vld [vmem:[#allocation20 + $0x1a8] sm:$0xff] }
0x1864   : > { %5064 = vmatmul.mubr.msk.f32.vlgmr.msra.gmra.mrb[18].mxu0 %vm1101_vm0, %v5054_v4  ;;  %v5481_v4 = vpack.c.bf16 %v3990_v0, %v3988_v63  ;;  %v4128_v63 = vld [vmem:[#allocation23 + $0x1e8] sm:$0xff] }
0x1865   : > { %5422 = vmatpush3.bf16.msra.mxu0 %v5419_v49  ;;  %5074 = vmatprep.mubr.msk.f32.mxu0 %vm1101_vm0, %v2978_v58 }
0x1866   : > { %5424 = vmatprep.subr.bf16.mxu0 %v5423_v23 }
0x1869   : > { %5426 = vmatpush3.bf16.msra.mxu0 %v5423_v23  ;;  %v3995_v23 = vld [vmem:[#allocation20 + $0x1b8] sm:$0xff] }
0x186a   : > { %5438 = vmatprep.subr.bf16.mxu0 %v5437_v13  ;;  %v5483_v12 = vpack.c.bf16 %v3995_v23, %v3993_v8 }
0x186c   : > { %5075 = vmatmul.mubr.msk.f32.vlgmr.msra.gmra.mrb[18].mxu0 %vm1101_vm0, %v5040_v57  ;;  %v3991_v57 = vld [vmem:[#allocation20 + $0x198] sm:$0xff] }
0x186d   : > { %5440 = vmatpush3.bf16.msra.mxu0 %v5437_v13  ;;  %5099 = vmatprep.mubr.msk.f32.mxu0 %vm1101_vm0, %v7397_v55  ;;  %v5479_v58 = vpack.c.bf16 %v3991_v57, %v3989_v6  ;;  %v3994_v13 = vld [vmem:[#allocation20 + $0x1b0] sm:$0xff]  ;;  %v4110_v57 = vld [vmem:[#allocation23 + $0x158] sm:$0xff] }
0x186e   : > { %5442 = vmatprep.subr.bf16.mxu0 %v5441_v3  ;;  %v4109_v6 = vld [vmem:[#allocation23 + $0x150] sm:$0xff] }
0x186f   : > { %v5517_v0 = vpack.c.bf16 %v4110_v57, %v4109_v6 }
0x1871   : > { %5444 = vmatpush3.bf16.msra.mxu0 %v5441_v3  ;;  %v5485_v3 = vpack.c.bf16 %v3994_v13, %v3992_v11 }
0x1872   : > { %5456 = vmatprep.subr.bf16.mxu0 %v5455_v15 }
0x1874   : > { %5100 = vmatmul.mubr.msk.f32.vlgmr.msra.gmra.mrb[18].mxu0 %vm1101_vm0, %v7395_v54  ;;  %v3973_v54 = vld [vmem:[#allocation20 + $0x108] sm:$0xff] }
0x1875   : > { %5458 = vmatpush3.bf16.msra.mxu0 %v5455_v15  ;;  %v5463_v29 = vpack.c.bf16 %v3975_v28, %v3973_v54  ;;  %v3998_v15 = vld [vmem:[#allocation20 + $0x1d0] sm:$0xff] }
0x1876   : > { %5460 = vmatprep.subr.bf16.mxu0 %v5459_v18  ;;  %v4100_v28 = vld [vmem:[#allocation23 + $0x108] sm:$0xff] }
0x1877   : > { %5464 = vmatprep.subr.bf16.mxu1 %v5463_v29  ;;  %v4118_v29 = vld [vmem:[#allocation23 + $0x198] sm:$0xff] }
0x1878   : > { %5466 = vmatpush1.bf16.msra.mxu1 %v5465_v34  ;;  %v4102_v34 = vld [vmem:[#allocation23 + $0x118] sm:$0xff] }
0x1879   : > { %5462 = vmatpush3.bf16.msra.mxu0 %v5459_v18  ;;  %v5489_v18 = vpack.c.bf16 %v3998_v15, %v3996_v5  ;;  %v4622_v5 = vld [vmem:[#allocation18 + $0x1] ss:$0 sm:$0xff] }
0x18f8   : > { %v5115_v19 = vpop.f32.mrb[34].mxu1 }
0x18f9   : > { %v3825_v20 = vpop.f32.mrb[35].mxu1 }
0x18fa   : > { %5124 = vmatprep.mubr.msk.f32.mxu0 %vm1101_vm0, %v3825_v20  ;;  %v4000_v20 = vld [vmem:[#allocation20 + $0x1e0] sm:$0xff] }
0x18fb   : > { %5125 = vmatmul.mubr.msk.f32.vlgmr.msra.gmra.mrb[18].mxu0 %vm1101_vm0, %v5115_v19  ;;  %v5491_v19 = vpack.c.bf16 %v4003_v17, %v4001_v16 }
0x19ce   : > { %v5126_v55 = vpop.f32.mrb[18].mxu0 }
0x19cf   : > { %v3918_v22 = vadd.f32 %v5126_v55, %v7313_v41  ;;  %v3906_v24 = vpop.f32.mrb[19].mxu0  ;;  %v5467_v41 = vpack.c.bf16 %v3979_v33, %v3977_v31  ;;  %v4002_v55 = vld [vmem:[#allocation20 + $0x1f0] sm:$0xff]  ;;  %v5499_v31 = vpack.c.bf16 %v4118_v29, %v4117_v1  ;;  %v4005_v29 = vld [vmem:[#allocation21 + $0x2] sm:$0x3] }
0x19d0   : > { %v3917_v25 = vadd.f32 %v3906_v24, %v7309_v37  ;;  %v3981_v37 = vld [vmem:[#allocation20 + $0x148] sm:$0xff]  ;;  %v4101_v33 = vld [vmem:[#allocation23 + $0x110] sm:$0xff] }
0x19d1   : > { %v7432_v9 = vadd.f32 %v4620_v21, %v3918_v22  ;;  %5468 = vmatprep.subr.bf16.mxu1 %v5467_v41  ;;  %v5471_v42 = vpack.c.bf16 %v3983_v38, %v3981_v37  ;;  %v4115_v22 = vld [vmem:[#allocation23 + $0x180] sm:$0xff]  ;;  %v4116_v24 = vld [vmem:[#allocation23 + $0x188] sm:$0xff]  ;;  %v5501_v7 = vpack.c.bf16 %v4102_v34, %v4101_v33 }
0x19d2   : > { %v7434_v26 = vadd.f32 %v4620_v21, %v3917_v25  ;;  %5470 = vmatpush1.bf16.msra.mxu1 %v5469_v2  ;;  %v5493_v21 = vpack.c.bf16 %v4002_v55, %v4000_v20  ;;  %v4099_v25 = vld [vmem:[#allocation23 + $0x100] sm:$0xff]  ;;  %v5495_v54 = vpack.c.bf16 %v4116_v24, %v4115_v22  ;;  %v4104_v2 = vld [vmem:[#allocation23 + $0x128] sm:$0xff]  ;;  %v4129_v24 = vld [vmem:[#allocation23 + $0x1f0] sm:$0xff] }
0x19d3   : > { %3935 = vadd.xlane.f32.xlu0 %v7432_v9  ;;  %5472 = vmatprep.subr.bf16.mxu1 %v5471_v42  ;;  %v5497_v30 = vpack.c.bf16 %v4100_v28, %v4099_v25  ;;  %v4119_v41 = vld [vmem:[#allocation23 + $0x1a0] sm:$0xff]  ;;  %v4121_v42 = vld [vmem:[#allocation23 + $0x1b0] sm:$0xff]  ;;  %v4130_v25 = vld [vmem:[#allocation23 + $0x1f8] sm:$0xff] }
0x19d4   : > { %3933 = vadd.xlane.f32.xlu1 %v7434_v26  ;;  %5496 = vmatprep.subr.bf16.mxu0 %v5495_v54  ;;  %v5503_v37 = vpack.c.bf16 %v4120_v35, %v4119_v41  ;;  %v4103_v38 = vld [vmem:[#allocation23 + $0x120] sm:$0xff]  ;;  %v5523_v54 = vpack.c.bf16 %v4130_v25, %v4129_v24  ;;  %v4114_v28 = vld [vmem:[#allocation23 + $0x178] sm:$0xff] }
0x19d5   : > { %5498 = vmatpush3.bf16.msra.mxu0 %v5497_v30  ;;  %v5505_v44 = vpack.c.bf16 %v4104_v2, %v4103_v38  ;;  %v4111_v55 = vld [vmem:[#allocation23 + $0x160] sm:$0xff]  ;;  %v4014_v30 = vrot.slane %v4005_v29, %v7164_v36 }
0x19d6   : > { %5474 = vmatpush1.bf16.msra.mxu1 %v5473_v47  ;;  %5500 = vmatprep.subr.bf16.mxu0 %v5499_v31  ;;  %v5507_v47 = vpack.c.bf16 %v4122_v43, %v4121_v42  ;;  %v4623_v36 = vld [vmem:[#allocation24 + $0x1] ss:$0 sm:$0xff] }
0x19d7   : > { %5476 = vmatprep.subr.bf16.mxu1 %v5475_v52  ;;  %v4125_v52 = vld [vmem:[#allocation23 + $0x1d0] sm:$0xff] }
0x19d9   : > { %5502 = vmatpush3.bf16.msra.mxu0 %v5501_v7 }
0x19da   : > { %5478 = vmatpush1.bf16.msra.mxu1 %v5477_v56  ;;  %5504 = vmatprep.subr.bf16.mxu0 %v5503_v37  ;;  %v5515_v56 = vpack.c.bf16 %v4126_v62, %v4125_v52 }
0x19db   : > { %5480 = vmatprep.subr.bf16.mxu1 %v5479_v58  ;;  %v4127_v58 = vld [vmem:[#allocation23 + $0x1e0] sm:$0xff] }
0x19dd   : > { %5506 = vmatpush3.bf16.msra.mxu0 %v5505_v44 }
0x19de   : > { %5482 = vmatpush1.bf16.msra.mxu1 %v5481_v4  ;;  %5508 = vmatprep.subr.bf16.mxu0 %v5507_v47  ;;  %v5519_v4 = vpack.c.bf16 %v4128_v63, %v4127_v58 }
0x19df   : > { %5484 = vmatprep.subr.bf16.mxu1 %v5483_v12 }
0x19e2   : > { %5486 = vmatpush1.bf16.msra.mxu1 %v5485_v3  ;;  %v4621_v3 = vld [vmem:[#allocation17 + $0x1] ss:$0 sm:$0xff] }
0x19e3   : > { %5488 = vmatprep.subr.bf16.mxu1 %v5487_v14 }
0x19e6   : > { %5490 = vmatpush1.bf16.msra.mxu1 %v5489_v18 }
0x19e7   : > { %5492 = vmatprep.subr.bf16.mxu1 %v5491_v19 }
0x19ea   : > { %5494 = vmatpush1.bf16.msra.mxu1 %v5493_v21  ;;  %v4112_v21 = vld [vmem:[#allocation23 + $0x168] sm:$0xff] }
0x19eb   : > { %v5521_v22 = vpack.c.bf16 %v4112_v21, %v4111_v55 }
0x1a60   : > { %v3936_v32 = vpop.xlane.xlu0 %3935 }
0x1a61   : > { %v3934_v46 = vpop.xlane.xlu1 %3933  ;;  %v3938_v60 = vmul.f32 0.0078125, %v3936_v32  ;;  %v4105_v32 = vld [vmem:[#allocation23 + $0x130] sm:$0xff] }
0x1a62   : > { %v3937_v48 = vmul.f32 0.0078125, %v3934_v46  ;;  %v4106_v46 = vld [vmem:[#allocation23 + $0x138] sm:$0xff] }
0x1a63   : > { %v7442_v39 = vsub.f32 %v7432_v9, %v3938_v60  ;;  %v4123_v60 = vld [vmem:[#allocation23 + $0x1c0] sm:$0xff] }
0x1a64   : > { %v7439_v49 = vsub.f32 %v7434_v26, %v3937_v48  ;;  %v4124_v48 = vld [vmem:[#allocation23 + $0x1c8] sm:$0xff] }
0x1a65   : > { %v3942_v51 = vmul.f32 %v7442_v39, %v7442_v39 }
0x1a66   : > { %v3941_v50 = vmul.f32 %v7439_v49, %v7439_v49 }
0x1a68   : > { %3943 = vadd.xlane.f32.xlu1 %v3941_v50  ;;  %v5509_v50 = vpack.c.bf16 %v4106_v46, %v4105_v32 }
0x1a6a   : > { %5510 = vmatpush3.bf16.msra.mxu0 %v5509_v50 }
0x1a6c   : > { %3945 = vadd.xlane.f32.xlu1 %v3942_v51  ;;  %v5511_v51 = vpack.c.bf16 %v4124_v48, %v4123_v60 }
0x1a6e   : > { %5512 = vmatprep.subr.bf16.mxu0 %v5511_v51 }
0x1a6f   : > { %5514 = vmatpush3.bf16.msra.mxu0 %v5513_v53 }
0x1a70   : > { %5516 = vmatprep.subr.bf16.mxu0 %v5515_v56 }
0x1a73   : > { %5518 = vmatpush3.bf16.msra.mxu0 %v5517_v0 }
0x1a74   : > { %5520 = vmatprep.subr.bf16.mxu0 %v5519_v4 }
0x1a77   : > { %5522 = vmatpush3.bf16.msra.mxu0 %v5521_v22 }
0x1a78   : > { %5524 = vmatprep.subr.bf16.mxu0 %v5523_v54 }
0x1af5   : > { %v3944_v8 = vpop.xlane.xlu1 %3943 }
0x1af6   : > { %v3947_v23 = vmul.f32 0.0078125, %v3944_v8 }
0x1af8   : > { %v3949_v11 = vadd.f32 1e-06, %v3947_v23 }
0x1af9   : > { %v3946_v12 = vpop.xlane.xlu1 %3945 }
0x1afa   : > { %5894 = vrsqrt.f32 %v3949_v11  ;;  %v3948_v13 = vmul.f32 0.0078125, %v3946_v12  ;;  %v4624_v11 = vld [vmem:[#allocation26] ss:$0 sm:$0xff] }
0x1afc   : > { %v3950_v27 = vadd.f32 1e-06, %v3948_v13  ;;  %v4625_v13 = vld [vmem:[#allocation27] ss:$0 sm:$0xff] }
0x1afe   : > { %5896 = vrsqrt.f32 %v3950_v27 }
0x1b04   : > { %v5895_v59 = vpop.eup %5894 }
0x1b05   : > { %v3953_v14 = vmul.f32 %v5895_v59, %v7439_v49  ;;  %v4113_v49 = vld [vmem:[#allocation23 + $0x170] sm:$0xff] }
0x1b06   : > { %v5525_v1 = vpack.c.bf16 %v4114_v28, %v4113_v49 }
0x1b07   : > { %v3961_v15 = vmul.f32 %v4621_v3, %v3953_v14 }
0x1b08   : > { %v5897_v16 = vpop.eup %5896  ;;  %5526 = vmatpush3.bf16.msra.mxu0 %v5525_v1 }
0x1b09   : > { %v3969_v17 = vadd.f32 %v4622_v5, %v3961_v15  ;;  %v3954_v18 = vmul.f32 %v5897_v16, %v7442_v39  ;;  %v4010_v39 = vrot.slane %v4005_v29, %v7159_v45 }
0x1b0b   : > { %4082 = vmatmul.mubr.f32.vlgmr.msra.gmra.mrb[36].mxu1 %v3969_v17  ;;  %v3962_v19 = vmul.f32 %v4621_v3, %v3954_v18 }
0x1b0c   : > { %4087 = vmatprep.mubr.f32.mxu1 %v6519_v10 }
0x1b0d   : > { %v3970_v20 = vadd.f32 %v4622_v5, %v3962_v19 }
0x1b0f   : > { %4088 = vmatmul.mubr.f32.gmra.mrb[38].mxu1 %v3970_v20 }
0x1bde   : > { %v4083_v10 = vpop.f32.mrb[36].mxu1 }
0x1bdf   : > { %v4084_v31 = vadd.f32 %v4083_v10, %v4010_v39  ;;  %v4085_v33 = vpop.f32.mrb[37].mxu1 }
0x1be0   : > { %v4086_v34 = vadd.f32 %v4085_v33, %v4014_v30 }
0x1be1   : > { %v4094_v7 = vmax.f32 %v4084_v31, 0.0 }
0x1be2   : > { %v4095_v41 = vmax.f32 %v4086_v34, 0.0  ;;  %v4089_v35 = vpop.f32.mrb[38].mxu1 }
0x1be3   : > { %v4090_v37 = vadd.f32 %v4089_v35, %v4010_v39  ;;  %v4091_v38 = vpop.f32.mrb[39].mxu1 }
0x1be4   : > { %v4092_v2 = vadd.f32 %v4091_v38, %v4014_v30  ;;  %4195 = vmatprep.mubr.f32.mxu0 %v4095_v41 }
0x1be5   : > { %4196 = vmatmul.mubr.f32.vlgmr.msra.gmra.mrb[20].mxu0 %v4094_v7  ;;  %v4096_v43 = vmax.f32 %v4090_v37, 0.0 }
0x1be6   : > { %v4097_v42 = vmax.f32 %v4092_v2, 0.0 }
0x1be8   : > { %4200 = vmatprep.mubr.f32.mxu0 %v4097_v42 }
0x1be9   : > { %4201 = vmatmul.mubr.f32.gmra.mrb[22].mxu0 %v4096_v43 }
0x1cb8   : > { %v4851_v44 = vpop.f32.mrb[20].mxu0 }
0x1cb9   : > { %v4852_v45 = vpop.f32.mrb[21].mxu0 }
0x1cba   : > { %v4853_v47 = vadd.f32 %v4852_v45, %v4851_v44 }
0x1cbc   : > { %v4206_v32 = vadd.f32 %v4853_v47, %v7434_v26  ;;  %v4854_v46 = vpop.f32.mrb[22].mxu0 }
0x1cbd   : > { %v4855_v60 = vpop.f32.mrb[23].mxu0 }
0x1cbe   : > { %v4856_v48 = vadd.f32 %v4855_v60, %v4854_v46  ;;  %v4216_v50 = vadd.f32 %v4623_v36, %v4206_v32 }
0x1cc0   : > { %v4207_v51 = vadd.f32 %v4856_v48, %v7432_v9  ;;  %4220 = vadd.xlane.f32.xlu1 %v4216_v50 }
0x1cc2   : > { %v4217_v40 = vadd.f32 %v4623_v36, %v4207_v51 }
0x1cc4   : > { %4222 = vadd.xlane.f32.xlu0 %v4217_v40 }
0x1d4d   : > { %v4221_v61 = vpop.xlane.xlu1 %4220 }
0x1d4e   : > { %v4224_v52 = vmul.f32 0.0078125, %v4221_v61 }
0x1d50   : > { %v4226_v62 = vsub.f32 %v4216_v50, %v4224_v52 }
0x1d51   : > { %v4223_v53 = vpop.xlane.xlu0 %4222 }
0x1d52   : > { %v4225_v56 = vmul.f32 0.0078125, %v4223_v53  ;;  %v4228_v6 = vmul.f32 %v4226_v62, %v4226_v62 }
0x1d54   : > { %v4227_v57 = vsub.f32 %v4217_v40, %v4225_v56  ;;  %4230 = vadd.xlane.f32.xlu1 %v4228_v6 }
0x1d56   : > { %v4229_v58 = vmul.f32 %v4227_v57, %v4227_v57 }
0x1d58   : > { %4232 = vadd.xlane.f32.xlu0 %v4229_v58 }
0x1de1   : > { %v4231_v26 = vpop.xlane.xlu1 %4230 }
0x1de2   : > { %v4234_v63 = vmul.f32 0.0078125, %v4231_v26 }
0x1de4   : > { %v4236_v0 = vadd.f32 1e-06, %v4234_v63 }
0x1de5   : > { %v4233_v4 = vpop.xlane.xlu0 %4232 }
0x1de6   : > { %5898 = vrsqrt.f32 %v4236_v0  ;;  %v4235_v9 = vmul.f32 0.0078125, %v4233_v4 }
0x1de8   : > { %v4237_v8 = vadd.f32 1e-06, %v4235_v9 }
0x1dea   : > { %5900 = vrsqrt.f32 %v4237_v8 }
0x1df0   : > { %v5899_v23 = vpop.eup %5898 }
0x1df1   : > { %v4240_v12 = vmul.f32 %v5899_v23, %v4226_v62 }
0x1df3   : > { %v4248_v27 = vmul.f32 %v4624_v11, %v4240_v12 }
0x1df4   : > { %v5901_v59 = vpop.eup %5900 }
0x1df5   : > { %v4256_v3 = vadd.f32 %v4625_v13, %v4248_v27  ;;  %v4241_v14 = vmul.f32 %v5901_v59, %v4227_v57 }
0x1df7   : > { %v4249_v5 = vmul.f32 %v4624_v11, %v4241_v14  ;;  %4258 = vst [vmem:[%s811_s22] sm:$0xff] %v4256_v3 }
0x1df9   : > { %v4257_v15 = vadd.f32 %v4625_v13, %v4249_v5 }
0x1dfb   : > { %4259 = vst [vmem:[%s811_s22 + $0x8] sm:$0xff] %v4257_v15 }
0x1dfc   : > { %6396 = shalt.err (!%p6393_p10)
}
0x1dfd   : > { %s6397_s18 = scalar_lea.hbm %s7461_s10, 256  ;;  %s6401_s28 = scalar_lea.hbm %s7639_s17, 512 }
0x1dfe   : > { %p6398_p7 = scmp.ne.s32.totalorder %s7461_s10, %s6397_s18  ;;  %p6402_p4 = scmp.lt.u32.totalorder %s7461_s10, %s7639_s17 }
0x1dff   : > { %p6403_p3 = scmp.lt.u32.totalorder %s6401_s28, %s6397_s18  ;;  %p6405_p0 = scmp.lt.u32.totalorder %s6397_s18, %s7461_s10 }
0x1e00   : > { %p6399_p13 = pnand %p6398_p7, %p7640_p2 }
0x1e01   : > { %p6404_p12 = por %p6403_p3, %p6402_p4 }
0x1e02   : > { %p6400_p1 = pneg %p6399_p13 }
0x1e03   : > { %p6406_p9 = por %p6405_p0, %p6404_p12 }
0x1e05   : > { %p6407_p8 = pnand %p6406_p9, %p6400_p1 }
0x1e07   : > { %6410 = shalt.err (!%p6407_p8)
}
0x1e08   : > { %s6524_s1 = smov 128   ;;  %s6525_s22 = smov 8  }
0x1e09   : > { %5603 = dma.vmem_to_hbm [thread:$0]  (%p7640_p2), %s7463_s30, 256, %s7461_s10, %s4261_s14, %s6524_s1, %s6524_s1, %s6525_s22  }
0x1e0a PF: > { %s7641_s9 = sld [smem:[#allocation42_spill]]  ;;  %s7642_s3 = sld [smem:[#allocation47_spill]] }
0x1e0b   : > { %p7644_p11 = scmp.ge.s32.totalorder %s6489_s27, 2 }
0x1e10   : > { %s4289_s6 = sand.u32 1, %s7641_s9   ;;  %p7643_p5 = scmp.ne.s32.totalorder %s7642_s3, 0 }
0x1e11   : > { %s4290_s0 = scalar_lea.sflag [#allocation4], %s4289_s6 }
0x1e12   : > { %p5659_p6 = pnand %p7644_p11, %p7643_p5 }
0x1e14   : > { %6472 = dma.done.wait (!%p5659_p6), %s4290_s0, 256  }
0x1e15   : > { %6474 = vsyncadd (!%p5659_p6), %s4290_s0, 4294967040  ;;  %s7645_s27 = sld [smem:[#allocation44_spill]]  ;;  %s7646_s29 = sld [smem:[#allocation45_spill]] }
0x1e16   : > { %s7647_s24 = smov %s6481_s25  ;;  %s7648_s25 = smov %s6485_s26 }
0x1e1b   : > { %p38_p10 = scmp.ge.s32.totalorder %s7645_s27, 4   ;;  %s7649_s26 = smov %s7646_s29 }
0x1e1d   :  { %40 = sbr.rel (!%p38_p10) target bundleno = 30 (0x1e), region = 216 }
0x1e24   :  { %4295 = vsyncpa [#allocation3], 1 }
0x1e25   :  { %4297 = vsyncpa [#allocation3 + $0x1], 1 }
0x1e26   :  { %4298 = vsyncpa [#allocation6], 1 }
0x1e27   :  { %4299 = vsyncpa [#allocation10], 1 }
0x1e28   :  { %4300 = vsyncpa [#allocation13], 1 }
0x1e29   :  { %4301 = vsyncpa [#allocation16], 1 }
0x1e2a   :  { %4302 = vsyncpa [#allocation19], 1 }
0x1e2b   :  { %4303 = vsyncpa [#allocation22], 1 }
0x1e2c   :  { %4304 = vsyncpa [#allocation25], 1 }
0x1e2d   :  { %4305 = vsyncpa [#allocation28], 1 }
0x1e2e   :  { %4306 = vsyncpa [#allocation4], 1 }
0x1e2f   :  { %4308 = vsyncpa [#allocation4 + $0x1], 1 }

</bundles_post_ra>
